<compile_context>
chip_gen: v5e
topology: v5e:2x2
jax: 0.10.0
libtpu: 0.0.40
codegen_flags: <defaults>
</compile_context>

<pallas_src>
import functools
import math

import jax
import jax.numpy as jnp
from jax import lax
from jax.experimental import pallas as pl
from jax.experimental.pallas import tpu as pltpu


def _detect_big_vmem():
    # v4/v5e/v6e have 128 MiB VMEM per core; v7x has 64 MiB.  Default to the conservative
    # (v7x-safe) budget when unsure.
    try:
        kind = jax.devices()[0].device_kind.lower()
    except Exception:
        return False
    return any(tag in kind for tag in ("v4", "v5", "v6"))


_BIG_VMEM = _detect_big_vmem()
_BAND_BUDGET = (24 if _BIG_VMEM else 8) * 1024 * 1024
_VMEM_LIMIT = (100 if _BIG_VMEM else 48) * 1024 * 1024


def _leaky(v, slope):
    return jnp.where(v >= 0, v, slope * v)


def _largest_divisor(n, cap):
    cap = max(1, min(cap, n))
    for t in range(cap, 0, -1):
        if n % t == 0:
            return t
    return n


def _const_spec(shape):
    zeros = (0,) * len(shape)
    return pl.BlockSpec(shape, lambda b, j: zeros)


# ----------------------------------------------------------------------------------
# Fused DepthConvBlock4: DepthConv (1x1 + LeakyReLU -> 3x3 depthwise -> 1x1 + adaptor
# residual) + gated ConvFFN3, one pallas_call over spatial row bands.
# Input / output layout: (B, H, 2, W/2, C)  (axis 2 = column parity), bf16.
# ----------------------------------------------------------------------------------
def depth_conv_block4(x, p, *, row_tile=None):
    x = x.astype(jnp.bfloat16)
    B, H, PH, Wo, Cin = x.shape
    assert PH == 2 and Wo >= 2
    W = 2 * Wo
    Cout = p["w2"].shape[1]
    internal = p["fw2"].shape[0]
    assert p["fw1"].shape == (Cout, 2 * internal)
    has_adaptor = "wa" in p
    if not has_adaptor:
        assert Cin == Cout

    if row_tile is None:
        row_bytes = W * 4 * (6 * Cin + 10 * Cout)      # conservative live-f32 estimate
        cap = max(1, _BAND_BUDGET // max(row_bytes, 1))
        if not _BIG_VMEM:                              # v7x: keep >=2 bands for the 2 TCs
            cap = min(cap, max(1, (H * B) // 2))
        row_tile = _largest_divisor(H, cap)
    Th = row_tile
    assert H % Th == 0
    nb = H // Th

    bf = jnp.bfloat16

    def kernel(x_ref, xt_ref, xb_ref, *rest):
        if has_adaptor:
            (wa, ba, w1, b1, dwr, dbr, w2, b2,
             f1v, f1vb, f1g, f1gb, f2, f2b, o_ref) = rest
        else:
            (w1, b1, dwr, dbr, w2, b2,
             f1v, f1vb, f1g, f1gb, f2, f2b, o_ref) = rest

        j = pl.program_id(1)
        nb_ = pl.num_programs(1)

        xm = x_ref[0]                                       # (Th, 2, Wo, Cin) bf16
        x_all = jnp.concatenate([xt_ref[0], xm, xb_ref[0]], axis=0)   # (Th+2, 2, Wo, Cin)
        n_all = (Th + 2) * 2 * Wo
        n_m = Th * 2 * Wo

        # --- DepthConv conv1: 1x1 (bf16 MXU, f32 acc) + LeakyReLU, main + halo rows ---
        t = jnp.dot(x_all.reshape(n_all, Cin), w1[...],
                    preferred_element_type=jnp.float32) + b1[...]
        t = _leaky(t, 0.01)
        t = t.reshape(Th + 2, 2, Wo, Cin)
        # Halo rows outside the image must be the depthwise's ZERO padding (not LReLU(b1)).
        tv = (j > 0).astype(jnp.float32)
        bv = (j < nb_ - 1).astype(jnp.float32)
        t = jnp.concatenate([t[0:1] * tv, t[1:Th + 1], t[Th + 1:] * bv], axis=0)

        # --- 3x3 depthwise, column-phase-split (f32 VPU taps, major-dim row slices) ---
        te = t[:, 0]                                        # even cols   (Th+2, Wo, Cin)
        to = t[:, 1]                                        # odd  cols
        zc = jnp.zeros((Th + 2, 1, Cin), jnp.float32)
        to_r = jnp.concatenate([zc, to[:, :Wo - 1, :]], axis=1)   # odd cols, shifted right
        te_l = jnp.concatenate([te[:, 1:, :], zc], axis=1)        # even cols, shifted left
        # per-tap column sources in the (phase, wo) output layout
        src_m1 = jnp.concatenate([to_r[:, None], te[:, None]], axis=1)   # input col w-1
        src_p1 = jnp.concatenate([to[:, None], te_l[:, None]], axis=1)   # input col w+1
        col_srcs = (src_m1, t, src_p1)

        acc = jnp.zeros((Th, 2, Wo, Cin), jnp.float32)
        for dx in range(3):
            s = col_srcs[dx]
            for dy in range(3):
                acc = acc + s[dy:dy + Th] * dwr[dy, dx, :]
        acc = acc + dbr[...]

        # --- conv2 (1x1) + adaptor residual (bf16 MXU) ---
        xm2 = xm.reshape(n_m, Cin)                          # bf16
        acc_bf = acc.reshape(n_m, Cin).astype(bf)
        u = jnp.dot(acc_bf, w2[...], preferred_element_type=jnp.float32) + b2[...]
        if has_adaptor:
            u = u + (jnp.dot(xm2, wa[...], preferred_element_type=jnp.float32) + ba[...])
        else:
            u = u + xm2.astype(jnp.float32)

        # --- gated ConvFFN3 (value/gate weights pre-split; bf16 MXU) ---
        u_bf = u.astype(bf)
        hv = jnp.dot(u_bf, f1v[...], preferred_element_type=jnp.float32) + f1vb[...]
        hg = jnp.dot(u_bf, f1g[...], preferred_element_type=jnp.float32) + f1gb[...]
        gated = (hv * jnp.maximum(hg, 0.0)).astype(bf)
        v = jnp.dot(gated, f2[...], preferred_element_type=jnp.float32) + f2b[...]
        o_ref[0] = (u + v).reshape(Th, 2, Wo, Cout).astype(o_ref.dtype)

    # main band + two clamped single-row halo views of the same array (no jnp.pad pass)
    x_main = pl.BlockSpec((1, Th, 2, Wo, Cin), lambda b, j: (b, j, 0, 0, 0))
    x_top = pl.BlockSpec((1, 1, 2, Wo, Cin),
                         lambda b, j: (b, jnp.maximum(j * Th - 1, 0), 0, 0, 0))
    x_bot = pl.BlockSpec((1, 1, 2, Wo, Cin),
                         lambda b, j: (b, jnp.minimum((j + 1) * Th, H - 1), 0, 0, 0))

    f32 = jnp.float32
    weights = []
    if has_adaptor:
        weights += [p["wa"].astype(bf), p["ba"].reshape(1, -1).astype(f32)]
    weights += [
        p["w1"].astype(bf), p["b1"].reshape(1, -1).astype(f32),
        p["dw"].astype(f32), p["db"].reshape(1, -1).astype(f32),
        p["w2"].astype(bf), p["b2"].reshape(1, -1).astype(f32),
        p["fw1"][:, :internal].astype(bf), p["fb1"][:internal].reshape(1, -1).astype(f32),
        p["fw1"][:, internal:].astype(bf), p["fb1"][internal:].reshape(1, -1).astype(f32),
        p["fw2"].astype(bf), p["fb2"].reshape(1, -1).astype(f32),
    ]

    in_specs = [x_main, x_top, x_bot] + [_const_spec(w.shape) for w in weights]
    args = [x, x, x] + weights

    return pl.pallas_call(
        kernel,
        out_shape=jax.ShapeDtypeStruct((B, H, 2, Wo, Cout), jnp.bfloat16),
        grid=(B, nb),
        in_specs=in_specs,
        out_specs=pl.BlockSpec((1, Th, 2, Wo, Cout), lambda b, j: (b, j, 0, 0, 0)),
        compiler_params=pltpu.CompilerParams(
            dimension_semantics=("parallel", "parallel"),
            vmem_limit_bytes=_VMEM_LIMIT),
    )(*args)


# ----------------------------------------------------------------------------------
# Fused 3x3 / stride-2 / pad-1 conv (+ optional fused LeakyReLU).
# Input layout: (B, Hin, 2, Win/2, Cin) column-phase-split, bf16.
# Output layout: plain (B, Hin/2, Win/2, Cout), bf16.
# Row parity is obtained for free from a (Hin -> Hin/2, 2) reshape + three BlockSpec views
# (even rows, odd rows, 1-row top halo); the 9 taps are contiguous slices -> 9 bf16 MXU
# matmuls, no strided deinterleaves anywhere.
# ----------------------------------------------------------------------------------
def conv3x3_stride2_split(x, w, b, *, slope=None, row_tile=None):
    x = x.astype(jnp.bfloat16)
    B, Hin, PH, Woin, Cin = x.shape
    assert PH == 2 and Woin >= 2 and Hin % 2 == 0
    Cout = w.shape[-1]
    assert w.shape == (3, 3, Cin, Cout)
    Hout = Hin // 2
    Wout = Woin

    # free major-dim split of rows into (row-pair, row-phase)
    xr = x.reshape(B, Hout, 2, 2, Woin, Cin)

    if row_tile is None:
        row_bytes = Wout * 4 * (6 * Cin + 3 * Cout)
        cap = max(1, _BAND_BUDGET // max(row_bytes, 1))
        if not _BIG_VMEM:
            cap = min(cap, max(1, (Hout * B) // 2))
        row_tile = _largest_divisor(Hout, cap)
    T = row_tile
    assert Hout % T == 0
    nb = Hout // T

    wb = w.astype(jnp.bfloat16)
    b2 = b.reshape(1, Cout).astype(jnp.float32)

    def kernel(xe_ref, xo_ref, xh_ref, w_ref, b_ref, o_ref):
        j = pl.program_id(1)
        ev = xe_ref[0, :, 0]                               # rows 2*oh    (T, 2, Wo, Cin)
        od = xo_ref[0, :, 0]                               # rows 2*oh+1
        top_valid = (j > 0).astype(ev.dtype)
        halo = xh_ref[0, 0, 0] * top_valid                 # row 2*j*T-1  (2, Wo, Cin)
        if T > 1:
            rows_m1 = jnp.concatenate([halo[None], od[:T - 1]], axis=0)   # rows 2*oh-1
        else:
            rows_m1 = halo[None]
        row_srcs = (rows_m1, ev, od)

        zcol = jnp.zeros((T, 1, Cin), ev.dtype)
        acc = jnp.zeros((T * Wout, Cout), jnp.float32)
        for dy in range(3):
            r = row_srcs[dy]
            c_even = r[:, 0]                               # input col 2*ow     (dx=1)
            c_odd = r[:, 1]                                # input col 2*ow+1   (dx=2)
            c_left = jnp.concatenate([zcol, c_odd[:, :Wout - 1, :]], axis=1)   # 2*ow-1
            for dx, src in ((0, c_left), (1, c_even), (2, c_odd)):
                acc = acc + jnp.dot(src.reshape(T * Wout, Cin), w_ref[dy, dx],
                                    preferred_element_type=jnp.float32)
        y = acc + b_ref[...]
        if slope is not None:
            y = _leaky(y, slope)
        o_ref[0] = y.reshape(T, Wout, Cout).astype(o_ref.dtype)

    ev_spec = pl.BlockSpec((1, T, 1, 2, Woin, Cin), lambda bi, j: (bi, j, 0, 0, 0, 0))
    od_spec = pl.BlockSpec((1, T, 1, 2, Woin, Cin), lambda bi, j: (bi, j, 1, 0, 0, 0))
    halo_spec = pl.BlockSpec((1, 1, 1, 2, Woin, Cin),
                             lambda bi, j: (bi, jnp.maximum(j * T - 1, 0), 1, 0, 0, 0))

    return pl.pallas_call(
        kernel,
        out_shape=jax.ShapeDtypeStruct((B, Hout, Wout, Cout), jnp.bfloat16),
        grid=(B, nb),
        in_specs=[ev_spec, od_spec, halo_spec,
                  _const_spec((3, 3, Cin, Cout)),
                  _const_spec((1, Cout))],
        out_specs=pl.BlockSpec((1, T, Wout, Cout), lambda bi, j: (bi, j, 0, 0)),
        compiler_params=pltpu.CompilerParams(
            dimension_semantics=("parallel", "parallel"),
            vmem_limit_bytes=_VMEM_LIMIT),
    )(xr, xr, xr, wb, b2)


# ----------------------------------------------------------------------------------
# Parameter init (deterministic, synthetic)
# ----------------------------------------------------------------------------------
def _init_conv1x1(key, cin, cout):
    kw, kb = jax.random.split(key)
    w = jax.random.normal(kw, (cin, cout), jnp.float32) / math.sqrt(cin)
    b = jax.random.normal(kb, (cout,), jnp.float32) * 0.01
    return w, b


def _init_conv3x3(key, cin, cout):
    kw, kb = jax.random.split(key)
    w = jax.random.normal(kw, (3, 3, cin, cout), jnp.float32) / math.sqrt(cin * 9)
    b = jax.random.normal(kb, (cout,), jnp.float32) * 0.01
    return w, b


def _init_dw3x3(key, c):
    kw, kb = jax.random.split(key)
    w = jax.random.normal(kw, (3, 3, c), jnp.float32) / 3.0
    b = jax.random.normal(kb, (c,), jnp.float32) * 0.01
    return w, b


def init_depth_conv_block4(key, cin, cout):
    ks = jax.random.split(key, 6)
    p = {}
    p["w1"], p["b1"] = _init_conv1x1(ks[0], cin, cin)
    p["dw"], p["db"] = _init_dw3x3(ks[1], cin)
    p["w2"], p["b2"] = _init_conv1x1(ks[2], cin, cout)
    if cin != cout:
        p["wa"], p["ba"] = _init_conv1x1(ks[3], cin, cout)
    internal = 2 * cout
    p["fw1"], p["fb1"] = _init_conv1x1(ks[4], cout, 2 * internal)
    p["fw2"], p["fb2"] = _init_conv1x1(ks[5], internal, cout)
    return p


def init_hyper_encoder(key, N=256, z_channel=128):
    ks = jax.random.split(key, 3)
    return {
        "block": init_depth_conv_block4(ks[0], N, z_channel),
        "conv1": _init_conv3x3(ks[1], z_channel, z_channel),
        "conv2": _init_conv3x3(ks[2], z_channel, z_channel),
    }


# ----------------------------------------------------------------------------------
# HyperEncoder forward (NCHW f32 in / NCHW f32 out)
# ----------------------------------------------------------------------------------
def hyper_encoder(params, x_nchw, *, block_rows=None, conv_rows=None):
    B, C, H, W = x_nchw.shape
    assert H % 4 == 0 and W % 4 == 0
    Wo = W // 2
    # single XLA transpose: NCHW -> column-phase-split NHWC (B, H, 2, W/2, C), bf16
    x = x_nchw.reshape(B, C, H, Wo, 2).transpose(0, 2, 4, 3, 1).astype(jnp.bfloat16)

    y = depth_conv_block4(x, params["block"], row_tile=block_rows)   # (B, H, 2, Wo, 128)
    w1, b1 = params["conv1"]
    y = conv3x3_stride2_split(y, w1, b1, slope=0.01, row_tile=conv_rows)  # (B,H/2,W/2,128)
    # tiny re-split pass for the second stride-2 conv
    H1, W1 = H // 2, W // 2
    y = y.reshape(B, H1, W1 // 2, 2, y.shape[-1]).transpose(0, 1, 3, 2, 4)
    w2, b2 = params["conv2"]
    y = conv3x3_stride2_split(y, w2, b2, slope=None, row_tile=conv_rows)  # (B,H/4,W/4,128)
    return jnp.transpose(y, (0, 3, 1, 2)).astype(jnp.float32)             # NCHW f32


# ----------------------------------------------------------------------------------
# Pure-JAX reference (correctness check only; f32 / HIGHEST precision)
# ----------------------------------------------------------------------------------
def hyper_encoder_ref(params, x_nchw):
    hi = lax.Precision.HIGHEST
    x = jnp.transpose(x_nchw, (0, 2, 3, 1)).astype(jnp.float32)
    p = params["block"]

    def conv1x1(v, w, b):
        return jnp.einsum("bhwc,cd->bhwd", v, w, precision=hi) + b

    t = _leaky(conv1x1(x, p["w1"], p["b1"]), 0.01)
    dwk = p["dw"][:, :, None, :]
    t = lax.conv_general_dilated(t, dwk, (1, 1), ((1, 1), (1, 1)),
                                 dimension_numbers=("NHWC", "HWIO", "NHWC"),
                                 feature_group_count=t.shape[-1], precision=hi) + p["db"]
    u = conv1x1(t, p["w2"], p["b2"])
    idn = conv1x1(x, p["wa"], p["ba"]) if "wa" in p else x
    u = u + idn
    internal = p["fw2"].shape[0]
    hg = conv1x1(u, p["fw1"], p["fb1"])
    gated = hg[..., :internal] * jnp.maximum(hg[..., internal:], 0.0)
    y = u + conv1x1(gated, p["fw2"], p["fb2"])

    def conv_s2(v, w, b):
        return lax.conv_general_dilated(v, w, (2, 2), ((1, 1), (1, 1)),
                                        dimension_numbers=("NHWC", "HWIO", "NHWC"),
                                        precision=hi) + b

    y = conv_s2(y, *params["conv1"])
    y = _leaky(y, 0.01)
    y = conv_s2(y, *params["conv2"])
    return jnp.transpose(y, (0, 3, 1, 2))


# ----------------------------------------------------------------------------------
if __name__ == "__main__":
    key = jax.random.PRNGKey(0)
    kp, kx = jax.random.split(key)

    N, Z = 256, 128
    B, H, W = 2, 16, 16
    params = init_hyper_encoder(kp, N=N, z_channel=Z)
    x = jax.random.normal(kx, (B, N, H, W), jnp.float32)            # NCHW latent

    # Small explicit row tiles exercise the multi-band / halo paths at this toy size.
    fwd = jax.jit(functools.partial(hyper_encoder, block_rows=4, conv_rows=2))
    y = jax.block_until_ready(fwd(params, x))
    assert y.shape == (B, Z, H // 4, W // 4), y.shape
    assert bool(jnp.all(jnp.isfinite(y)))

    y_ref = hyper_encoder_ref(params, x)
    # bf16 MXU inputs (f32 accumulation) vs. an f32 HIGHEST-precision reference:
    # typical max-normalized error ~1e-2.
    rel_err = float(jnp.max(jnp.abs(y - y_ref)) / (jnp.max(jnp.abs(y_ref)) + 1e-6))
    assert rel_err < 5e-2, f"mismatch vs pure-JAX reference: rel_err={rel_err}"

    # Auto-tiled (default) path must also run and match.
    y2 = jax.block_until_ready(jax.jit(hyper_encoder)(params, x))
    rel_err2 = float(jnp.max(jnp.abs(y2 - y_ref)) / (jnp.max(jnp.abs(y_ref)) + 1e-6))
    assert rel_err2 < 5e-2, f"auto-tile mismatch vs reference: rel_err={rel_err2}"

    print("KERNEL_OK")
</pallas_src>

<mosaic_0001>
module attributes {stable_mosaic.version = 11 : i64} {
  func.func @kernel(%arg0: i32, %arg1: i32, %arg2: memref<1x4x2x8x256xbf16, #tpu.memory_space<vmem>>, %arg3: memref<1x1x2x8x256xbf16, #tpu.memory_space<vmem>>, %arg4: memref<1x1x2x8x256xbf16, #tpu.memory_space<vmem>>, %arg5: memref<256x128xbf16, #tpu.memory_space<vmem>>, %arg6: memref<1x128xf32, #tpu.memory_space<vmem>>, %arg7: memref<256x256xbf16, #tpu.memory_space<vmem>>, %arg8: memref<1x256xf32, #tpu.memory_space<vmem>>, %arg9: memref<3x3x256xf32, #tpu.memory_space<vmem>>, %arg10: memref<1x256xf32, #tpu.memory_space<vmem>>, %arg11: memref<256x128xbf16, #tpu.memory_space<vmem>>, %arg12: memref<1x128xf32, #tpu.memory_space<vmem>>, %arg13: memref<128x256xbf16, #tpu.memory_space<vmem>>, %arg14: memref<1x256xf32, #tpu.memory_space<vmem>>, %arg15: memref<128x256xbf16, #tpu.memory_space<vmem>>, %arg16: memref<1x256xf32, #tpu.memory_space<vmem>>, %arg17: memref<256x128xbf16, #tpu.memory_space<vmem>>, %arg18: memref<1x128xf32, #tpu.memory_space<vmem>>, %arg19: memref<1x4x2x8x128xbf16, #tpu.memory_space<vmem>>) attributes {dimension_semantics = [#tpu.dimension_semantics<parallel>, #tpu.dimension_semantics<parallel>], iteration_bounds = array<i64: 2, 4>, scalar_prefetch = 0 : i64, scratch_operands = 0 : i64, tpu.core_type = #tpu.core_type<tc>, window_params = [{transform_indices = @transform_0, window_bounds = array<i64: 1, 4, 2, 8, 256>}, {transform_indices = @transform_1, window_bounds = array<i64: 1, 1, 2, 8, 256>}, {transform_indices = @transform_2, window_bounds = array<i64: 1, 1, 2, 8, 256>}, {pipeline_mode = #tpu.pipeline_mode<synchronous>, transform_indices = @transform_3, window_bounds = array<i64: 256, 128>}, {pipeline_mode = #tpu.pipeline_mode<synchronous>, transform_indices = @transform_4, window_bounds = array<i64: 1, 128>}, {pipeline_mode = #tpu.pipeline_mode<synchronous>, transform_indices = @transform_5, window_bounds = array<i64: 256, 256>}, {pipeline_mode = #tpu.pipeline_mode<synchronous>, transform_indices = @transform_6, window_bounds = array<i64: 1, 256>}, {pipeline_mode = #tpu.pipeline_mode<synchronous>, transform_indices = @transform_7, window_bounds = array<i64: 3, 3, 256>}, {pipeline_mode = #tpu.pipeline_mode<synchronous>, transform_indices = @transform_8, window_bounds = array<i64: 1, 256>}, {pipeline_mode = #tpu.pipeline_mode<synchronous>, transform_indices = @transform_9, window_bounds = array<i64: 256, 128>}, {pipeline_mode = #tpu.pipeline_mode<synchronous>, transform_indices = @transform_10, window_bounds = array<i64: 1, 128>}, {pipeline_mode = #tpu.pipeline_mode<synchronous>, transform_indices = @transform_11, window_bounds = array<i64: 128, 256>}, {pipeline_mode = #tpu.pipeline_mode<synchronous>, transform_indices = @transform_12, window_bounds = array<i64: 1, 256>}, {pipeline_mode = #tpu.pipeline_mode<synchronous>, transform_indices = @transform_13, window_bounds = array<i64: 128, 256>}, {pipeline_mode = #tpu.pipeline_mode<synchronous>, transform_indices = @transform_14, window_bounds = array<i64: 1, 256>}, {pipeline_mode = #tpu.pipeline_mode<synchronous>, transform_indices = @transform_15, window_bounds = array<i64: 256, 128>}, {pipeline_mode = #tpu.pipeline_mode<synchronous>, transform_indices = @transform_16, window_bounds = array<i64: 1, 128>}, {transform_indices = @transform_17, window_bounds = array<i64: 1, 4, 2, 8, 128>}]} {
    %c0 = arith.constant 0 : index
    %c0_0 = arith.constant 0 : index
    %c0_1 = arith.constant 0 : index
    %c0_2 = arith.constant 0 : index
    %c0_3 = arith.constant 0 : index
    %0 = vector.load %arg2[%c0, %c0_0, %c0_1, %c0_2, %c0_3] : memref<1x4x2x8x256xbf16, #tpu.memory_space<vmem>>, vector<1x4x2x8x256xbf16>
    %1 = vector.shape_cast %0 : vector<1x4x2x8x256xbf16> to vector<4x2x8x256xbf16>
    %c0_4 = arith.constant 0 : index
    %c0_5 = arith.constant 0 : index
    %c0_6 = arith.constant 0 : index
    %c0_7 = arith.constant 0 : index
    %c0_8 = arith.constant 0 : index
    %2 = vector.load %arg3[%c0_4, %c0_5, %c0_6, %c0_7, %c0_8] : memref<1x1x2x8x256xbf16, #tpu.memory_space<vmem>>, vector<1x1x2x8x256xbf16>
    %3 = vector.shape_cast %2 : vector<1x1x2x8x256xbf16> to vector<1x2x8x256xbf16>
    %c0_9 = arith.constant 0 : index
    %c0_10 = arith.constant 0 : index
    %c0_11 = arith.constant 0 : index
    %c0_12 = arith.constant 0 : index
    %c0_13 = arith.constant 0 : index
    %4 = vector.load %arg4[%c0_9, %c0_10, %c0_11, %c0_12, %c0_13] : memref<1x1x2x8x256xbf16, #tpu.memory_space<vmem>>, vector<1x1x2x8x256xbf16>
    %5 = vector.shape_cast %4 : vector<1x1x2x8x256xbf16> to vector<1x2x8x256xbf16>
    %6 = tpu.concatenate %3, %1, %5 in 0 : vector<1x2x8x256xbf16>, vector<4x2x8x256xbf16>, vector<1x2x8x256xbf16> -> vector<6x2x8x256xbf16>
    %7 = vector.shape_cast %6 : vector<6x2x8x256xbf16> to vector<96x256xbf16>
    %c0_14 = arith.constant 0 : index
    %c0_15 = arith.constant 0 : index
    %8 = vector.load %arg7[%c0_14, %c0_15] : memref<256x256xbf16, #tpu.memory_space<vmem>>, vector<256x256xbf16>
    %cst = arith.constant dense<0.000000e+00> : vector<96x256xf32>
    %9 = tpu.matmul %7, %8, %cst {dimension_numbers = #tpu.dot_dimension_numbers<[1], [0], [0], [1], [0, 0, 1, 1], [], []>} : vector<96x256xbf16>, vector<256x256xbf16>, vector<96x256xf32> -> vector<96x256xf32>
    %c0_16 = arith.constant 0 : index
    %c0_17 = arith.constant 0 : index
    %10 = vector.load %arg8[%c0_16, %c0_17] : memref<1x256xf32, #tpu.memory_space<vmem>>, vector<1x256xf32>
    %11 = vector.broadcast %10 : vector<1x256xf32> to vector<96x256xf32>
    %12 = arith.addf %9, %11 : vector<96x256xf32>
    %cst_18 = arith.constant 0.000000e+00 : f32
    %13 = vector.broadcast %cst_18 : f32 to vector<96x256xf32>
    %14 = arith.cmpf oge, %12, %13 : vector<96x256xf32>
    %cst_19 = arith.constant 0.00999999977 : f32
    %15 = vector.broadcast %cst_19 : f32 to vector<96x256xf32>
    %16 = arith.mulf %15, %12 : vector<96x256xf32>
    %17 = arith.select %14, %12, %16 : vector<96x256xi1>, vector<96x256xf32>
    %18 = vector.shape_cast %17 : vector<96x256xf32> to vector<6x2x8x256xf32>
    %c0_i32 = arith.constant 0 : i32
    %19 = arith.cmpi sgt, %arg1, %c0_i32 : i32
    %20 = arith.extui %19 : i1 to i32
    %21 = arith.sitofp %20 : i32 to f32
    %c3_i32 = arith.constant 3 : i32
    %22 = arith.cmpi slt, %arg1, %c3_i32 : i32
    %23 = arith.extui %22 : i1 to i32
    %24 = arith.sitofp %23 : i32 to f32
    %25 = vector.extract_strided_slice %18 {offsets = [0, 0, 0, 0], sizes = [1, 2, 8, 256], strides = [1, 1, 1, 1]} : vector<6x2x8x256xf32> to vector<1x2x8x256xf32>
    %26 = vector.broadcast %21 : f32 to vector<1x2x8x256xf32>
    %27 = arith.mulf %25, %26 : vector<1x2x8x256xf32>
    %28 = vector.extract_strided_slice %18 {offsets = [1, 0, 0, 0], sizes = [4, 2, 8, 256], strides = [1, 1, 1, 1]} : vector<6x2x8x256xf32> to vector<4x2x8x256xf32>
    %29 = vector.extract_strided_slice %18 {offsets = [5, 0, 0, 0], sizes = [1, 2, 8, 256], strides = [1, 1, 1, 1]} : vector<6x2x8x256xf32> to vector<1x2x8x256xf32>
    %30 = vector.broadcast %24 : f32 to vector<1x2x8x256xf32>
    %31 = arith.mulf %29, %30 : vector<1x2x8x256xf32>
    %32 = tpu.concatenate %27, %28, %31 in 0 : vector<1x2x8x256xf32>, vector<4x2x8x256xf32>, vector<1x2x8x256xf32> -> vector<6x2x8x256xf32>
    %33 = vector.extract_strided_slice %32 {offsets = [0, 0, 0, 0], sizes = [6, 1, 8, 256], strides = [1, 1, 1, 1]} : vector<6x2x8x256xf32> to vector<6x1x8x256xf32>
    %34 = vector.shape_cast %33 : vector<6x1x8x256xf32> to vector<6x8x256xf32>
    %35 = vector.extract_strided_slice %32 {offsets = [0, 1, 0, 0], sizes = [6, 1, 8, 256], strides = [1, 1, 1, 1]} : vector<6x2x8x256xf32> to vector<6x1x8x256xf32>
    %36 = vector.shape_cast %35 : vector<6x1x8x256xf32> to vector<6x8x256xf32>
    %cst_20 = arith.constant 0.000000e+00 : f32
    %37 = vector.broadcast %cst_20 : f32 to vector<6x1x256xf32>
    %38 = vector.extract_strided_slice %36 {offsets = [0, 0, 0], sizes = [6, 7, 256], strides = [1, 1, 1]} : vector<6x8x256xf32> to vector<6x7x256xf32>
    %39 = tpu.concatenate %37, %38 in 1 : vector<6x1x256xf32>, vector<6x7x256xf32> -> vector<6x8x256xf32>
    %40 = vector.extract_strided_slice %34 {offsets = [0, 1, 0], sizes = [6, 7, 256], strides = [1, 1, 1]} : vector<6x8x256xf32> to vector<6x7x256xf32>
    %41 = tpu.concatenate %40, %37 in 1 : vector<6x7x256xf32>, vector<6x1x256xf32> -> vector<6x8x256xf32>
    %42 = vector.shape_cast %39 : vector<6x8x256xf32> to vector<6x1x8x256xf32>
    %43 = vector.shape_cast %34 : vector<6x8x256xf32> to vector<6x1x8x256xf32>
    %44 = tpu.concatenate %42, %43 in 1 : vector<6x1x8x256xf32>, vector<6x1x8x256xf32> -> vector<6x2x8x256xf32>
    %45 = vector.shape_cast %36 : vector<6x8x256xf32> to vector<6x1x8x256xf32>
    %46 = vector.shape_cast %41 : vector<6x8x256xf32> to vector<6x1x8x256xf32>
    %47 = tpu.concatenate %45, %46 in 1 : vector<6x1x8x256xf32>, vector<6x1x8x256xf32> -> vector<6x2x8x256xf32>
    %cst_21 = arith.constant 0.000000e+00 : f32
    %48 = vector.broadcast %cst_21 : f32 to vector<4x2x8x256xf32>
    %49 = vector.extract_strided_slice %44 {offsets = [0, 0, 0, 0], sizes = [4, 2, 8, 256], strides = [1, 1, 1, 1]} : vector<6x2x8x256xf32> to vector<4x2x8x256xf32>
    %c0_22 = arith.constant 0 : index
    %c0_23 = arith.constant 0 : index
    %c0_24 = arith.constant 0 : index
    %50 = vector.load %arg9[%c0_22, %c0_23, %c0_24] : memref<3x3x256xf32, #tpu.memory_space<vmem>>, vector<1x1x256xf32>
    %51 = vector.shape_cast %50 : vector<1x1x256xf32> to vector<256xf32>
    %52 = vector.shape_cast %51 : vector<256xf32> to vector<1x1x1x256xf32>
    %53 = vector.broadcast %52 : vector<1x1x1x256xf32> to vector<4x2x8x256xf32>
    %54 = arith.mulf %49, %53 : vector<4x2x8x256xf32>
    %55 = arith.addf %48, %54 : vector<4x2x8x256xf32>
    %56 = vector.extract_strided_slice %44 {offsets = [1, 0, 0, 0], sizes = [4, 2, 8, 256], strides = [1, 1, 1, 1]} : vector<6x2x8x256xf32> to vector<4x2x8x256xf32>
    %c1 = arith.constant 1 : index
    %c0_25 = arith.constant 0 : index
    %c0_26 = arith.constant 0 : index
    %57 = vector.load %arg9[%c1, %c0_25, %c0_26] : memref<3x3x256xf32, #tpu.memory_space<vmem>>, vector<1x1x256xf32>
    %58 = vector.shape_cast %57 : vector<1x1x256xf32> to vector<256xf32>
    %59 = vector.shape_cast %58 : vector<256xf32> to vector<1x1x1x256xf32>
    %60 = vector.broadcast %59 : vector<1x1x1x256xf32> to vector<4x2x8x256xf32>
    %61 = arith.mulf %56, %60 : vector<4x2x8x256xf32>
    %62 = arith.addf %55, %61 : vector<4x2x8x256xf32>
    %63 = vector.extract_strided_slice %44 {offsets = [2, 0, 0, 0], sizes = [4, 2, 8, 256], strides = [1, 1, 1, 1]} : vector<6x2x8x256xf32> to vector<4x2x8x256xf32>
    %c2 = arith.constant 2 : index
    %c0_27 = arith.constant 0 : index
    %c0_28 = arith.constant 0 : index
    %64 = vector.load %arg9[%c2, %c0_27, %c0_28] : memref<3x3x256xf32, #tpu.memory_space<vmem>>, vector<1x1x256xf32>
    %65 = vector.shape_cast %64 : vector<1x1x256xf32> to vector<256xf32>
    %66 = vector.shape_cast %65 : vector<256xf32> to vector<1x1x1x256xf32>
    %67 = vector.broadcast %66 : vector<1x1x1x256xf32> to vector<4x2x8x256xf32>
    %68 = arith.mulf %63, %67 : vector<4x2x8x256xf32>
    %69 = arith.addf %62, %68 : vector<4x2x8x256xf32>
    %70 = vector.extract_strided_slice %32 {offsets = [0, 0, 0, 0], sizes = [4, 2, 8, 256], strides = [1, 1, 1, 1]} : vector<6x2x8x256xf32> to vector<4x2x8x256xf32>
    %c0_29 = arith.constant 0 : index
    %c1_30 = arith.constant 1 : index
    %c0_31 = arith.constant 0 : index
    %71 = vector.load %arg9[%c0_29, %c1_30, %c0_31] : memref<3x3x256xf32, #tpu.memory_space<vmem>>, vector<1x1x256xf32>
    %72 = vector.shape_cast %71 : vector<1x1x256xf32> to vector<256xf32>
    %73 = vector.shape_cast %72 : vector<256xf32> to vector<1x1x1x256xf32>
    %74 = vector.broadcast %73 : vector<1x1x1x256xf32> to vector<4x2x8x256xf32>
    %75 = arith.mulf %70, %74 : vector<4x2x8x256xf32>
    %76 = arith.addf %69, %75 : vector<4x2x8x256xf32>
    %77 = vector.extract_strided_slice %32 {offsets = [1, 0, 0, 0], sizes = [4, 2, 8, 256], strides = [1, 1, 1, 1]} : vector<6x2x8x256xf32> to vector<4x2x8x256xf32>
    %c1_32 = arith.constant 1 : index
    %c1_33 = arith.constant 1 : index
    %c0_34 = arith.constant 0 : index
    %78 = vector.load %arg9[%c1_32, %c1_33, %c0_34] : memref<3x3x256xf32, #tpu.memory_space<vmem>>, vector<1x1x256xf32>
    %79 = vector.shape_cast %78 : vector<1x1x256xf32> to vector<256xf32>
    %80 = vector.shape_cast %79 : vector<256xf32> to vector<1x1x1x256xf32>
    %81 = vector.broadcast %80 : vector<1x1x1x256xf32> to vector<4x2x8x256xf32>
    %82 = arith.mulf %77, %81 : vector<4x2x8x256xf32>
    %83 = arith.addf %76, %82 : vector<4x2x8x256xf32>
    %84 = vector.extract_strided_slice %32 {offsets = [2, 0, 0, 0], sizes = [4, 2, 8, 256], strides = [1, 1, 1, 1]} : vector<6x2x8x256xf32> to vector<4x2x8x256xf32>
    %c2_35 = arith.constant 2 : index
    %c1_36 = arith.constant 1 : index
    %c0_37 = arith.constant 0 : index
    %85 = vector.load %arg9[%c2_35, %c1_36, %c0_37] : memref<3x3x256xf32, #tpu.memory_space<vmem>>, vector<1x1x256xf32>
    %86 = vector.shape_cast %85 : vector<1x1x256xf32> to vector<256xf32>
    %87 = vector.shape_cast %86 : vector<256xf32> to vector<1x1x1x256xf32>
    %88 = vector.broadcast %87 : vector<1x1x1x256xf32> to vector<4x2x8x256xf32>
    %89 = arith.mulf %84, %88 : vector<4x2x8x256xf32>
    %90 = arith.addf %83, %89 : vector<4x2x8x256xf32>
    %91 = vector.extract_strided_slice %47 {offsets = [0, 0, 0, 0], sizes = [4, 2, 8, 256], strides = [1, 1, 1, 1]} : vector<6x2x8x256xf32> to vector<4x2x8x256xf32>
    %c0_38 = arith.constant 0 : index
    %c2_39 = arith.constant 2 : index
    %c0_40 = arith.constant 0 : index
    %92 = vector.load %arg9[%c0_38, %c2_39, %c0_40] : memref<3x3x256xf32, #tpu.memory_space<vmem>>, vector<1x1x256xf32>
    %93 = vector.shape_cast %92 : vector<1x1x256xf32> to vector<256xf32>
    %94 = vector.shape_cast %93 : vector<256xf32> to vector<1x1x1x256xf32>
    %95 = vector.broadcast %94 : vector<1x1x1x256xf32> to vector<4x2x8x256xf32>
    %96 = arith.mulf %91, %95 : vector<4x2x8x256xf32>
    %97 = arith.addf %90, %96 : vector<4x2x8x256xf32>
    %98 = vector.extract_strided_slice %47 {offsets = [1, 0, 0, 0], sizes = [4, 2, 8, 256], strides = [1, 1, 1, 1]} : vector<6x2x8x256xf32> to vector<4x2x8x256xf32>
    %c1_41 = arith.constant 1 : index
    %c2_42 = arith.constant 2 : index
    %c0_43 = arith.constant 0 : index
    %99 = vector.load %arg9[%c1_41, %c2_42, %c0_43] : memref<3x3x256xf32, #tpu.memory_space<vmem>>, vector<1x1x256xf32>
    %100 = vector.shape_cast %99 : vector<1x1x256xf32> to vector<256xf32>
    %101 = vector.shape_cast %100 : vector<256xf32> to vector<1x1x1x256xf32>
    %102 = vector.broadcast %101 : vector<1x1x1x256xf32> to vector<4x2x8x256xf32>
    %103 = arith.mulf %98, %102 : vector<4x2x8x256xf32>
    %104 = arith.addf %97, %103 : vector<4x2x8x256xf32>
    %105 = vector.extract_strided_slice %47 {offsets = [2, 0, 0, 0], sizes = [4, 2, 8, 256], strides = [1, 1, 1, 1]} : vector<6x2x8x256xf32> to vector<4x2x8x256xf32>
    %c2_44 = arith.constant 2 : index
    %c2_45 = arith.constant 2 : index
    %c0_46 = arith.constant 0 : index
    %106 = vector.load %arg9[%c2_44, %c2_45, %c0_46] : memref<3x3x256xf32, #tpu.memory_space<vmem>>, vector<1x1x256xf32>
    %107 = vector.shape_cast %106 : vector<1x1x256xf32> to vector<256xf32>
    %108 = vector.shape_cast %107 : vector<256xf32> to vector<1x1x1x256xf32>
    %109 = vector.broadcast %108 : vector<1x1x1x256xf32> to vector<4x2x8x256xf32>
    %110 = arith.mulf %105, %109 : vector<4x2x8x256xf32>
    %111 = arith.addf %104, %110 : vector<4x2x8x256xf32>
    %c0_47 = arith.constant 0 : index
    %c0_48 = arith.constant 0 : index
    %112 = vector.load %arg10[%c0_47, %c0_48] : memref<1x256xf32, #tpu.memory_space<vmem>>, vector<1x256xf32>
    %113 = vector.shape_cast %112 : vector<1x256xf32> to vector<1x1x1x256xf32>
    %114 = vector.broadcast %113 : vector<1x1x1x256xf32> to vector<4x2x8x256xf32>
    %115 = arith.addf %111, %114 : vector<4x2x8x256xf32>
    %116 = vector.shape_cast %1 : vector<4x2x8x256xbf16> to vector<64x256xbf16>
    %117 = vector.shape_cast %115 : vector<4x2x8x256xf32> to vector<64x256xf32>
    %118 = arith.truncf %117 : vector<64x256xf32> to vector<64x256xbf16>
    %c0_49 = arith.constant 0 : index
    %c0_50 = arith.constant 0 : index
    %119 = vector.load %arg11[%c0_49, %c0_50] : memref<256x128xbf16, #tpu.memory_space<vmem>>, vector<256x128xbf16>
    %cst_51 = arith.constant dense<0.000000e+00> : vector<64x128xf32>
    %120 = tpu.matmul %118, %119, %cst_51 {dimension_numbers = #tpu.dot_dimension_numbers<[1], [0], [0], [1], [0, 0, 1, 1], [], []>} : vector<64x256xbf16>, vector<256x128xbf16>, vector<64x128xf32> -> vector<64x128xf32>
    %c0_52 = arith.constant 0 : index
    %c0_53 = arith.constant 0 : index
    %121 = vector.load %arg12[%c0_52, %c0_53] : memref<1x128xf32, #tpu.memory_space<vmem>>, vector<1x128xf32>
    %122 = vector.broadcast %121 : vector<1x128xf32> to vector<64x128xf32>
    %123 = arith.addf %120, %122 : vector<64x128xf32>
    %c0_54 = arith.constant 0 : index
    %c0_55 = arith.constant 0 : index
    %124 = vector.load %arg5[%c0_54, %c0_55] : memref<256x128xbf16, #tpu.memory_space<vmem>>, vector<256x128xbf16>
    %cst_56 = arith.constant dense<0.000000e+00> : vector<64x128xf32>
    %125 = tpu.matmul %116, %124, %cst_56 {dimension_numbers = #tpu.dot_dimension_numbers<[1], [0], [0], [1], [0, 0, 1, 1], [], []>} : vector<64x256xbf16>, vector<256x128xbf16>, vector<64x128xf32> -> vector<64x128xf32>
    %c0_57 = arith.constant 0 : index
    %c0_58 = arith.constant 0 : index
    %126 = vector.load %arg6[%c0_57, %c0_58] : memref<1x128xf32, #tpu.memory_space<vmem>>, vector<1x128xf32>
    %127 = vector.broadcast %126 : vector<1x128xf32> to vector<64x128xf32>
    %128 = arith.addf %125, %127 : vector<64x128xf32>
    %129 = arith.addf %123, %128 : vector<64x128xf32>
    %130 = arith.truncf %129 : vector<64x128xf32> to vector<64x128xbf16>
    %c0_59 = arith.constant 0 : index
    %c0_60 = arith.constant 0 : index
    %131 = vector.load %arg13[%c0_59, %c0_60] : memref<128x256xbf16, #tpu.memory_space<vmem>>, vector<128x256xbf16>
    %cst_61 = arith.constant dense<0.000000e+00> : vector<64x256xf32>
    %132 = tpu.matmul %130, %131, %cst_61 {dimension_numbers = #tpu.dot_dimension_numbers<[1], [0], [0], [1], [0, 0, 1, 1], [], []>} : vector<64x128xbf16>, vector<128x256xbf16>, vector<64x256xf32> -> vector<64x256xf32>
    %c0_62 = arith.constant 0 : index
    %c0_63 = arith.constant 0 : index
    %133 = vector.load %arg14[%c0_62, %c0_63] : memref<1x256xf32, #tpu.memory_space<vmem>>, vector<1x256xf32>
    %134 = vector.broadcast %133 : vector<1x256xf32> to vector<64x256xf32>
    %135 = arith.addf %132, %134 : vector<64x256xf32>
    %c0_64 = arith.constant 0 : index
    %c0_65 = arith.constant 0 : index
    %136 = vector.load %arg15[%c0_64, %c0_65] : memref<128x256xbf16, #tpu.memory_space<vmem>>, vector<128x256xbf16>
    %cst_66 = arith.constant dense<0.000000e+00> : vector<64x256xf32>
    %137 = tpu.matmul %130, %136, %cst_66 {dimension_numbers = #tpu.dot_dimension_numbers<[1], [0], [0], [1], [0, 0, 1, 1], [], []>} : vector<64x128xbf16>, vector<128x256xbf16>, vector<64x256xf32> -> vector<64x256xf32>
    %c0_67 = arith.constant 0 : index
    %c0_68 = arith.constant 0 : index
    %138 = vector.load %arg16[%c0_67, %c0_68] : memref<1x256xf32, #tpu.memory_space<vmem>>, vector<1x256xf32>
    %139 = vector.broadcast %138 : vector<1x256xf32> to vector<64x256xf32>
    %140 = arith.addf %137, %139 : vector<64x256xf32>
    %cst_69 = arith.constant 0.000000e+00 : f32
    %141 = vector.broadcast %cst_69 : f32 to vector<64x256xf32>
    %142 = arith.maximumf %140, %141 : vector<64x256xf32>
    %143 = arith.mulf %135, %142 : vector<64x256xf32>
    %144 = arith.truncf %143 : vector<64x256xf32> to vector<64x256xbf16>
    %c0_70 = arith.constant 0 : index
    %c0_71 = arith.constant 0 : index
    %145 = vector.load %arg17[%c0_70, %c0_71] : memref<256x128xbf16, #tpu.memory_space<vmem>>, vector<256x128xbf16>
    %cst_72 = arith.constant dense<0.000000e+00> : vector<64x128xf32>
    %146 = tpu.matmul %144, %145, %cst_72 {dimension_numbers = #tpu.dot_dimension_numbers<[1], [0], [0], [1], [0, 0, 1, 1], [], []>} : vector<64x256xbf16>, vector<256x128xbf16>, vector<64x128xf32> -> vector<64x128xf32>
    %c0_73 = arith.constant 0 : index
    %c0_74 = arith.constant 0 : index
    %147 = vector.load %arg18[%c0_73, %c0_74] : memref<1x128xf32, #tpu.memory_space<vmem>>, vector<1x128xf32>
    %148 = vector.broadcast %147 : vector<1x128xf32> to vector<64x128xf32>
    %149 = arith.addf %146, %148 : vector<64x128xf32>
    %150 = arith.addf %129, %149 : vector<64x128xf32>
    %151 = vector.shape_cast %150 : vector<64x128xf32> to vector<4x2x8x128xf32>
    %152 = arith.truncf %151 : vector<4x2x8x128xf32> to vector<4x2x8x128xbf16>
    %c0_75 = arith.constant 0 : index
    %c0_76 = arith.constant 0 : index
    %c0_77 = arith.constant 0 : index
    %c0_78 = arith.constant 0 : index
    %c0_79 = arith.constant 0 : index
    %153 = vector.load %arg19[%c0_75, %c0_76, %c0_77, %c0_78, %c0_79] : memref<1x4x2x8x128xbf16, #tpu.memory_space<vmem>>, vector<1x4x2x8x128xbf16>
    %154 = vector.shape_cast %153 : vector<1x4x2x8x128xbf16> to vector<4x2x8x128xbf16>
    %155 = vector.shape_cast %152 : vector<4x2x8x128xbf16> to vector<1x4x2x8x128xbf16>
    tpu.vector_store %arg19[%c0_75, %c0_76, %c0_77, %c0_78, %c0_79], %155 {strides = array<i32>} : memref<1x4x2x8x128xbf16, #tpu.memory_space<vmem>>, vector<1x4x2x8x128xbf16>,
    return
  }
  func.func @transform_0(%arg0: i32, %arg1: i32) -> (i32, i32, i32, i32, i32) {
    %c0_i32 = arith.constant 0 : i32
    %c0_i32_0 = arith.constant 0 : i32
    %c0_i32_1 = arith.constant 0 : i32
    %c0_i32_2 = arith.constant 0 : i32
    return %arg0, %arg1, %c0_i32, %c0_i32_0, %c0_i32_1 : i32, i32, i32, i32, i32
  }
  func.func @transform_1(%arg0: i32, %arg1: i32) -> (i32, i32, i32, i32, i32) {
    %c4_i32 = arith.constant 4 : i32
    %0 = arith.muli %arg1, %c4_i32 : i32
    %c1_i32 = arith.constant 1 : i32
    %1 = arith.subi %0, %c1_i32 : i32
    %c0_i32 = arith.constant 0 : i32
    %2 = arith.maxsi %1, %c0_i32 : i32
    %c0_i32_0 = arith.constant 0 : i32
    %c0_i32_1 = arith.constant 0 : i32
    %c0_i32_2 = arith.constant 0 : i32
    %c0_i32_3 = arith.constant 0 : i32
    return %arg0, %2, %c0_i32_0, %c0_i32_1, %c0_i32_2 : i32, i32, i32, i32, i32
  }
  func.func @transform_2(%arg0: i32, %arg1: i32) -> (i32, i32, i32, i32, i32) {
    %c1_i32 = arith.constant 1 : i32
    %0 = arith.addi %arg1, %c1_i32 : i32
    %c4_i32 = arith.constant 4 : i32
    %1 = arith.muli %0, %c4_i32 : i32
    %c15_i32 = arith.constant 15 : i32
    %2 = arith.minsi %1, %c15_i32 : i32
    %c0_i32 = arith.constant 0 : i32
    %c0_i32_0 = arith.constant 0 : i32
    %c0_i32_1 = arith.constant 0 : i32
    %c0_i32_2 = arith.constant 0 : i32
    return %arg0, %2, %c0_i32, %c0_i32_0, %c0_i32_1 : i32, i32, i32, i32, i32
  }
  func.func @transform_3(%arg0: i32, %arg1: i32) -> (i32, i32) {
    %c0_i32 = arith.constant 0 : i32
    %c0_i32_0 = arith.constant 0 : i32
    %c0_i32_1 = arith.constant 0 : i32
    return %c0_i32, %c0_i32_0 : i32, i32
  }
  func.func @transform_4(%arg0: i32, %arg1: i32) -> (i32, i32) {
    %c0_i32 = arith.constant 0 : i32
    %c0_i32_0 = arith.constant 0 : i32
    %c0_i32_1 = arith.constant 0 : i32
    return %c0_i32, %c0_i32_0 : i32, i32
  }
  func.func @transform_5(%arg0: i32, %arg1: i32) -> (i32, i32) {
    %c0_i32 = arith.constant 0 : i32
    %c0_i32_0 = arith.constant 0 : i32
    %c0_i32_1 = arith.constant 0 : i32
    return %c0_i32, %c0_i32_0 : i32, i32
  }
  func.func @transform_6(%arg0: i32, %arg1: i32) -> (i32, i32) {
    %c0_i32 = arith.constant 0 : i32
    %c0_i32_0 = arith.constant 0 : i32
    %c0_i32_1 = arith.constant 0 : i32
    return %c0_i32, %c0_i32_0 : i32, i32
  }
  func.func @transform_7(%arg0: i32, %arg1: i32) -> (i32, i32, i32) {
    %c0_i32 = arith.constant 0 : i32
    %c0_i32_0 = arith.constant 0 : i32
    %c0_i32_1 = arith.constant 0 : i32
    %c0_i32_2 = arith.constant 0 : i32
    return %c0_i32, %c0_i32_0, %c0_i32_1 : i32, i32, i32
  }
  func.func @transform_8(%arg0: i32, %arg1: i32) -> (i32, i32) {
    %c0_i32 = arith.constant 0 : i32
    %c0_i32_0 = arith.constant 0 : i32
    %c0_i32_1 = arith.constant 0 : i32
    return %c0_i32, %c0_i32_0 : i32, i32
  }
  func.func @transform_9(%arg0: i32, %arg1: i32) -> (i32, i32) {
    %c0_i32 = arith.constant 0 : i32
    %c0_i32_0 = arith.constant 0 : i32
    %c0_i32_1 = arith.constant 0 : i32
    return %c0_i32, %c0_i32_0 : i32, i32
  }
  func.func @transform_10(%arg0: i32, %arg1: i32) -> (i32, i32) {
    %c0_i32 = arith.constant 0 : i32
    %c0_i32_0 = arith.constant 0 : i32
    %c0_i32_1 = arith.constant 0 : i32
    return %c0_i32, %c0_i32_0 : i32, i32
  }
  func.func @transform_11(%arg0: i32, %arg1: i32) -> (i32, i32) {
    %c0_i32 = arith.constant 0 : i32
    %c0_i32_0 = arith.constant 0 : i32
    %c0_i32_1 = arith.constant 0 : i32
    return %c0_i32, %c0_i32_0 : i32, i32
  }
  func.func @transform_12(%arg0: i32, %arg1: i32) -> (i32, i32) {
    %c0_i32 = arith.constant 0 : i32
    %c0_i32_0 = arith.constant 0 : i32
    %c0_i32_1 = arith.constant 0 : i32
    return %c0_i32, %c0_i32_0 : i32, i32
  }
  func.func @transform_13(%arg0: i32, %arg1: i32) -> (i32, i32) {
    %c0_i32 = arith.constant 0 : i32
    %c0_i32_0 = arith.constant 0 : i32
    %c0_i32_1 = arith.constant 0 : i32
    return %c0_i32, %c0_i32_0 : i32, i32
  }
  func.func @transform_14(%arg0: i32, %arg1: i32) -> (i32, i32) {
    %c0_i32 = arith.constant 0 : i32
    %c0_i32_0 = arith.constant 0 : i32
    %c0_i32_1 = arith.constant 0 : i32
    return %c0_i32, %c0_i32_0 : i32, i32
  }
  func.func @transform_15(%arg0: i32, %arg1: i32) -> (i32, i32) {
    %c0_i32 = arith.constant 0 : i32
    %c0_i32_0 = arith.constant 0 : i32
    %c0_i32_1 = arith.constant 0 : i32
    return %c0_i32, %c0_i32_0 : i32, i32
  }
  func.func @transform_16(%arg0: i32, %arg1: i32) -> (i32, i32) {
    %c0_i32 = arith.constant 0 : i32
    %c0_i32_0 = arith.constant 0 : i32
    %c0_i32_1 = arith.constant 0 : i32
    return %c0_i32, %c0_i32_0 : i32, i32
  }
  func.func @transform_17(%arg0: i32, %arg1: i32) -> (i32, i32, i32, i32, i32) {
    %c0_i32 = arith.constant 0 : i32
    %c0_i32_0 = arith.constant 0 : i32
    %c0_i32_1 = arith.constant 0 : i32
    %c0_i32_2 = arith.constant 0 : i32
    return %arg0, %arg1, %c0_i32, %c0_i32_0, %c0_i32_1 : i32, i32, i32, i32, i32
  }
}

module attributes {stable_mosaic.version = 11 : i64} {
  func.func @kernel(%arg0: i32, %arg1: i32, %arg2: memref<1x2x1x2x8x128xbf16, #tpu.memory_space<vmem>>, %arg3: memref<1x2x1x2x8x128xbf16, #tpu.memory_space<vmem>>, %arg4: memref<1x1x1x2x8x128xbf16, #tpu.memory_space<vmem>>, %arg5: memref<3x3x128x128xbf16, #tpu.memory_space<vmem>>, %arg6: memref<1x128xf32, #tpu.memory_space<vmem>>, %arg7: memref<1x2x8x128xbf16, #tpu.memory_space<vmem>>) attributes {dimension_semantics = [#tpu.dimension_semantics<parallel>, #tpu.dimension_semantics<parallel>], iteration_bounds = array<i64: 2, 4>, scalar_prefetch = 0 : i64, scratch_operands = 0 : i64, tpu.core_type = #tpu.core_type<tc>, window_params = [{transform_indices = @transform_0, window_bounds = array<i64: 1, 2, 1, 2, 8, 128>}, {transform_indices = @transform_1, window_bounds = array<i64: 1, 2, 1, 2, 8, 128>}, {transform_indices = @transform_2, window_bounds = array<i64: 1, 1, 1, 2, 8, 128>}, {pipeline_mode = #tpu.pipeline_mode<synchronous>, transform_indices = @transform_3, window_bounds = array<i64: 3, 3, 128, 128>}, {pipeline_mode = #tpu.pipeline_mode<synchronous>, transform_indices = @transform_4, window_bounds = array<i64: 1, 128>}, {transform_indices = @transform_5, window_bounds = array<i64: 1, 2, 8, 128>}]} {
    %c0 = arith.constant 0 : index
    %c0_0 = arith.constant 0 : index
    %c0_1 = arith.constant 0 : index
    %c0_2 = arith.constant 0 : index
    %c0_3 = arith.constant 0 : index
    %c0_4 = arith.constant 0 : index
    %0 = vector.load %arg2[%c0, %c0_0, %c0_1, %c0_2, %c0_3, %c0_4] : memref<1x2x1x2x8x128xbf16, #tpu.memory_space<vmem>>, vector<1x2x1x2x8x128xbf16>
    %1 = vector.shape_cast %0 : vector<1x2x1x2x8x128xbf16> to vector<2x2x8x128xbf16>
    %c0_5 = arith.constant 0 : index
    %c0_6 = arith.constant 0 : index
    %c0_7 = arith.constant 0 : index
    %c0_8 = arith.constant 0 : index
    %c0_9 = arith.constant 0 : index
    %c0_10 = arith.constant 0 : index
    %2 = vector.load %arg3[%c0_5, %c0_6, %c0_7, %c0_8, %c0_9, %c0_10] : memref<1x2x1x2x8x128xbf16, #tpu.memory_space<vmem>>, vector<1x2x1x2x8x128xbf16>
    %3 = vector.shape_cast %2 : vector<1x2x1x2x8x128xbf16> to vector<2x2x8x128xbf16>
    %c0_i32 = arith.constant 0 : i32
    %4 = arith.cmpi sgt, %arg1, %c0_i32 : i32
    %5 = arith.extui %4 : i1 to i32
    %6 = arith.sitofp %5 : i32 to f32
    %7 = arith.truncf %6 : f32 to bf16
    %c0_11 = arith.constant 0 : index
    %c0_12 = arith.constant 0 : index
    %c0_13 = arith.constant 0 : index
    %c0_14 = arith.constant 0 : index
    %c0_15 = arith.constant 0 : index
    %c0_16 = arith.constant 0 : index
    %8 = vector.load %arg4[%c0_11, %c0_12, %c0_13, %c0_14, %c0_15, %c0_16] : memref<1x1x1x2x8x128xbf16, #tpu.memory_space<vmem>>, vector<1x1x1x2x8x128xbf16>
    %9 = vector.shape_cast %8 : vector<1x1x1x2x8x128xbf16> to vector<2x8x128xbf16>
    %10 = vector.broadcast %7 : bf16 to vector<2x8x128xbf16>
    %11 = arith.mulf %9, %10 : vector<2x8x128xbf16>
    %12 = vector.shape_cast %11 : vector<2x8x128xbf16> to vector<1x2x8x128xbf16>
    %13 = vector.extract_strided_slice %3 {offsets = [0, 0, 0, 0], sizes = [1, 2, 8, 128], strides = [1, 1, 1, 1]} : vector<2x2x8x128xbf16> to vector<1x2x8x128xbf16>
    %14 = tpu.concatenate %12, %13 in 0 : vector<1x2x8x128xbf16>, vector<1x2x8x128xbf16> -> vector<2x2x8x128xbf16>
    %cst = arith.constant 0.000000e+00 : bf16
    %15 = vector.broadcast %cst : bf16 to vector<2x1x128xbf16>
    %cst_17 = arith.constant 0.000000e+00 : f32
    %16 = vector.broadcast %cst_17 : f32 to vector<16x128xf32>
    %17 = vector.extract_strided_slice %14 {offsets = [0, 0, 0, 0], sizes = [2, 1, 8, 128], strides = [1, 1, 1, 1]} : vector<2x2x8x128xbf16> to vector<2x1x8x128xbf16>
    %18 = vector.shape_cast %17 : vector<2x1x8x128xbf16> to vector<2x8x128xbf16>
    %19 = vector.extract_strided_slice %14 {offsets = [0, 1, 0, 0], sizes = [2, 1, 8, 128], strides = [1, 1, 1, 1]} : vector<2x2x8x128xbf16> to vector<2x1x8x128xbf16>
    %20 = vector.shape_cast %19 : vector<2x1x8x128xbf16> to vector<2x8x128xbf16>
    %21 = vector.extract_strided_slice %20 {offsets = [0, 0, 0], sizes = [2, 7, 128], strides = [1, 1, 1]} : vector<2x8x128xbf16> to vector<2x7x128xbf16>
    %22 = tpu.concatenate %15, %21 in 1 : vector<2x1x128xbf16>, vector<2x7x128xbf16> -> vector<2x8x128xbf16>
    %23 = vector.shape_cast %22 : vector<2x8x128xbf16> to vector<16x128xbf16>
    %c0_18 = arith.constant 0 : index
    %c0_19 = arith.constant 0 : index
    %c0_20 = arith.constant 0 : index
    %c0_21 = arith.constant 0 : index
    %24 = vector.load %arg5[%c0_18, %c0_19, %c0_20, %c0_21] : memref<3x3x128x128xbf16, #tpu.memory_space<vmem>>, vector<1x1x128x128xbf16>
    %25 = vector.shape_cast %24 : vector<1x1x128x128xbf16> to vector<128x128xbf16>
    %cst_22 = arith.constant dense<0.000000e+00> : vector<16x128xf32>
    %26 = tpu.matmul %23, %25, %cst_22 {dimension_numbers = #tpu.dot_dimension_numbers<[1], [0], [0], [1], [0, 0, 1, 1], [], []>} : vector<16x128xbf16>, vector<128x128xbf16>, vector<16x128xf32> -> vector<16x128xf32>
    %27 = arith.addf %16, %26 : vector<16x128xf32>
    %28 = vector.shape_cast %18 : vector<2x8x128xbf16> to vector<16x128xbf16>
    %c0_23 = arith.constant 0 : index
    %c1 = arith.constant 1 : index
    %c0_24 = arith.constant 0 : index
    %c0_25 = arith.constant 0 : index
    %29 = vector.load %arg5[%c0_23, %c1, %c0_24, %c0_25] : memref<3x3x128x128xbf16, #tpu.memory_space<vmem>>, vector<1x1x128x128xbf16>
    %30 = vector.shape_cast %29 : vector<1x1x128x128xbf16> to vector<128x128xbf16>
    %cst_26 = arith.constant dense<0.000000e+00> : vector<16x128xf32>
    %31 = tpu.matmul %28, %30, %cst_26 {dimension_numbers = #tpu.dot_dimension_numbers<[1], [0], [0], [1], [0, 0, 1, 1], [], []>} : vector<16x128xbf16>, vector<128x128xbf16>, vector<16x128xf32> -> vector<16x128xf32>
    %32 = arith.addf %27, %31 : vector<16x128xf32>
    %33 = vector.shape_cast %20 : vector<2x8x128xbf16> to vector<16x128xbf16>
    %c0_27 = arith.constant 0 : index
    %c2 = arith.constant 2 : index
    %c0_28 = arith.constant 0 : index
    %c0_29 = arith.constant 0 : index
    %34 = vector.load %arg5[%c0_27, %c2, %c0_28, %c0_29] : memref<3x3x128x128xbf16, #tpu.memory_space<vmem>>, vector<1x1x128x128xbf16>
    %35 = vector.shape_cast %34 : vector<1x1x128x128xbf16> to vector<128x128xbf16>
    %cst_30 = arith.constant dense<0.000000e+00> : vector<16x128xf32>
    %36 = tpu.matmul %33, %35, %cst_30 {dimension_numbers = #tpu.dot_dimension_numbers<[1], [0], [0], [1], [0, 0, 1, 1], [], []>} : vector<16x128xbf16>, vector<128x128xbf16>, vector<16x128xf32> -> vector<16x128xf32>
    %37 = arith.addf %32, %36 : vector<16x128xf32>
    %38 = vector.extract_strided_slice %1 {offsets = [0, 0, 0, 0], sizes = [2, 1, 8, 128], strides = [1, 1, 1, 1]} : vector<2x2x8x128xbf16> to vector<2x1x8x128xbf16>
    %39 = vector.shape_cast %38 : vector<2x1x8x128xbf16> to vector<2x8x128xbf16>
    %40 = vector.extract_strided_slice %1 {offsets = [0, 1, 0, 0], sizes = [2, 1, 8, 128], strides = [1, 1, 1, 1]} : vector<2x2x8x128xbf16> to vector<2x1x8x128xbf16>
    %41 = vector.shape_cast %40 : vector<2x1x8x128xbf16> to vector<2x8x128xbf16>
    %42 = vector.extract_strided_slice %41 {offsets = [0, 0, 0], sizes = [2, 7, 128], strides = [1, 1, 1]} : vector<2x8x128xbf16> to vector<2x7x128xbf16>
    %43 = tpu.concatenate %15, %42 in 1 : vector<2x1x128xbf16>, vector<2x7x128xbf16> -> vector<2x8x128xbf16>
    %44 = vector.shape_cast %43 : vector<2x8x128xbf16> to vector<16x128xbf16>
    %c1_31 = arith.constant 1 : index
    %c0_32 = arith.constant 0 : index
    %c0_33 = arith.constant 0 : index
    %c0_34 = arith.constant 0 : index
    %45 = vector.load %arg5[%c1_31, %c0_32, %c0_33, %c0_34] : memref<3x3x128x128xbf16, #tpu.memory_space<vmem>>, vector<1x1x128x128xbf16>
    %46 = vector.shape_cast %45 : vector<1x1x128x128xbf16> to vector<128x128xbf16>
    %cst_35 = arith.constant dense<0.000000e+00> : vector<16x128xf32>
    %47 = tpu.matmul %44, %46, %cst_35 {dimension_numbers = #tpu.dot_dimension_numbers<[1], [0], [0], [1], [0, 0, 1, 1], [], []>} : vector<16x128xbf16>, vector<128x128xbf16>, vector<16x128xf32> -> vector<16x128xf32>
    %48 = arith.addf %37, %47 : vector<16x128xf32>
    %49 = vector.shape_cast %39 : vector<2x8x128xbf16> to vector<16x128xbf16>
    %c1_36 = arith.constant 1 : index
    %c1_37 = arith.constant 1 : index
    %c0_38 = arith.constant 0 : index
    %c0_39 = arith.constant 0 : index
    %50 = vector.load %arg5[%c1_36, %c1_37, %c0_38, %c0_39] : memref<3x3x128x128xbf16, #tpu.memory_space<vmem>>, vector<1x1x128x128xbf16>
    %51 = vector.shape_cast %50 : vector<1x1x128x128xbf16> to vector<128x128xbf16>
    %cst_40 = arith.constant dense<0.000000e+00> : vector<16x128xf32>
    %52 = tpu.matmul %49, %51, %cst_40 {dimension_numbers = #tpu.dot_dimension_numbers<[1], [0], [0], [1], [0, 0, 1, 1], [], []>} : vector<16x128xbf16>, vector<128x128xbf16>, vector<16x128xf32> -> vector<16x128xf32>
    %53 = arith.addf %48, %52 : vector<16x128xf32>
    %54 = vector.shape_cast %41 : vector<2x8x128xbf16> to vector<16x128xbf16>
    %c1_41 = arith.constant 1 : index
    %c2_42 = arith.constant 2 : index
    %c0_43 = arith.constant 0 : index
    %c0_44 = arith.constant 0 : index
    %55 = vector.load %arg5[%c1_41, %c2_42, %c0_43, %c0_44] : memref<3x3x128x128xbf16, #tpu.memory_space<vmem>>, vector<1x1x128x128xbf16>
    %56 = vector.shape_cast %55 : vector<1x1x128x128xbf16> to vector<128x128xbf16>
    %cst_45 = arith.constant dense<0.000000e+00> : vector<16x128xf32>
    %57 = tpu.matmul %54, %56, %cst_45 {dimension_numbers = #tpu.dot_dimension_numbers<[1], [0], [0], [1], [0, 0, 1, 1], [], []>} : vector<16x128xbf16>, vector<128x128xbf16>, vector<16x128xf32> -> vector<16x128xf32>
    %58 = arith.addf %53, %57 : vector<16x128xf32>
    %59 = vector.extract_strided_slice %3 {offsets = [0, 0, 0, 0], sizes = [2, 1, 8, 128], strides = [1, 1, 1, 1]} : vector<2x2x8x128xbf16> to vector<2x1x8x128xbf16>
    %60 = vector.shape_cast %59 : vector<2x1x8x128xbf16> to vector<2x8x128xbf16>
    %61 = vector.extract_strided_slice %3 {offsets = [0, 1, 0, 0], sizes = [2, 1, 8, 128], strides = [1, 1, 1, 1]} : vector<2x2x8x128xbf16> to vector<2x1x8x128xbf16>
    %62 = vector.shape_cast %61 : vector<2x1x8x128xbf16> to vector<2x8x128xbf16>
    %63 = vector.extract_strided_slice %62 {offsets = [0, 0, 0], sizes = [2, 7, 128], strides = [1, 1, 1]} : vector<2x8x128xbf16> to vector<2x7x128xbf16>
    %64 = tpu.concatenate %15, %63 in 1 : vector<2x1x128xbf16>, vector<2x7x128xbf16> -> vector<2x8x128xbf16>
    %65 = vector.shape_cast %64 : vector<2x8x128xbf16> to vector<16x128xbf16>
    %c2_46 = arith.constant 2 : index
    %c0_47 = arith.constant 0 : index
    %c0_48 = arith.constant 0 : index
    %c0_49 = arith.constant 0 : index
    %66 = vector.load %arg5[%c2_46, %c0_47, %c0_48, %c0_49] : memref<3x3x128x128xbf16, #tpu.memory_space<vmem>>, vector<1x1x128x128xbf16>
    %67 = vector.shape_cast %66 : vector<1x1x128x128xbf16> to vector<128x128xbf16>
    %cst_50 = arith.constant dense<0.000000e+00> : vector<16x128xf32>
    %68 = tpu.matmul %65, %67, %cst_50 {dimension_numbers = #tpu.dot_dimension_numbers<[1], [0], [0], [1], [0, 0, 1, 1], [], []>} : vector<16x128xbf16>, vector<128x128xbf16>, vector<16x128xf32> -> vector<16x128xf32>
    %69 = arith.addf %58, %68 : vector<16x128xf32>
    %70 = vector.shape_cast %60 : vector<2x8x128xbf16> to vector<16x128xbf16>
    %c2_51 = arith.constant 2 : index
    %c1_52 = arith.constant 1 : index
    %c0_53 = arith.constant 0 : index
    %c0_54 = arith.constant 0 : index
    %71 = vector.load %arg5[%c2_51, %c1_52, %c0_53, %c0_54] : memref<3x3x128x128xbf16, #tpu.memory_space<vmem>>, vector<1x1x128x128xbf16>
    %72 = vector.shape_cast %71 : vector<1x1x128x128xbf16> to vector<128x128xbf16>
    %cst_55 = arith.constant dense<0.000000e+00> : vector<16x128xf32>
    %73 = tpu.matmul %70, %72, %cst_55 {dimension_numbers = #tpu.dot_dimension_numbers<[1], [0], [0], [1], [0, 0, 1, 1], [], []>} : vector<16x128xbf16>, vector<128x128xbf16>, vector<16x128xf32> -> vector<16x128xf32>
    %74 = arith.addf %69, %73 : vector<16x128xf32>
    %75 = vector.shape_cast %62 : vector<2x8x128xbf16> to vector<16x128xbf16>
    %c2_56 = arith.constant 2 : index
    %c2_57 = arith.constant 2 : index
    %c0_58 = arith.constant 0 : index
    %c0_59 = arith.constant 0 : index
    %76 = vector.load %arg5[%c2_56, %c2_57, %c0_58, %c0_59] : memref<3x3x128x128xbf16, #tpu.memory_space<vmem>>, vector<1x1x128x128xbf16>
    %77 = vector.shape_cast %76 : vector<1x1x128x128xbf16> to vector<128x128xbf16>
    %cst_60 = arith.constant dense<0.000000e+00> : vector<16x128xf32>
    %78 = tpu.matmul %75, %77, %cst_60 {dimension_numbers = #tpu.dot_dimension_numbers<[1], [0], [0], [1], [0, 0, 1, 1], [], []>} : vector<16x128xbf16>, vector<128x128xbf16>, vector<16x128xf32> -> vector<16x128xf32>
    %79 = arith.addf %74, %78 : vector<16x128xf32>
    %c0_61 = arith.constant 0 : index
    %c0_62 = arith.constant 0 : index
    %80 = vector.load %arg6[%c0_61, %c0_62] : memref<1x128xf32, #tpu.memory_space<vmem>>, vector<1x128xf32>
    %81 = vector.broadcast %80 : vector<1x128xf32> to vector<16x128xf32>
    %82 = arith.addf %79, %81 : vector<16x128xf32>
    %cst_63 = arith.constant 0.000000e+00 : f32
    %83 = vector.broadcast %cst_63 : f32 to vector<16x128xf32>
    %84 = arith.cmpf oge, %82, %83 : vector<16x128xf32>
    %cst_64 = arith.constant 0.00999999977 : f32
    %85 = vector.broadcast %cst_64 : f32 to vector<16x128xf32>
    %86 = arith.mulf %85, %82 : vector<16x128xf32>
    %87 = arith.select %84, %82, %86 : vector<16x128xi1>, vector<16x128xf32>
    %88 = vector.shape_cast %87 : vector<16x128xf32> to vector<2x8x128xf32>
    %89 = arith.truncf %88 : vector<2x8x128xf32> to vector<2x8x128xbf16>
    %c0_65 = arith.constant 0 : index
    %c0_66 = arith.constant 0 : index
    %c0_67 = arith.constant 0 : index
    %c0_68 = arith.constant 0 : index
    %90 = vector.load %arg7[%c0_65, %c0_66, %c0_67, %c0_68] : memref<1x2x8x128xbf16, #tpu.memory_space<vmem>>, vector<1x2x8x128xbf16>
    %91 = vector.shape_cast %90 : vector<1x2x8x128xbf16> to vector<2x8x128xbf16>
    %92 = vector.shape_cast %89 : vector<2x8x128xbf16> to vector<1x2x8x128xbf16>
    tpu.vector_store %arg7[%c0_65, %c0_66, %c0_67, %c0_68], %92 {strides = array<i32>} : memref<1x2x8x128xbf16, #tpu.memory_space<vmem>>, vector<1x2x8x128xbf16>,
    return
  }
  func.func @transform_0(%arg0: i32, %arg1: i32) -> (i32, i32, i32, i32, i32, i32) {
    %c0_i32 = arith.constant 0 : i32
    %c0_i32_0 = arith.constant 0 : i32
    %c0_i32_1 = arith.constant 0 : i32
    %c0_i32_2 = arith.constant 0 : i32
    %c0_i32_3 = arith.constant 0 : i32
    return %arg0, %arg1, %c0_i32, %c0_i32_0, %c0_i32_1, %c0_i32_2 : i32, i32, i32, i32, i32, i32
  }
  func.func @transform_1(%arg0: i32, %arg1: i32) -> (i32, i32, i32, i32, i32, i32) {
    %c1_i32 = arith.constant 1 : i32
    %c0_i32 = arith.constant 0 : i32
    %c0_i32_0 = arith.constant 0 : i32
    %c0_i32_1 = arith.constant 0 : i32
    %c0_i32_2 = arith.constant 0 : i32
    return %arg0, %arg1, %c1_i32, %c0_i32, %c0_i32_0, %c0_i32_1 : i32, i32, i32, i32, i32, i32
  }
  func.func @transform_2(%arg0: i32, %arg1: i32) -> (i32, i32, i32, i32, i32, i32) {
    %c2_i32 = arith.constant 2 : i32
    %0 = arith.muli %arg1, %c2_i32 : i32
    %c1_i32 = arith.constant 1 : i32
    %1 = arith.subi %0, %c1_i32 : i32
    %c0_i32 = arith.constant 0 : i32
    %2 = arith.maxsi %1, %c0_i32 : i32
    %c1_i32_0 = arith.constant 1 : i32
    %c0_i32_1 = arith.constant 0 : i32
    %c0_i32_2 = arith.constant 0 : i32
    %c0_i32_3 = arith.constant 0 : i32
    %c0_i32_4 = arith.constant 0 : i32
    return %arg0, %2, %c1_i32_0, %c0_i32_1, %c0_i32_2, %c0_i32_3 : i32, i32, i32, i32, i32, i32
  }
  func.func @transform_3(%arg0: i32, %arg1: i32) -> (i32, i32, i32, i32) {
    %c0_i32 = arith.constant 0 : i32
    %c0_i32_0 = arith.constant 0 : i32
    %c0_i32_1 = arith.constant 0 : i32
    %c0_i32_2 = arith.constant 0 : i32
    %c0_i32_3 = arith.constant 0 : i32
    return %c0_i32, %c0_i32_0, %c0_i32_1, %c0_i32_2 : i32, i32, i32, i32
  }
  func.func @transform_4(%arg0: i32, %arg1: i32) -> (i32, i32) {
    %c0_i32 = arith.constant 0 : i32
    %c0_i32_0 = arith.constant 0 : i32
    %c0_i32_1 = arith.constant 0 : i32
    return %c0_i32, %c0_i32_0 : i32, i32
  }
  func.func @transform_5(%arg0: i32, %arg1: i32) -> (i32, i32, i32, i32) {
    %c0_i32 = arith.constant 0 : i32
    %c0_i32_0 = arith.constant 0 : i32
    %c0_i32_1 = arith.constant 0 : i32
    return %arg0, %arg1, %c0_i32, %c0_i32_0 : i32, i32, i32, i32
  }
}

module attributes {stable_mosaic.version = 11 : i64} {
  func.func @kernel(%arg0: i32, %arg1: i32, %arg2: memref<1x2x1x2x4x128xbf16, #tpu.memory_space<vmem>>, %arg3: memref<1x2x1x2x4x128xbf16, #tpu.memory_space<vmem>>, %arg4: memref<1x1x1x2x4x128xbf16, #tpu.memory_space<vmem>>, %arg5: memref<3x3x128x128xbf16, #tpu.memory_space<vmem>>, %arg6: memref<1x128xf32, #tpu.memory_space<vmem>>, %arg7: memref<1x2x4x128xbf16, #tpu.memory_space<vmem>>) attributes {dimension_semantics = [#tpu.dimension_semantics<parallel>, #tpu.dimension_semantics<parallel>], iteration_bounds = array<i64: 2, 2>, scalar_prefetch = 0 : i64, scratch_operands = 0 : i64, tpu.core_type = #tpu.core_type<tc>, window_params = [{transform_indices = @transform_0, window_bounds = array<i64: 1, 2, 1, 2, 4, 128>}, {transform_indices = @transform_1, window_bounds = array<i64: 1, 2, 1, 2, 4, 128>}, {transform_indices = @transform_2, window_bounds = array<i64: 1, 1, 1, 2, 4, 128>}, {pipeline_mode = #tpu.pipeline_mode<synchronous>, transform_indices = @transform_3, window_bounds = array<i64: 3, 3, 128, 128>}, {pipeline_mode = #tpu.pipeline_mode<synchronous>, transform_indices = @transform_4, window_bounds = array<i64: 1, 128>}, {transform_indices = @transform_5, window_bounds = array<i64: 1, 2, 4, 128>}]} {
    %c0 = arith.constant 0 : index
    %c0_0 = arith.constant 0 : index
    %c0_1 = arith.constant 0 : index
    %c0_2 = arith.constant 0 : index
    %c0_3 = arith.constant 0 : index
    %c0_4 = arith.constant 0 : index
    %0 = vector.load %arg2[%c0, %c0_0, %c0_1, %c0_2, %c0_3, %c0_4] : memref<1x2x1x2x4x128xbf16, #tpu.memory_space<vmem>>, vector<1x2x1x2x4x128xbf16>
    %1 = vector.shape_cast %0 : vector<1x2x1x2x4x128xbf16> to vector<2x2x4x128xbf16>
    %c0_5 = arith.constant 0 : index
    %c0_6 = arith.constant 0 : index
    %c0_7 = arith.constant 0 : index
    %c0_8 = arith.constant 0 : index
    %c0_9 = arith.constant 0 : index
    %c0_10 = arith.constant 0 : index
    %2 = vector.load %arg3[%c0_5, %c0_6, %c0_7, %c0_8, %c0_9, %c0_10] : memref<1x2x1x2x4x128xbf16, #tpu.memory_space<vmem>>, vector<1x2x1x2x4x128xbf16>
    %3 = vector.shape_cast %2 : vector<1x2x1x2x4x128xbf16> to vector<2x2x4x128xbf16>
    %c0_i32 = arith.constant 0 : i32
    %4 = arith.cmpi sgt, %arg1, %c0_i32 : i32
    %5 = arith.extui %4 : i1 to i32
    %6 = arith.sitofp %5 : i32 to f32
    %7 = arith.truncf %6 : f32 to bf16
    %c0_11 = arith.constant 0 : index
    %c0_12 = arith.constant 0 : index
    %c0_13 = arith.constant 0 : index
    %c0_14 = arith.constant 0 : index
    %c0_15 = arith.constant 0 : index
    %c0_16 = arith.constant 0 : index
    %8 = vector.load %arg4[%c0_11, %c0_12, %c0_13, %c0_14, %c0_15, %c0_16] : memref<1x1x1x2x4x128xbf16, #tpu.memory_space<vmem>>, vector<1x1x1x2x4x128xbf16>
    %9 = vector.shape_cast %8 : vector<1x1x1x2x4x128xbf16> to vector<2x4x128xbf16>
    %10 = vector.broadcast %7 : bf16 to vector<2x4x128xbf16>
    %11 = arith.mulf %9, %10 : vector<2x4x128xbf16>
    %12 = vector.shape_cast %11 : vector<2x4x128xbf16> to vector<1x2x4x128xbf16>
    %13 = vector.extract_strided_slice %3 {offsets = [0, 0, 0, 0], sizes = [1, 2, 4, 128], strides = [1, 1, 1, 1]} : vector<2x2x4x128xbf16> to vector<1x2x4x128xbf16>
    %14 = tpu.concatenate %12, %13 in 0 : vector<1x2x4x128xbf16>, vector<1x2x4x128xbf16> -> vector<2x2x4x128xbf16>
    %cst = arith.constant 0.000000e+00 : bf16
    %15 = vector.broadcast %cst : bf16 to vector<2x1x128xbf16>
    %cst_17 = arith.constant 0.000000e+00 : f32
    %16 = vector.broadcast %cst_17 : f32 to vector<8x128xf32>
    %17 = vector.extract_strided_slice %14 {offsets = [0, 0, 0, 0], sizes = [2, 1, 4, 128], strides = [1, 1, 1, 1]} : vector<2x2x4x128xbf16> to vector<2x1x4x128xbf16>
    %18 = vector.shape_cast %17 : vector<2x1x4x128xbf16> to vector<2x4x128xbf16>
    %19 = vector.extract_strided_slice %14 {offsets = [0, 1, 0, 0], sizes = [2, 1, 4, 128], strides = [1, 1, 1, 1]} : vector<2x2x4x128xbf16> to vector<2x1x4x128xbf16>
    %20 = vector.shape_cast %19 : vector<2x1x4x128xbf16> to vector<2x4x128xbf16>
    %21 = vector.extract_strided_slice %20 {offsets = [0, 0, 0], sizes = [2, 3, 128], strides = [1, 1, 1]} : vector<2x4x128xbf16> to vector<2x3x128xbf16>
    %22 = tpu.concatenate %15, %21 in 1 : vector<2x1x128xbf16>, vector<2x3x128xbf16> -> vector<2x4x128xbf16>
    %23 = vector.shape_cast %22 : vector<2x4x128xbf16> to vector<8x128xbf16>
    %c0_18 = arith.constant 0 : index
    %c0_19 = arith.constant 0 : index
    %c0_20 = arith.constant 0 : index
    %c0_21 = arith.constant 0 : index
    %24 = vector.load %arg5[%c0_18, %c0_19, %c0_20, %c0_21] : memref<3x3x128x128xbf16, #tpu.memory_space<vmem>>, vector<1x1x128x128xbf16>
    %25 = vector.shape_cast %24 : vector<1x1x128x128xbf16> to vector<128x128xbf16>
    %cst_22 = arith.constant dense<0.000000e+00> : vector<8x128xf32>
    %26 = tpu.matmul %23, %25, %cst_22 {dimension_numbers = #tpu.dot_dimension_numbers<[1], [0], [0], [1], [0, 0, 1, 1], [], []>} : vector<8x128xbf16>, vector<128x128xbf16>, vector<8x128xf32> -> vector<8x128xf32>
    %27 = arith.addf %16, %26 : vector<8x128xf32>
    %28 = vector.shape_cast %18 : vector<2x4x128xbf16> to vector<8x128xbf16>
    %c0_23 = arith.constant 0 : index
    %c1 = arith.constant 1 : index
    %c0_24 = arith.constant 0 : index
    %c0_25 = arith.constant 0 : index
    %29 = vector.load %arg5[%c0_23, %c1, %c0_24, %c0_25] : memref<3x3x128x128xbf16, #tpu.memory_space<vmem>>, vector<1x1x128x128xbf16>
    %30 = vector.shape_cast %29 : vector<1x1x128x128xbf16> to vector<128x128xbf16>
    %cst_26 = arith.constant dense<0.000000e+00> : vector<8x128xf32>
    %31 = tpu.matmul %28, %30, %cst_26 {dimension_numbers = #tpu.dot_dimension_numbers<[1], [0], [0], [1], [0, 0, 1, 1], [], []>} : vector<8x128xbf16>, vector<128x128xbf16>, vector<8x128xf32> -> vector<8x128xf32>
    %32 = arith.addf %27, %31 : vector<8x128xf32>
    %33 = vector.shape_cast %20 : vector<2x4x128xbf16> to vector<8x128xbf16>
    %c0_27 = arith.constant 0 : index
    %c2 = arith.constant 2 : index
    %c0_28 = arith.constant 0 : index
    %c0_29 = arith.constant 0 : index
    %34 = vector.load %arg5[%c0_27, %c2, %c0_28, %c0_29] : memref<3x3x128x128xbf16, #tpu.memory_space<vmem>>, vector<1x1x128x128xbf16>
    %35 = vector.shape_cast %34 : vector<1x1x128x128xbf16> to vector<128x128xbf16>
    %cst_30 = arith.constant dense<0.000000e+00> : vector<8x128xf32>
    %36 = tpu.matmul %33, %35, %cst_30 {dimension_numbers = #tpu.dot_dimension_numbers<[1], [0], [0], [1], [0, 0, 1, 1], [], []>} : vector<8x128xbf16>, vector<128x128xbf16>, vector<8x128xf32> -> vector<8x128xf32>
    %37 = arith.addf %32, %36 : vector<8x128xf32>
    %38 = vector.extract_strided_slice %1 {offsets = [0, 0, 0, 0], sizes = [2, 1, 4, 128], strides = [1, 1, 1, 1]} : vector<2x2x4x128xbf16> to vector<2x1x4x128xbf16>
    %39 = vector.shape_cast %38 : vector<2x1x4x128xbf16> to vector<2x4x128xbf16>
    %40 = vector.extract_strided_slice %1 {offsets = [0, 1, 0, 0], sizes = [2, 1, 4, 128], strides = [1, 1, 1, 1]} : vector<2x2x4x128xbf16> to vector<2x1x4x128xbf16>
    %41 = vector.shape_cast %40 : vector<2x1x4x128xbf16> to vector<2x4x128xbf16>
    %42 = vector.extract_strided_slice %41 {offsets = [0, 0, 0], sizes = [2, 3, 128], strides = [1, 1, 1]} : vector<2x4x128xbf16> to vector<2x3x128xbf16>
    %43 = tpu.concatenate %15, %42 in 1 : vector<2x1x128xbf16>, vector<2x3x128xbf16> -> vector<2x4x128xbf16>
    %44 = vector.shape_cast %43 : vector<2x4x128xbf16> to vector<8x128xbf16>
    %c1_31 = arith.constant 1 : index
    %c0_32 = arith.constant 0 : index
    %c0_33 = arith.constant 0 : index
    %c0_34 = arith.constant 0 : index
    %45 = vector.load %arg5[%c1_31, %c0_32, %c0_33, %c0_34] : memref<3x3x128x128xbf16, #tpu.memory_space<vmem>>, vector<1x1x128x128xbf16>
    %46 = vector.shape_cast %45 : vector<1x1x128x128xbf16> to vector<128x128xbf16>
    %cst_35 = arith.constant dense<0.000000e+00> : vector<8x128xf32>
    %47 = tpu.matmul %44, %46, %cst_35 {dimension_numbers = #tpu.dot_dimension_numbers<[1], [0], [0], [1], [0, 0, 1, 1], [], []>} : vector<8x128xbf16>, vector<128x128xbf16>, vector<8x128xf32> -> vector<8x128xf32>
    %48 = arith.addf %37, %47 : vector<8x128xf32>
    %49 = vector.shape_cast %39 : vector<2x4x128xbf16> to vector<8x128xbf16>
    %c1_36 = arith.constant 1 : index
    %c1_37 = arith.constant 1 : index
    %c0_38 = arith.constant 0 : index
    %c0_39 = arith.constant 0 : index
    %50 = vector.load %arg5[%c1_36, %c1_37, %c0_38, %c0_39] : memref<3x3x128x128xbf16, #tpu.memory_space<vmem>>, vector<1x1x128x128xbf16>
    %51 = vector.shape_cast %50 : vector<1x1x128x128xbf16> to vector<128x128xbf16>
    %cst_40 = arith.constant dense<0.000000e+00> : vector<8x128xf32>
    %52 = tpu.matmul %49, %51, %cst_40 {dimension_numbers = #tpu.dot_dimension_numbers<[1], [0], [0], [1], [0, 0, 1, 1], [], []>} : vector<8x128xbf16>, vector<128x128xbf16>, vector<8x128xf32> -> vector<8x128xf32>
    %53 = arith.addf %48, %52 : vector<8x128xf32>
    %54 = vector.shape_cast %41 : vector<2x4x128xbf16> to vector<8x128xbf16>
    %c1_41 = arith.constant 1 : index
    %c2_42 = arith.constant 2 : index
    %c0_43 = arith.constant 0 : index
    %c0_44 = arith.constant 0 : index
    %55 = vector.load %arg5[%c1_41, %c2_42, %c0_43, %c0_44] : memref<3x3x128x128xbf16, #tpu.memory_space<vmem>>, vector<1x1x128x128xbf16>
    %56 = vector.shape_cast %55 : vector<1x1x128x128xbf16> to vector<128x128xbf16>
    %cst_45 = arith.constant dense<0.000000e+00> : vector<8x128xf32>
    %57 = tpu.matmul %54, %56, %cst_45 {dimension_numbers = #tpu.dot_dimension_numbers<[1], [0], [0], [1], [0, 0, 1, 1], [], []>} : vector<8x128xbf16>, vector<128x128xbf16>, vector<8x128xf32> -> vector<8x128xf32>
    %58 = arith.addf %53, %57 : vector<8x128xf32>
    %59 = vector.extract_strided_slice %3 {offsets = [0, 0, 0, 0], sizes = [2, 1, 4, 128], strides = [1, 1, 1, 1]} : vector<2x2x4x128xbf16> to vector<2x1x4x128xbf16>
    %60 = vector.shape_cast %59 : vector<2x1x4x128xbf16> to vector<2x4x128xbf16>
    %61 = vector.extract_strided_slice %3 {offsets = [0, 1, 0, 0], sizes = [2, 1, 4, 128], strides = [1, 1, 1, 1]} : vector<2x2x4x128xbf16> to vector<2x1x4x128xbf16>
    %62 = vector.shape_cast %61 : vector<2x1x4x128xbf16> to vector<2x4x128xbf16>
    %63 = vector.extract_strided_slice %62 {offsets = [0, 0, 0], sizes = [2, 3, 128], strides = [1, 1, 1]} : vector<2x4x128xbf16> to vector<2x3x128xbf16>
    %64 = tpu.concatenate %15, %63 in 1 : vector<2x1x128xbf16>, vector<2x3x128xbf16> -> vector<2x4x128xbf16>
    %65 = vector.shape_cast %64 : vector<2x4x128xbf16> to vector<8x128xbf16>
    %c2_46 = arith.constant 2 : index
    %c0_47 = arith.constant 0 : index
    %c0_48 = arith.constant 0 : index
    %c0_49 = arith.constant 0 : index
    %66 = vector.load %arg5[%c2_46, %c0_47, %c0_48, %c0_49] : memref<3x3x128x128xbf16, #tpu.memory_space<vmem>>, vector<1x1x128x128xbf16>
    %67 = vector.shape_cast %66 : vector<1x1x128x128xbf16> to vector<128x128xbf16>
    %cst_50 = arith.constant dense<0.000000e+00> : vector<8x128xf32>
    %68 = tpu.matmul %65, %67, %cst_50 {dimension_numbers = #tpu.dot_dimension_numbers<[1], [0], [0], [1], [0, 0, 1, 1], [], []>} : vector<8x128xbf16>, vector<128x128xbf16>, vector<8x128xf32> -> vector<8x128xf32>
    %69 = arith.addf %58, %68 : vector<8x128xf32>
    %70 = vector.shape_cast %60 : vector<2x4x128xbf16> to vector<8x128xbf16>
    %c2_51 = arith.constant 2 : index
    %c1_52 = arith.constant 1 : index
    %c0_53 = arith.constant 0 : index
    %c0_54 = arith.constant 0 : index
    %71 = vector.load %arg5[%c2_51, %c1_52, %c0_53, %c0_54] : memref<3x3x128x128xbf16, #tpu.memory_space<vmem>>, vector<1x1x128x128xbf16>
    %72 = vector.shape_cast %71 : vector<1x1x128x128xbf16> to vector<128x128xbf16>
    %cst_55 = arith.constant dense<0.000000e+00> : vector<8x128xf32>
    %73 = tpu.matmul %70, %72, %cst_55 {dimension_numbers = #tpu.dot_dimension_numbers<[1], [0], [0], [1], [0, 0, 1, 1], [], []>} : vector<8x128xbf16>, vector<128x128xbf16>, vector<8x128xf32> -> vector<8x128xf32>
    %74 = arith.addf %69, %73 : vector<8x128xf32>
    %75 = vector.shape_cast %62 : vector<2x4x128xbf16> to vector<8x128xbf16>
    %c2_56 = arith.constant 2 : index
    %c2_57 = arith.constant 2 : index
    %c0_58 = arith.constant 0 : index
    %c0_59 = arith.constant 0 : index
    %76 = vector.load %arg5[%c2_56, %c2_57, %c0_58, %c0_59] : memref<3x3x128x128xbf16, #tpu.memory_space<vmem>>, vector<1x1x128x128xbf16>
    %77 = vector.shape_cast %76 : vector<1x1x128x128xbf16> to vector<128x128xbf16>
    %cst_60 = arith.constant dense<0.000000e+00> : vector<8x128xf32>
    %78 = tpu.matmul %75, %77, %cst_60 {dimension_numbers = #tpu.dot_dimension_numbers<[1], [0], [0], [1], [0, 0, 1, 1], [], []>} : vector<8x128xbf16>, vector<128x128xbf16>, vector<8x128xf32> -> vector<8x128xf32>
    %79 = arith.addf %74, %78 : vector<8x128xf32>
    %c0_61 = arith.constant 0 : index
    %c0_62 = arith.constant 0 : index
    %80 = vector.load %arg6[%c0_61, %c0_62] : memref<1x128xf32, #tpu.memory_space<vmem>>, vector<1x128xf32>
    %81 = vector.broadcast %80 : vector<1x128xf32> to vector<8x128xf32>
    %82 = arith.addf %79, %81 : vector<8x128xf32>
    %83 = vector.shape_cast %82 : vector<8x128xf32> to vector<2x4x128xf32>
    %84 = arith.truncf %83 : vector<2x4x128xf32> to vector<2x4x128xbf16>
    %c0_63 = arith.constant 0 : index
    %c0_64 = arith.constant 0 : index
    %c0_65 = arith.constant 0 : index
    %c0_66 = arith.constant 0 : index
    %85 = vector.load %arg7[%c0_63, %c0_64, %c0_65, %c0_66] : memref<1x2x4x128xbf16, #tpu.memory_space<vmem>>, vector<1x2x4x128xbf16>
    %86 = vector.shape_cast %85 : vector<1x2x4x128xbf16> to vector<2x4x128xbf16>
    %87 = vector.shape_cast %84 : vector<2x4x128xbf16> to vector<1x2x4x128xbf16>
    tpu.vector_store %arg7[%c0_63, %c0_64, %c0_65, %c0_66], %87 {strides = array<i32>} : memref<1x2x4x128xbf16, #tpu.memory_space<vmem>>, vector<1x2x4x128xbf16>,
    return
  }
  func.func @transform_0(%arg0: i32, %arg1: i32) -> (i32, i32, i32, i32, i32, i32) {
    %c0_i32 = arith.constant 0 : i32
    %c0_i32_0 = arith.constant 0 : i32
    %c0_i32_1 = arith.constant 0 : i32
    %c0_i32_2 = arith.constant 0 : i32
    %c0_i32_3 = arith.constant 0 : i32
    return %arg0, %arg1, %c0_i32, %c0_i32_0, %c0_i32_1, %c0_i32_2 : i32, i32, i32, i32, i32, i32
  }
  func.func @transform_1(%arg0: i32, %arg1: i32) -> (i32, i32, i32, i32, i32, i32) {
    %c1_i32 = arith.constant 1 : i32
    %c0_i32 = arith.constant 0 : i32
    %c0_i32_0 = arith.constant 0 : i32
    %c0_i32_1 = arith.constant 0 : i32
    %c0_i32_2 = arith.constant 0 : i32
    return %arg0, %arg1, %c1_i32, %c0_i32, %c0_i32_0, %c0_i32_1 : i32, i32, i32, i32, i32, i32
  }
  func.func @transform_2(%arg0: i32, %arg1: i32) -> (i32, i32, i32, i32, i32, i32) {
    %c2_i32 = arith.constant 2 : i32
    %0 = arith.muli %arg1, %c2_i32 : i32
    %c1_i32 = arith.constant 1 : i32
    %1 = arith.subi %0, %c1_i32 : i32
    %c0_i32 = arith.constant 0 : i32
    %2 = arith.maxsi %1, %c0_i32 : i32
    %c1_i32_0 = arith.constant 1 : i32
    %c0_i32_1 = arith.constant 0 : i32
    %c0_i32_2 = arith.constant 0 : i32
    %c0_i32_3 = arith.constant 0 : i32
    %c0_i32_4 = arith.constant 0 : i32
    return %arg0, %2, %c1_i32_0, %c0_i32_1, %c0_i32_2, %c0_i32_3 : i32, i32, i32, i32, i32, i32
  }
  func.func @transform_3(%arg0: i32, %arg1: i32) -> (i32, i32, i32, i32) {
    %c0_i32 = arith.constant 0 : i32
    %c0_i32_0 = arith.constant 0 : i32
    %c0_i32_1 = arith.constant 0 : i32
    %c0_i32_2 = arith.constant 0 : i32
    %c0_i32_3 = arith.constant 0 : i32
    return %c0_i32, %c0_i32_0, %c0_i32_1, %c0_i32_2 : i32, i32, i32, i32
  }
  func.func @transform_4(%arg0: i32, %arg1: i32) -> (i32, i32) {
    %c0_i32 = arith.constant 0 : i32
    %c0_i32_0 = arith.constant 0 : i32
    %c0_i32_1 = arith.constant 0 : i32
    return %c0_i32, %c0_i32_0 : i32, i32
  }
  func.func @transform_5(%arg0: i32, %arg1: i32) -> (i32, i32, i32, i32) {
    %c0_i32 = arith.constant 0 : i32
    %c0_i32_0 = arith.constant 0 : i32
    %c0_i32_1 = arith.constant 0 : i32
    return %arg0, %arg1, %c0_i32, %c0_i32_0 : i32, i32, i32, i32
  }
}

</mosaic_0001>

<bundles_post_ra>
// kernel: hyper_encoder.4
= control target key start
LH: loop header
LB: loop body
LE: loop exit
PB: predicated region body
PF: predicated region fallthrough
CT: control target
= control target key end

     0   :  { %s2172_s18 = smov 0   ;;  %s2174_s19 = smov 0   ;;  %s2583_s0 = inlined_call_operand.vmem [shape: bf16[2,8,2,2,8,128], index: 0, kind: input, shape index: {}, may-alias: {0,1,2}]   ;;  %s2584_s1 = inlined_call_operand.vmem [shape: bf16[2,8,2,2,8,128], index: 1, kind: input, shape index: {}, may-alias: {0,1,2}]   ;;  %s2585_s2 = inlined_call_operand.vmem [shape: bf16[2,8,2,2,8,128], index: 2, kind: input, shape index: {}, may-alias: {0,1,2}]   ;;  %s2586_s3 = inlined_call_operand.vmem [shape: bf16[3,3,128,128], index: 3, kind: input, shape index: {}]   ;;  %s2587_s4 = inlined_call_operand.vmem [shape: f32[1,128], index: 4, kind: input, shape index: {}]   ;;  %s2588_s5 = inlined_call_operand.vmem [shape: bf16[2,8,8,128], index: 5, kind: output, shape index: {}]  }
   0x1   :  { %s2176_s20 = smov 0   ;;  %s2178_s21 = smov 0  }
   0x2   :  { %s2180_s22 = smov 0   ;;  %s2182_s23 = smov 0  }
   0x3   :  { %s2184_s24 = smov 0  }
   0x4 LB: > { %s24_s25 = sadd.s32 1, %s2132_s22  ;;  %s27_s26 = sadd.s32 1, %s2136_s23  ;;  %s2140_s24 = sphi %s2184_s24, %s15_s24   ;;  %s2136_s23 = sphi %s2182_s23, %s2597_s23   ;;  %s2132_s22 = sphi %s2180_s22, %s2596_s22   ;;  %s2128_s21 = sphi %s2178_s21, %s2595_s21   ;;  %s2124_s20 = sphi %s2176_s20, %s2594_s20   ;;  %s2120_s19 = sphi %s2174_s19, %s2593_s19   ;;  %s2116_s18 = sphi %s2172_s18, %s2592_s18  }
   0x5   : > { %p25_p0 = scmp.ge.s32.totalorder %s24_s25, 4  ;;  %p43_p1 = scmp.ne.s32.totalorder %s2120_s19, %s2116_s18 }
   0x6   : > { %p44_p2 = scmp.eq.s32.totalorder %s2140_s24, 0  ;;  %s36_s6 = sadd.s32 1, %s2120_s19 }
   0x7   : > { %s2599_s25 = smov (%p25_p0, %s24_s25), 0  ;;  %s2601_s26 = smov (!%p25_p0, %s27_s26), %s2136_s23 }
   0x8   : > { %p2215_p3 = por %p44_p2, %p43_p1  ;;  %p29_p4 = scmp.ge.s32.totalorder %s2601_s26, 2 }
   0x9   : > { %s32_s28 = ssub.s32 %s2132_s22, %s2599_s25  ;;  %p1480_p6 = scmp.ge.s32.totalorder %s2140_s24, 8 }
   0xa   : > { %s2603_s26 = smov (%p29_p4, %s2601_s26), 0 }
   0xb   : > { %s31_s29 = ssub.s32 %s2136_s23, %s2603_s26  ;;  %209 = sbr.rel (%p1480_p6) target bundleno = 34 (0x22), region = 24 }
   0xc   : > { %s33_s30 = sor.u32 %s32_s28, %s31_s29 }
   0xd   : > { %p34_p5 = scmp.eq.s32.totalorder %s33_s30, 0 }
   0xf   : > { %s2227_s7 = scalar_select %p34_p5, %s2120_s19, %s36_s6  }
  0x10   : > { %212 = sbr.rel (!%p2215_p3) target bundleno = 25 (0x19), region = 28  ;;  %s214_s8 = sand.u32 (%p2215_p3), 1, %s2120_s19  }
  0x11   : > { %s1934_s9 = sshll.u32 (%p2215_p3), %s2132_s22, 3  ;;  %s1481_s10 = sshll.u32 (%p2215_p3), %s214_s8, 4 }
  0x12   : > { %s1484_s11 = sshll.u32 (%p2215_p3), %s2136_s23, 5  ;;  %s216_s17 = scalar_lea.vmem (%p2215_p3), [#allocation2], %s1481_s10 }
  0x13   : > { %s220_s12 = sadd.s32 (%p2215_p3), %s1934_s9, %s1484_s11 }
  0x14   : > { %s1485_s13 = sshll.u32 (%p2215_p3), %s220_s12, 2 }
  0x15   : > { %s222_s16 = scalar_lea.vmem %s2583_s0, %s1485_s13 }
  0x16   : > { %v239_v0 = vld [vmem:[%s222_s16] sm:$0xff]   ;;  %v243_v1 = vld [vmem:[%s222_s16 + $0x10] sm:$0xff]  }
  0x17   : > { %240 = vst [vmem:[%s216_s17] sm:$0xff] %v239_v0  }
  0x18   : > { %244 = vst [vmem:[%s216_s17 + $0x8] sm:$0xff] %v243_v1  }
  0x19 PF: > { %278 = sbr.rel (!%p2215_p3) target bundleno = 34 (0x22), region = 69  ;;  %s280_s28 = sand.u32 (%p2215_p3), 1, %s2120_s19  }
  0x1a   : > { %s1487_s29 = sshll.u32 (%p2215_p3), %s2132_s22, 3  ;;  %s1486_s30 = sshll.u32 (%p2215_p3), %s280_s28, 4 }
  0x1b   : > { %s1488_s6 = sshll.u32 (%p2215_p3), %s2136_s23, 5  ;;  %s282_s10 = scalar_lea.vmem (%p2215_p3), [#allocation3], %s1486_s30 }
  0x1c   : > { %s1375_s8 = sadd.s32 (%p2215_p3), %s1488_s6, %s1487_s29 }
  0x1d   : > { %s1489_s9 = sshll.u32 (%p2215_p3), %s1375_s8, 2 }
  0x1e   : > { %s1377_s13 = scalar_lea.vmem %s2584_s1, %s1489_s9 }
  0x1f   : > { %v1490_v2 = vld [vmem:[%s1377_s13 + $0x8] sm:$0xff]   ;;  %v1492_v3 = vld [vmem:[%s1377_s13 + $0x18] sm:$0xff]  }
  0x20   : > { %307 = vst [vmem:[%s282_s10] sm:$0xff] %v1490_v2  }
  0x21   : > { %311 = vst [vmem:[%s282_s10 + $0x8] sm:$0xff] %v1492_v3  }
  0x22 PF: > { %p1494_p7 = scmp.ge.s32.totalorder %s2140_s24, 1  ;;  %p365_p8 = scmp.lt.s32.totalorder %s2140_s24, 9 }
  0x24   : > { %p366_p9 = pnand %p1494_p7, %p365_p8 }
  0x25   : > { %s2258_s29 = sshll.u32 (!%p366_p9), %s2124_s20, 1  ;;  %p434_p11 = scmp.lt.s32.totalorder (!%p366_p9), %s2128_s21, 1 }
  0x26   : > { %369 = sbr.rel (%p366_p9) target bundleno = 283 (0x11b), region = 114  ;;  %s1498_s8 = sadd.s32 (!%p366_p9), 4294967295, %s2258_s29 }
  0x27   : > { %p432_p10 = scmp.gt.s32.totalorder (!%p366_p9), %s1498_s8, 0  ;;  %s372_s16 = sand.u32 (!%p366_p9), 1, %s2116_s18  }
  0x28   : > { %p1499_p12 = scmp.lt.s32.totalorder (!%p366_p9), %s1498_s8, 7  ;;  %s2293_s13 = sshll.u32 (!%p366_p9), %s372_s16, 4 }
  0x29   : > { %p467_p13 = scmp.gt.s32.totalorder (!%p366_p9), %s2124_s20, 0  ;;  %s2326_s16 = scalar_lea.vmem (!%p366_p9), [#allocation2], %s2293_s13 }
  0x2a   : > { %p451_p1 = scmp.lt.s32.totalorder (!%p366_p9), %s2258_s29, 7 }
  0x2b   : > { %v1953_v4 = vld [vmem:[%s2586_s3 + $0x78] sm:$0xff]  ;;  %v1952_v8 = vld [vmem:[%s2586_s3 + $0x70] sm:$0xff]  ;;  %s2605_s8 = smov (!%p432_p10, %s1498_s8), 0  ;;  %v1951_v12 = vld [vmem:[%s2586_s3 + $0x68] sm:$0xff]  ;;  %s2607_s21 = smov (!%p434_p11, %s2128_s21), 1  ;;  %vm515_vm0 = vcmask 1040384  }
  0x2c   : > { %v1961_v5 = vld [vmem:[%s2586_s3 + $0xb8] sm:$0xff]  ;;  %607 = vmatpush.bf16.msra.mxu0 %v1953_v4  ;;  %v1960_v9 = vld [vmem:[%s2586_s3 + $0xb0] sm:$0xff]  ;;  %v1959_v13 = vld [vmem:[%s2586_s3 + $0xa8] sm:$0xff]  ;;  %s2609_s8 = smov (!%p1499_p12, %s2605_s8), 7  ;;  %s1505_s6 = sshll.u32 %s2607_s21, 5 }
  0x2d   : > { %v1945_v6 = vld [vmem:[%s2586_s3 + $0x38] sm:$0xff]  ;;  %756 = vmatpush.bf16.msra.mxu2 %v1961_v5  ;;  %v1944_v10 = vld [vmem:[%s2586_s3 + $0x30] sm:$0xff]  ;;  %v1943_v14 = vld [vmem:[%s2586_s3 + $0x28] sm:$0xff]  ;;  %s1504_s20 = sshll.u32 %s2609_s8, 2  ;;  %vm516_vm1 = vsmask.f32 256 }
  0x2e   : > { %v1969_v7 = vld [vmem:[%s2586_s3 + $0xf8] sm:$0xff]  ;;  %675 = vmatpush.bf16.msra.mxu1 %v1945_v6  ;;  %v1968_v11 = vld [vmem:[%s2586_s3 + $0xf0] sm:$0xff]  ;;  %v1967_v15 = vld [vmem:[%s2586_s3 + $0xe8] sm:$0xff]  ;;  %s468_s9 = scalar_select %p467_p13, 1, 0 }
  0x2f   : > { %867 = vmatpush.bf16.msra.mxu3 %v1969_v7  ;;  %v1950_v16 = vld [vmem:[%s2586_s3 + $0x60] sm:$0xff]  ;;  %v1949_v20 = vld [vmem:[%s2586_s3 + $0x58] sm:$0xff]  ;;  %s2315_s27 = sadd.s32 %s1505_s6, %s1504_s20  ;;  %s381_s20 = scalar_lea.vmem [#allocation3], %s2293_s13  ;;  %v1948_v29 = vld [vmem:[%s2586_s3 + $0x50] sm:$0xff] }
  0x30   : > { %608 = vmatpush.bf16.msra.mxu0 %v1952_v8  ;;  %v1958_v17 = vld [vmem:[%s2586_s3 + $0xa0] sm:$0xff]  ;;  %v1957_v21 = vld [vmem:[%s2586_s3 + $0x98] sm:$0xff]  ;;  %s2323_s28 = scvt.s32.f32 %s468_s9  ;;  %s1506_s30 = sshll.u32 %s2315_s27, 2  ;;  %v1956_v30 = vld [vmem:[%s2586_s3 + $0x90] sm:$0xff] }
  0x31   : > { %757 = vmatpush.bf16.msra.mxu2 %v1960_v9  ;;  %v1942_v18 = vld [vmem:[%s2586_s3 + $0x20] sm:$0xff]  ;;  %v1941_v22 = vld [vmem:[%s2586_s3 + $0x18] sm:$0xff]  ;;  %v1940_v31 = vld [vmem:[%s2586_s3 + $0x10] sm:$0xff]  ;;  %s1407_s11 = scalar_lea.vmem %s2585_s2, %s1506_s30  ;;  %s2613_s29 = smov (!%p451_p1, %s2258_s29), 7 }
  0x32   : > { %676 = vmatpush.bf16.msra.mxu1 %v1944_v10  ;;  %v1966_v19 = vld [vmem:[%s2586_s3 + $0xe0] sm:$0xff]  ;;  %v1965_v23 = vld [vmem:[%s2586_s3 + $0xd8] sm:$0xff]  ;;  %s472_s6 = sshrl.u32 %s2323_s28, 16  ;;  %p471_p0 = scmp.ne.f32.partialorder %s2323_s28, %s2323_s28  ;;  %v1964_v32 = vld [vmem:[%s2586_s3 + $0xd0] sm:$0xff] }
  0x33   : > { %868 = vmatpush.bf16.msra.mxu3 %v1968_v11  ;;  %v460_v24 = vld [vmem:[%s2326_s16 + $0x4] sm:$0xf]  ;;  %v462_v25 = vld [vmem:[%s2326_s16 + $0xc] sm:$0xf]  ;;  %s473_s10 = sand.u32 1, %s472_s6  ;;  %vm2385_vm2 = vmand %vm515_vm0, %vm516_vm1 }
  0x34   : > { %609 = vmatpush.bf16.msra.mxu0 %v1951_v12  ;;  %v2334_v26 = vld [vmem:[%s381_s20] sm:$0xff]   ;;  %v2337_v27 = vunpack.c.l.b16 %v460_v24  ;;  %v2339_v28 = vunpack.c.l.b16 %v462_v25  ;;  %s474_s17 = sadd.s32 32767, %s473_s10  ;;  %v1947_v38 = vld [vmem:[%s2586_s3 + $0x48] sm:$0xff]  ;;  %v1977_v55 = vld [vmem:[%s2586_s3 + $0x138] sm:$0xff] }
  0x35   : > { %758 = vmatpush.bf16.msra.mxu2 %v1959_v13  ;;  %v2363_v35 = vunpack.c.h.b16 %v2334_v26  ;;  %s475_s18 = sadd.s32 %s474_s17, %s2323_s28  ;;  %v1955_v39 = vld [vmem:[%s2586_s3 + $0x88] sm:$0xff]  ;;  %v1946_v50 = vld [vmem:[%s2586_s3 + $0x40] sm:$0xff]  ;;  %v1993_v56 = vld [vmem:[%s2586_s3 + $0x1b8] sm:$0xff]  ;;  %v2012_v9 = vunpack.c.l.b16 %v2334_v26 }
  0x36   : > { %677 = vmatpush.bf16.msra.mxu1 %v1943_v14  ;;  %v776_v33 = vpack.c.b16 %v2337_v27, %v2337_v27  ;;  %v777_v34 = vpack.c.b16 %v2339_v28, %v2339_v28  ;;  %s476_s12 = sand.u32 4294901760, %s475_s18  ;;  %v1939_v42 = vld [vmem:[%s2586_s3 + $0x8] sm:$0xff]  ;;  %v1954_v51 = vld [vmem:[%s2586_s3 + $0x80] sm:$0xff]  ;;  %v1985_v2 = vld [vmem:[%s2586_s3 + $0x178] sm:$0xff] }
  0x37   : > { %869 = vmatpush.bf16.msra.mxu3 %v1967_v15  ;;  %s2611_s12 = smov (%p471_p0, %s476_s12), 2143289344  ;;  %v1963_v43 = vld [vmem:[%s2586_s3 + $0xc8] sm:$0xff]  ;;  %v498_v46 = vpack.c.b16 %v2363_v35, %v2363_v35  ;;  %v1938_v59 = vld [vmem:[%s2586_s3] sm:$0xff]  ;;  %v2001_v3 = vld [vmem:[%s2586_s3 + $0x1f8] sm:$0xff] }
  0x38   : > { %610 = vmatpush.bf16.msra.mxu0 %v1950_v16  ;;  %v779_v36 = vshrl.u32 %v776_v33, 16  ;;  %v782_v37 = vshll.u32 %v776_v33, 16  ;;  %v786_v40 = vshrl.u32 %v777_v34, 16  ;;  %v789_v41 = vshll.u32 %v777_v34, 16  ;;  %v2028_v44 = vld [vmem:[%s1407_s11 + $0x8] sm:$0xff]   ;;  %s479_s9 = sshrl.u32 %s2611_s12, 16 }
  0x39   : > { %759 = vmatpush.bf16.msra.mxu2 %v1958_v17  ;;  %s482_s28 = sshll.u32 %s479_s9, 16  ;;  %v2020_v52 = vunpack.c.l.bf16 %v2028_v44  ;;  %v2021_v53 = vunpack.c.h.bf16 %v2028_v44  ;;  %v1962_v60 = vld [vmem:[%s2586_s3 + $0xc0] sm:$0xff]  ;;  %v2411_v61 = vld [vmem:[%s381_s20 + $0x8] sm:$0xff]   ;;  %v507_v63 = vshrl.u32 %v498_v46, 16  ;;  %v1976_v7 = vld [vmem:[%s2586_s3 + $0x130] sm:$0xff]  ;;  %v510_v11 = vshll.u32 %v498_v46, 16 }
  0x3a   : > { %678 = vmatpush.bf16.msra.mxu1 %v1942_v18  ;;  %v781_v45 = vrot.slane %v779_v36, 7  ;;  %v788_v48 = vrot.slane %v786_v40, 7  ;;  %s483_s27 = sor.u32 %s482_s28, %s479_s9  ;;  %v1992_v8 = vld [vmem:[%s2586_s3 + $0x1b0] sm:$0xff]  ;;  %v2429_v10 = vunpack.c.h.b16 %v2411_v61  ;;  %v1974_v34 = vld [vmem:[%s2586_s3 + $0x120] sm:$0xff]  ;;  %v1989_v44 = vld [vmem:[%s2586_s3 + $0x198] sm:$0xff] }
  0x3b   : > { %870 = vmatpush.bf16.msra.mxu3 %v1966_v19  ;;  %v484_v57 = vstv %s483_s27  ;;  %v509_v14 = vrot.slane %v507_v63, 7  ;;  %v1984_v16 = vld [vmem:[%s2586_s3 + $0x170] sm:$0xff]  ;;  %v1990_v36 = vld [vmem:[%s2586_s3 + $0x1a0] sm:$0xff]  ;;  %v1995_v63 = vld [vmem:[%s2586_s3 + $0x1c8] sm:$0xff] }
  0x3c   : > { %611 = vmatpush.bf16.msra.mxu0 %v1949_v20  ;;  %v784_v49 = vor.u32 %v782_v37, %v781_v45  ;;  %v791_v54 = vor.u32 %v789_v41, %v788_v48  ;;  %v488_v62 = vunpack.c.l.bf16 %v484_v57  ;;  %v2000_v17 = vld [vmem:[%s2586_s3 + $0x1f0] sm:$0xff]  ;;  %v1975_v20 = vld [vmem:[%s2586_s3 + $0x128] sm:$0xff]  ;;  %v1982_v40 = vld [vmem:[%s2586_s3 + $0x160] sm:$0xff] }
  0x3d   : > { %760 = vmatpush.bf16.msra.mxu2 %v1957_v21  ;;  %v1991_v21 = vld [vmem:[%s2586_s3 + $0x1a8] sm:$0xff]  ;;  %v1998_v41 = vld [vmem:[%s2586_s3 + $0x1e0] sm:$0xff]  ;;  %v1996_v57 = vld [vmem:[%s2586_s3 + $0x1d0] sm:$0xff] }
  0x3e   : > { %679 = vmatpush.bf16.msra.mxu1 %v1941_v22  ;;  %v794_v58 = vsel %vm2385_vm2, 0, %v784_v49  ;;  %v795_v0 = vsel %vm2385_vm2, 0, %v791_v54  ;;  %v489_v5 = vmul.f32 %v2020_v52, %v488_v62  ;;  %v490_v6 = vmul.f32 %v2021_v53, %v488_v62  ;;  %v1981_v52 = vld [vmem:[%s2586_s3 + $0x158] sm:$0xff]  ;;  %v1972_v54 = vld [vmem:[%s2586_s3 + $0x110] sm:$0xff]  ;;  %v1986_v47 = vld [vmem:[%s2586_s3 + $0x180] sm:$0xff] }
  0x3f   : > { %871 = vmatpush.bf16.msra.mxu3 %v1965_v23  ;;  %v815_v1 = vunpack.c.l.b16 %v794_v58  ;;  %v816_v4 = vunpack.c.l.b16 %v795_v0  ;;  %v1055_v22 = vpack.c.b16 %v2429_v10, %v2429_v10  ;;  %v1980_v58 = vld [vmem:[%s2586_s3 + $0x150] sm:$0xff]  ;;  %v1979_v0 = vld [vmem:[%s2586_s3 + $0x148] sm:$0xff]  ;;  %v2006_v26 = vld [vmem:[%s2586_s3 + $0x220] sm:$0xff] }
  0x40   : > { %612 = vmatpush.bf16.msra.mxu0 %v1948_v29  ;;  %v491_v12 = vpack.c.bf16 %v489_v5, %v489_v5  ;;  %v492_v13 = vpack.c.bf16 %v490_v6, %v490_v6  ;;  %v512_v29 = vor.u32 %v510_v11, %v509_v14  ;;  %v2009_v5 = vld [vmem:[%s2586_s3 + $0x238] sm:$0xff]  ;;  %v2016_v6 = vunpack.c.l.b16 %v2411_v61  ;;  %v2008_v61 = vld [vmem:[%s2586_s3 + $0x230] sm:$0xff] }
  0x41   : > { %761 = vmatpush.bf16.msra.mxu2 %v1956_v30  ;;  %v817_v15 = vpack.c.b16 %v816_v4, %v815_v1  ;;  %v1983_v30 = vld [vmem:[%s2586_s3 + $0x168] sm:$0xff]  ;;  %v1060_v49 = vshll.u32 %v1055_v22, 16  ;;  %v1970_v1 = vld [vmem:[%s2586_s3 + $0x100] sm:$0xff]  ;;  %v987_v14 = vpack.c.b16 %v2339_v28, %v2337_v27  ;;  %v2005_v27 = vld [vmem:[%s2586_s3 + $0x218] sm:$0xff] }
  0x42   : > { %680 = vmatpush.bf16.msra.mxu1 %v1940_v31  ;;  %v555_v18 = vunpack.c.l.b16 %v491_v12  ;;  %v495_v19 = vunpack.c.l.b16 %v492_v13  ;;  %v1999_v31 = vld [vmem:[%s2586_s3 + $0x1e8] sm:$0xff]  ;;  %v1169_v13 = vpack.c.b16 %v2016_v6, %v2012_v9  ;;  %v2004_v28 = vld [vmem:[%s2586_s3 + $0x210] sm:$0xff] }
  0x43   : > { %872 = vmatpush.bf16.msra.mxu3 %v1964_v32 }
  0x44   : > { %613 = vmatpush.bf16.msra.mxu0 %v1947_v38  ;;  %v557_v23 = vpack.c.b16 %v2012_v9, %v555_v18  ;;  %v497_v24 = vpack.c.b16 %v495_v19, %v495_v19  ;;  %v706_v25 = vpack.c.b16 %v2363_v35, %v495_v19  ;;  %v519_v38 = vsel %vm2385_vm2, 0, %v512_v29  ;;  %v2003_v9 = vld [vmem:[%s2586_s3 + $0x208] sm:$0xff] }
  0x45   : > { %762 = vmatpush.bf16.msra.mxu2 %v1955_v39  ;;  %v1057_v39 = vshrl.u32 %v1055_v22, 16  ;;  %v624_v45 = vunpack.c.l.b16 %v519_v38 }
  0x46   : > { %681 = vmatpush.bf16.msra.mxu1 %v1939_v42  ;;  %v500_v32 = vshrl.u32 %v497_v24, 16  ;;  %v503_v33 = vshll.u32 %v497_v24, 16 }
  0x47   : > { %873 = vmatpush.bf16.msra.mxu3 %v1963_v43  ;;  %v1973_v43 = vld [vmem:[%s2586_s3 + $0x118] sm:$0xff]  ;;  %v1059_v48 = vrot.slane %v1057_v39, 7 }
  0x48   : > { %614 = vmatpush.bf16.msra.mxu0 %v1946_v50  ;;  %v502_v37 = vrot.slane %v500_v32, 7 }
  0x49   : > { %763 = vmatpush.bf16.msra.mxu2 %v1954_v51  ;;  %v1997_v51 = vld [vmem:[%s2586_s3 + $0x1d8] sm:$0xff] }
  0x4a   : > { %682 = vmatpush.bf16.msra.mxu1 %v1938_v59  ;;  %v505_v42 = vor.u32 %v503_v33, %v502_v37  ;;  %v1971_v59 = vld [vmem:[%s2586_s3 + $0x108] sm:$0xff] }
  0x4b   : > { %874 = vmatpush.bf16.msra.mxu3 %v1962_v60  ;;  %615 = vmatmul.bf16.vlgmr.msra.gmra.mxu0 %v557_v23  ;;  %v1987_v60 = vld [vmem:[%s2586_s3 + $0x188] sm:$0xff] }
  0x4c   : > { %954 = vmatpush.bf16.msrb.mxu0 %v1977_v55  ;;  %764 = vmatmul.bf16.vlgmr.msra.gmra.mxu2 %v706_v25  ;;  %v518_v46 = vsel %vm2385_vm2, 0, %v505_v42  ;;  %v1988_v55 = vld [vmem:[%s2586_s3 + $0x190] sm:$0xff] }
  0x4d   : > { %1134 = vmatpush.bf16.msrb.mxu2 %v1993_v56  ;;  %v623_v50 = vunpack.c.l.b16 %v518_v46  ;;  %v1062_v56 = vor.u32 %v1060_v49, %v1059_v48 }
  0x4e   : > { %1037 = vmatpush.bf16.msrb.mxu1 %v1985_v2  ;;  %875 = vmatmul.bf16.vlgmr.msra.gmra.mxu3 %v817_v15  ;;  %v1706_v2 = vld [vmem:[%s2326_s16] sm:$0xf]  ;;  %v2007_v15 = vld [vmem:[%s2586_s3 + $0x228] sm:$0xff] }
  0x4f   : > { %1219 = vmatpush.bf16.msrb.mxu3 %v2001_v3  ;;  %v625_v53 = vpack.c.b16 %v624_v45, %v623_v50  ;;  %v1064_v62 = vsel %vm2385_vm2, 0, %v1062_v56  ;;  %v1937_v3 = vld [vmem:[%s2326_s16 + $0x4] sm:$0xf0]  ;;  %s1508_s16 = sshll.u32 %s2607_s21, 3 }
  0x50   : > { %955 = vmatpush.bf16.msrb.mxu0 %v1976_v7  ;;  %v1083_v4 = vunpack.c.l.b16 %v1064_v62  ;;  %v1994_v7 = vld [vmem:[%s2586_s3 + $0x1c0] sm:$0xff]  ;;  %v1707_v11 = vor.u32 %v1937_v3, %v1706_v2  ;;  %s454_s11 = sadd.s32 %s1508_s16, %s2613_s29 }
  0x51   : > { %1135 = vmatpush.bf16.msrb.mxu2 %v1992_v8  ;;  %683 = vmatmul.bf16.vlgmr.msra.gmra.mxu1 %v625_v53  ;;  %v1978_v8 = vld [vmem:[%s2586_s3 + $0x140] sm:$0xff]  ;;  %s1509_s12 = sshll.u32 %s454_s11, 2 }
  0x52   : > { %1038 = vmatpush.bf16.msrb.mxu1 %v1984_v16  ;;  %v1084_v12 = vpack.c.b16 %v1083_v4, %v624_v45  ;;  %v2002_v16 = vld [vmem:[%s2586_s3 + $0x200] sm:$0xff]  ;;  %s456_s27 = scalar_lea.vmem %s2588_s5, %s1509_s12 }
  0x53   : > { %1220 = vmatpush.bf16.msrb.mxu3 %v2000_v17  ;;  %v1252_v17 = vpack.c.b16 %v2429_v10, %v2363_v35 }
  0x54   : > { %956 = vmatpush.bf16.msrb.mxu0 %v1975_v20 }
  0x55   : > { %1136 = vmatpush.bf16.msrb.mxu2 %v1991_v21 }
  0x56   : > { %1039 = vmatpush.bf16.msrb.mxu1 %v1983_v30 }
  0x57   : > { %1221 = vmatpush.bf16.msrb.mxu3 %v1999_v31 }
  0x58   : > { %957 = vmatpush.bf16.msrb.mxu0 %v1974_v34 }
  0x59   : > { %1137 = vmatpush.bf16.msrb.mxu2 %v1990_v36 }
  0x5a   : > { %1040 = vmatpush.bf16.msrb.mxu1 %v1982_v40 }
  0x5b   : > { %1222 = vmatpush.bf16.msrb.mxu3 %v1998_v41 }
  0x5c   : > { %958 = vmatpush.bf16.msrb.mxu0 %v1973_v43 }
  0x5d   : > { %1138 = vmatpush.bf16.msrb.mxu2 %v1989_v44 }
  0x5e   : > { %1041 = vmatpush.bf16.msrb.mxu1 %v1981_v52 }
  0x5f   : > { %1223 = vmatpush.bf16.msrb.mxu3 %v1997_v51  ;;  %v2085_v51 = vld [vmem:[%s2587_s4] ss:$0 sm:$0xff] }
  0x60   : > { %959 = vmatpush.bf16.msrb.mxu0 %v1972_v54 }
  0x61   : > { %1139 = vmatpush.bf16.msrb.mxu2 %v1988_v55 }
  0x62   : > { %1042 = vmatpush.bf16.msrb.mxu1 %v1980_v58 }
  0x63   : > { %1224 = vmatpush.bf16.msrb.mxu3 %v1996_v57 }
  0x64   : > { %960 = vmatpush.bf16.msrb.mxu0 %v1971_v59 }
  0x65   : > { %1140 = vmatpush.bf16.msrb.mxu2 %v1987_v60 }
  0x66   : > { %1043 = vmatpush.bf16.msrb.mxu1 %v1979_v0 }
  0x67   : > { %1225 = vmatpush.bf16.msrb.mxu3 %v1995_v63 }
  0x68   : > { %961 = vmatpush.bf16.msrb.mxu0 %v1970_v1 }
  0x69   : > { %1141 = vmatpush.bf16.msrb.mxu2 %v1986_v47 }
  0x6a   : > { %1044 = vmatpush.bf16.msrb.mxu1 %v1978_v8 }
  0x6b   : > { %1226 = vmatpush.bf16.msrb.mxu3 %v1994_v7  ;;  %962 = vmatmul.bf16.vlgmr.msrb.gmra.mxu0 %v1707_v11 }
  0x6c   : > { %1302 = vmatpush.bf16.msra.mxu0 %v2009_v5  ;;  %1142 = vmatmul.bf16.vlgmr.msrb.gmra.mxu2 %v1084_v12 }
  0x6d   : > { %1045 = vmatmul.bf16.vlgmr.msrb.gmra.mxu1 %v987_v14 }
  0x6e   : > { %1227 = vmatmul.bf16.vlgmr.msrb.gmra.mxu3 %v1169_v13 }
  0x70   : > { %1303 = vmatpush.bf16.msra.mxu0 %v2008_v61 }
  0x74   : > { %1304 = vmatpush.bf16.msra.mxu0 %v2007_v15 }
  0x78   : > { %1305 = vmatpush.bf16.msra.mxu0 %v2006_v26 }
  0x7c   : > { %1306 = vmatpush.bf16.msra.mxu0 %v2005_v27 }
  0x80   : > { %1307 = vmatpush.bf16.msra.mxu0 %v2004_v28 }
  0x84   : > { %1308 = vmatpush.bf16.msra.mxu0 %v2003_v9 }
  0x88   : > { %1309 = vmatpush.bf16.msra.mxu0 %v2002_v16 }
  0x8b   : > { %1310 = vmatmul.bf16.vlgmr.msra.gmra.mxu0 %v1252_v17 }
  0xc8   : > { %v616_v18 = vpop.f32.mrf.mxu0 }
  0xce   : > { %v684_v19 = vpop.f32.mrf.mxu1 }
  0xcf   : > { %v765_v20 = vpop.f32.mrf.mxu2  ;;  %v685_v23 = vadd.f32 %v684_v19, %v616_v18 }
  0xd0   : > { %v618_v21 = vpop.f32.mrf.mxu0 }
  0xd1   : > { %v876_v22 = vpop.f32.mrf.mxu3  ;;  %v770_v29 = vadd.f32 %v765_v20, %v685_v23 }
  0xd3   : > { %v881_v32 = vadd.f32 %v876_v22, %v770_v29 }
  0xd6   : > { %v686_v24 = vpop.f32.mrf.mxu1 }
  0xd7   : > { %v767_v25 = vpop.f32.mrf.mxu2  ;;  %v687_v33 = vadd.f32 %v686_v24, %v618_v21 }
  0xd9   : > { %v878_v31 = vpop.f32.mrf.mxu3  ;;  %v771_v35 = vadd.f32 %v767_v25, %v687_v33 }
  0xdb   : > { %v882_v40 = vadd.f32 %v878_v31, %v771_v35 }
  0xe8   : > { %v963_v30 = vpop.f32.mrf.mxu0 }
  0xe9   : > { %v968_v36 = vadd.f32 %v963_v30, %v881_v32 }
  0xea   : > { %v1046_v34 = vpop.f32.mrf.mxu1 }
  0xeb   : > { %v1051_v38 = vadd.f32 %v1046_v34, %v968_v36 }
  0xef   : > { %v1143_v37 = vpop.f32.mrf.mxu2 }
  0xf0   : > { %v965_v10 = vpop.f32.mrf.mxu0  ;;  %v1148_v41 = vadd.f32 %v1143_v37, %v1051_v38 }
  0xf1   : > { %v1228_v39 = vpop.f32.mrf.mxu3  ;;  %v969_v42 = vadd.f32 %v965_v10, %v882_v40 }
  0xf2   : > { %v1048_v43 = vpop.f32.mrf.mxu1  ;;  %v1233_v46 = vadd.f32 %v1228_v39, %v1148_v41 }
  0xf3   : > { %v1052_v48 = vadd.f32 %v1048_v43, %v969_v42 }
  0xf7   : > { %v1145_v44 = vpop.f32.mrf.mxu2 }
  0xf8   : > { %v1149_v49 = vadd.f32 %v1145_v44, %v1052_v48 }
  0xf9   : > { %v1230_v52 = vpop.f32.mrf.mxu3 }
  0xfa   : > { %v1234_v53 = vadd.f32 %v1230_v52, %v1149_v49 }
 0x108   : > { %v1311_v45 = vpop.f32.mrf.mxu0 }
 0x109   : > { %v1316_v50 = vadd.f32 %v1311_v45, %v1233_v46 }
 0x10b   : > { %v1322_v54 = vadd.f32 %v2085_v51, %v1316_v50 }
 0x10d   : > { %v1326_v57 = vmul.f32 0.01, %v1322_v54  ;;  %vm1324_vm3 = vcmp.ge.f32.partialorder %v1322_v54, 0.0 }
 0x10f   : > { %v1328_v60 = vsel %vm1324_vm3, %v1322_v54, %v1326_v57 }
 0x110   : > { %v1313_v55 = vpop.f32.mrf.mxu0 }
 0x111   : > { %v1317_v56 = vadd.f32 %v1313_v55, %v1234_v53 }
 0x113   : > { %v1323_v58 = vadd.f32 %v2085_v51, %v1317_v56 }
 0x115   : > { %vm1325_vm4 = vcmp.ge.f32.partialorder %v1323_v58, 0.0  ;;  %v1327_v59 = vmul.f32 0.01, %v1323_v58 }
 0x117   : > { %v1329_v62 = vsel %vm1325_vm4, %v1323_v58, %v1327_v59 }
 0x118   : > { %v2025_v63 = vpack.c.bf16 %v1329_v62, %v1328_v60 }
 0x11a   : > { %2026 = vst [vmem:[%s456_s27] sm:$0xff] %v2025_v63  }
 0x11b PF: > { %s15_s24 = sadd.s32 1, %s2140_s24   ;;  %s2592_s18 = smov %s2120_s19 }
 0x11c   : > { %p12_p2 = scmp.ge.s32.totalorder %s15_s24, 10   ;;  %s2593_s19 = smov %s2227_s7 }
 0x11d   : > { %s2594_s20 = smov %s2132_s22  ;;  %s2595_s21 = smov %s2136_s23 }
 0x11e   : > { %s2596_s22 = smov %s2599_s25  ;;  %s2597_s23 = smov %s2603_s26 }
 0x11f   :  { %14 = sbr.rel (!%p12_p2) target bundleno = 4 (0x4), region = 176 }

// kernel: hyper_encoder.5
= control target key start
LH: loop header
LB: loop body
LE: loop exit
PB: predicated region body
PF: predicated region fallthrough
CT: control target
= control target key end

     0   :  { %s2157_s18 = smov 0   ;;  %s2159_s19 = smov 0   ;;  %s2549_s0 = inlined_call_operand.vmem [shape: bf16[2,4,2,2,4,128], index: 0, kind: input, shape index: {}, may-alias: {0,1,2}]   ;;  %s2550_s1 = inlined_call_operand.vmem [shape: bf16[2,4,2,2,4,128], index: 1, kind: input, shape index: {}, may-alias: {0,1,2}]   ;;  %s2551_s2 = inlined_call_operand.vmem [shape: bf16[2,4,2,2,4,128], index: 2, kind: input, shape index: {}, may-alias: {0,1,2}]   ;;  %s2552_s3 = inlined_call_operand.vmem [shape: bf16[3,3,128,128], index: 3, kind: input, shape index: {}]   ;;  %s2553_s4 = inlined_call_operand.vmem [shape: f32[1,128], index: 4, kind: input, shape index: {}]   ;;  %s2554_s5 = inlined_call_operand.vmem [shape: bf16[2,4,4,128], index: 5, kind: output, shape index: {}]  }
   0x1   :  { %s2161_s20 = smov 0   ;;  %s2163_s21 = smov 0  }
   0x2   :  { %s2165_s22 = smov 0   ;;  %s2167_s23 = smov 0  }
   0x3   :  { %s2169_s24 = smov 0  }
   0x4 LB: > { %s24_s25 = sadd.s32 1, %s2117_s22  ;;  %s27_s26 = sadd.s32 1, %s2121_s23  ;;  %s2125_s24 = sphi %s2169_s24, %s15_s24   ;;  %s2121_s23 = sphi %s2167_s23, %s2563_s23   ;;  %s2117_s22 = sphi %s2165_s22, %s2562_s22   ;;  %s2113_s21 = sphi %s2163_s21, %s2561_s21   ;;  %s2109_s20 = sphi %s2161_s20, %s2560_s20   ;;  %s2105_s19 = sphi %s2159_s19, %s2559_s19   ;;  %s2101_s18 = sphi %s2157_s18, %s2558_s18  }
   0x5   : > { %p25_p0 = scmp.ge.s32.totalorder %s24_s25, 2  ;;  %p43_p1 = scmp.ne.s32.totalorder %s2105_s19, %s2101_s18 }
   0x6   : > { %p44_p2 = scmp.eq.s32.totalorder %s2125_s24, 0  ;;  %s36_s6 = sadd.s32 1, %s2105_s19 }
   0x7   : > { %s2565_s25 = smov (%p25_p0, %s24_s25), 0  ;;  %s2567_s26 = smov (!%p25_p0, %s27_s26), %s2121_s23 }
   0x8   : > { %p2200_p3 = por %p44_p2, %p43_p1  ;;  %p29_p4 = scmp.ge.s32.totalorder %s2567_s26, 2 }
   0x9   : > { %s32_s28 = ssub.s32 %s2117_s22, %s2565_s25  ;;  %p1489_p6 = scmp.ge.s32.totalorder %s2125_s24, 4 }
   0xa   : > { %s2569_s26 = smov (%p29_p4, %s2567_s26), 0 }
   0xb   : > { %s31_s29 = ssub.s32 %s2121_s23, %s2569_s26  ;;  %209 = sbr.rel (%p1489_p6) target bundleno = 34 (0x22), region = 24 }
   0xc   : > { %s33_s30 = sor.u32 %s32_s28, %s31_s29 }
   0xd   : > { %p34_p5 = scmp.eq.s32.totalorder %s33_s30, 0 }
   0xf   : > { %s2212_s7 = scalar_select %p34_p5, %s2105_s19, %s36_s6  }
  0x10   : > { %212 = sbr.rel (!%p2200_p3) target bundleno = 25 (0x19), region = 28  ;;  %s214_s8 = sand.u32 (%p2200_p3), 1, %s2105_s19  }
  0x11   : > { %s1939_s9 = sshll.u32 (%p2200_p3), %s2117_s22, 3  ;;  %s1490_s10 = sshll.u32 (%p2200_p3), %s214_s8, 3 }
  0x12   : > { %s1493_s11 = sshll.u32 (%p2200_p3), %s2121_s23, 4  ;;  %s216_s17 = scalar_lea.vmem (%p2200_p3), [#allocation2], %s1490_s10 }
  0x13   : > { %s220_s12 = sadd.s32 (%p2200_p3), %s1939_s9, %s1493_s11 }
  0x14   : > { %s1494_s13 = sshll.u32 (%p2200_p3), %s220_s12, 1 }
  0x15   : > { %s222_s16 = scalar_lea.vmem %s2549_s0, %s1494_s13 }
  0x16   : > { %v239_v0 = vld [vmem:[%s222_s16] sm:$0xf]   ;;  %v243_v1 = vld [vmem:[%s222_s16 + $0x8] sm:$0xf]  }
  0x17   : > { %240 = vst [vmem:[%s216_s17] sm:$0xf] %v239_v0  }
  0x18   : > { %244 = vst [vmem:[%s216_s17 + $0x4] sm:$0xf] %v243_v1  }
  0x19 PF: > { %278 = sbr.rel (!%p2200_p3) target bundleno = 34 (0x22), region = 69  ;;  %s280_s28 = sand.u32 (%p2200_p3), 1, %s2105_s19  }
  0x1a   : > { %s1496_s29 = sshll.u32 (%p2200_p3), %s2117_s22, 3  ;;  %s1495_s30 = sshll.u32 (%p2200_p3), %s280_s28, 3 }
  0x1b   : > { %s1497_s6 = sshll.u32 (%p2200_p3), %s2121_s23, 4  ;;  %s282_s10 = scalar_lea.vmem (%p2200_p3), [#allocation3], %s1495_s30 }
  0x1c   : > { %s1384_s8 = sadd.s32 (%p2200_p3), %s1497_s6, %s1496_s29 }
  0x1d   : > { %s1498_s9 = sshll.u32 (%p2200_p3), %s1384_s8, 1 }
  0x1e   : > { %s1386_s13 = scalar_lea.vmem %s2550_s1, %s1498_s9 }
  0x1f   : > { %v1499_v2 = vld [vmem:[%s1386_s13 + $0x4] sm:$0xf]   ;;  %v1501_v3 = vld [vmem:[%s1386_s13 + $0xc] sm:$0xf]  }
  0x20   : > { %307 = vst [vmem:[%s282_s10] sm:$0xf] %v1499_v2  }
  0x21   : > { %311 = vst [vmem:[%s282_s10 + $0x4] sm:$0xf] %v1501_v3  }
  0x22 PF: > { %p1503_p7 = scmp.ge.s32.totalorder %s2125_s24, 1  ;;  %p365_p8 = scmp.lt.s32.totalorder %s2125_s24, 5 }
  0x24   : > { %p366_p9 = pnand %p1503_p7, %p365_p8 }
  0x25   : > { %s2240_s17 = sshll.u32 (!%p366_p9), %s2109_s20, 1  ;;  %s372_s12 = sand.u32 (!%p366_p9), 1, %s2101_s18  }
  0x26   : > { %369 = sbr.rel (%p366_p9) target bundleno = 311 (0x137), region = 114  ;;  %s1507_s28 = sadd.s32 (!%p366_p9), 4294967295, %s2240_s17 }
  0x27   : > { %p432_p10 = scmp.gt.s32.totalorder (!%p366_p9), %s1507_s28, 0  ;;  %p434_p11 = scmp.lt.s32.totalorder (!%p366_p9), %s2113_s21, 1 }
  0x28   : > { %p1508_p12 = scmp.lt.s32.totalorder (!%p366_p9), %s1507_s28, 3  ;;  %s2275_s11 = sshll.u32 (!%p366_p9), %s372_s12, 3 }
  0x29   : > { %p467_p13 = scmp.gt.s32.totalorder (!%p366_p9), %s2109_s20, 0  ;;  %s2292_s8 = scalar_lea.vmem (!%p366_p9), [#allocation3], %s2275_s11 }
  0x2a   : > { %p451_p1 = scmp.lt.s32.totalorder (!%p366_p9), %s2240_s17, 3 }
  0x2b   : > { %v1957_v4 = vld [vmem:[%s2552_s3 + $0x78] sm:$0xff]  ;;  %v1956_v6 = vld [vmem:[%s2552_s3 + $0x70] sm:$0xff]  ;;  %s2571_s28 = smov (!%p432_p10, %s1507_s28), 0  ;;  %s2573_s21 = smov (!%p434_p11, %s2113_s21), 1  ;;  %v1955_v11 = vld [vmem:[%s2552_s3 + $0x68] sm:$0xff]  ;;  %vm515_vm0 = vcmask 1040384  }
  0x2c   : > { %v1949_v5 = vld [vmem:[%s2552_s3 + $0x38] sm:$0xff]  ;;  %608 = vmatpush.bf16.msra.mxu0 %v1957_v4  ;;  %v1948_v7 = vld [vmem:[%s2552_s3 + $0x30] sm:$0xff]  ;;  %v1947_v12 = vld [vmem:[%s2552_s3 + $0x28] sm:$0xff]  ;;  %s2575_s28 = smov (!%p1508_p12, %s2571_s28), 3  ;;  %s1514_s16 = sshll.u32 %s2573_s21, 4 }
  0x2d   : > { %676 = vmatpush.bf16.msra.mxu1 %v1949_v5  ;;  %v1965_v8 = vld [vmem:[%s2552_s3 + $0xb8] sm:$0xff]  ;;  %v1964_v9 = vld [vmem:[%s2552_s3 + $0xb0] sm:$0xff]  ;;  %v1963_v14 = vld [vmem:[%s2552_s3 + $0xa8] sm:$0xff]  ;;  %s1513_s15 = sshll.u32 %s2575_s28, 2  ;;  %vm516_vm1 = vsmask.f32 256 }
  0x2e   : > { %761 = vmatpush.bf16.msra.mxu2 %v1965_v8  ;;  %v1973_v10 = vld [vmem:[%s2552_s3 + $0xf8] sm:$0xff]  ;;  %v1972_v13 = vld [vmem:[%s2552_s3 + $0xf0] sm:$0xff]  ;;  %v1954_v15 = vld [vmem:[%s2552_s3 + $0x60] sm:$0xff]  ;;  %s468_s30 = scalar_select %p467_p13, 1, 0 }
  0x2f   : > { %870 = vmatpush.bf16.msra.mxu3 %v1973_v10  ;;  %v1946_v16 = vld [vmem:[%s2552_s3 + $0x20] sm:$0xff]  ;;  %v1971_v17 = vld [vmem:[%s2552_s3 + $0xe8] sm:$0xff]  ;;  %s1414_s6 = sadd.s32 %s1514_s16, %s1513_s15  ;;  %v1953_v20 = vld [vmem:[%s2552_s3 + $0x58] sm:$0xff]  ;;  %s2579_s17 = smov (!%p451_p1, %s2240_s17), 3 }
  0x30   : > { %609 = vmatpush.bf16.msra.mxu0 %v1956_v6  ;;  %v1962_v18 = vld [vmem:[%s2552_s3 + $0xa0] sm:$0xff]  ;;  %v1945_v21 = vld [vmem:[%s2552_s3 + $0x18] sm:$0xff]  ;;  %s469_s27 = scvt.s32.f32 %s468_s30  ;;  %s1515_s29 = sshll.u32 %s1414_s6, 1  ;;  %v1952_v25 = vld [vmem:[%s2552_s3 + $0x50] sm:$0xff] }
  0x31   : > { %677 = vmatpush.bf16.msra.mxu1 %v1948_v7  ;;  %v2295_v19 = vld [vmem:[%s2292_s8] sm:$0x3]  ;;  %v2308_v23 = vld [vmem:[%s2292_s8 + $0x2] sm:$0x3]  ;;  %v1944_v26 = vld [vmem:[%s2552_s3 + $0x10] sm:$0xff]  ;;  %s1416_s18 = scalar_lea.vmem %s2551_s2, %s1515_s29 }
  0x32   : > { %762 = vmatpush.bf16.msra.mxu2 %v1964_v9  ;;  %557 = vst [vmem:[#allocation1 + $0x1] ss:$4 sm:$0xff] %v2295_v19  ;;  %v1970_v22 = vld [vmem:[%s2552_s3 + $0xe0] sm:$0xff]  ;;  %v1961_v24 = vld [vmem:[%s2552_s3 + $0x98] sm:$0xff]  ;;  %s472_s12 = sshrl.u32 %s469_s27, 16  ;;  %p471_p0 = scmp.ne.f32.partialorder %s469_s27, %s469_s27  ;;  %v496_v27 = vunpack.c.l.b16 %v2308_v23  ;;  %v1960_v29 = vld [vmem:[%s2552_s3 + $0x90] sm:$0xff] }
  0x33   : > { %871 = vmatpush.bf16.msra.mxu3 %v1972_v13  ;;  %s473_s20 = sand.u32 1, %s472_s12  ;;  %v1969_v28 = vld [vmem:[%s2552_s3 + $0xd8] sm:$0xff]  ;;  %v1951_v30 = vld [vmem:[%s2552_s3 + $0x48] sm:$0xff]  ;;  %v1519_v32 = vld [vmem:[%s1416_s18 + $0x4] sm:$0x3] }
  0x34   : > { %610 = vmatpush.bf16.msra.mxu0 %v1955_v11  ;;  %s474_s10 = sadd.s32 32767, %s473_s20  ;;  %v1943_v31 = vld [vmem:[%s2552_s3 + $0x8] sm:$0xff]  ;;  %v1520_v33 = vld [vmem:[%s1416_s18 + $0x6] sm:$0x3]  ;;  %v498_v34 = vpack.c.b16 %v496_v27, %v496_v27  ;;  %v1968_v35 = vld [vmem:[%s2552_s3 + $0xd0] sm:$0xff]  ;;  %v486_v37 = vunpack.c.l.bf16 %v1519_v32 }
  0x35   : > { %678 = vmatpush.bf16.msra.mxu1 %v1947_v12  ;;  %s475_s12 = sadd.s32 %s474_s10, %s469_s27  ;;  %v1959_v36 = vld [vmem:[%s2552_s3 + $0x88] sm:$0xff]  ;;  %v487_v38 = vunpack.c.l.bf16 %v1520_v33  ;;  %v1950_v39 = vld [vmem:[%s2552_s3 + $0x40] sm:$0xff]  ;;  %v1981_v43 = vld [vmem:[%s2552_s3 + $0x138] sm:$0xff] }
  0x36   : > { %763 = vmatpush.bf16.msra.mxu2 %v1963_v14  ;;  %s476_s9 = sand.u32 4294901760, %s475_s12  ;;  %v1942_v40 = vld [vmem:[%s2552_s3] sm:$0xff]  ;;  %v507_v42 = vshrl.u32 %v498_v34, 16  ;;  %v1989_v44 = vld [vmem:[%s2552_s3 + $0x178] sm:$0xff]  ;;  %v1967_v47 = vld [vmem:[%s2552_s3 + $0xc8] sm:$0xff]  ;;  %v510_v53 = vshll.u32 %v498_v34, 16 }
  0x37   : > { %872 = vmatpush.bf16.msra.mxu3 %v1971_v17  ;;  %s2577_s9 = smov (%p471_p0, %s476_s9), 2143289344  ;;  %v1958_v46 = vld [vmem:[%s2552_s3 + $0x80] sm:$0xff]  ;;  %v1997_v49 = vld [vmem:[%s2552_s3 + $0x1b8] sm:$0xff]  ;;  %v1980_v54 = vld [vmem:[%s2552_s3 + $0x130] sm:$0xff] }
  0x38   : > { %611 = vmatpush.bf16.msra.mxu0 %v1954_v15  ;;  %s479_s6 = sshrl.u32 %s2577_s9, 16  ;;  %v509_v52 = vrot.slane %v507_v42, 7  ;;  %v1988_v55 = vld [vmem:[%s2552_s3 + $0x170] sm:$0xff]  ;;  %v1966_v58 = vld [vmem:[%s2552_s3 + $0xc0] sm:$0xff]  ;;  %v2005_v61 = vld [vmem:[%s2552_s3 + $0x1f8] sm:$0xff] }
  0x39   : > { %679 = vmatpush.bf16.msra.mxu1 %v1946_v16  ;;  %s482_s27 = sshll.u32 %s479_s6, 16  ;;  %v1996_v59 = vld [vmem:[%s2552_s3 + $0x1b0] sm:$0xff]  ;;  %v2386_v63 = vld [vmem:[%s2292_s8 + $0x6] sm:$0x3]  ;;  %v1979_v0 = vld [vmem:[%s2552_s3 + $0x128] sm:$0xff] }
  0x3a   : > { %764 = vmatpush.bf16.msra.mxu2 %v1962_v18  ;;  %s483_s30 = sor.u32 %s482_s27, %s479_s6  ;;  %s2361_s27 = scalar_lea.vmem [#allocation2], %s2275_s11  ;;  %v512_v62 = vor.u32 %v510_v53, %v509_v52  ;;  %v1987_v1 = vld [vmem:[%s2552_s3 + $0x168] sm:$0xff]  ;;  %vm2395_vm2 = vmand %vm515_vm0, %vm516_vm1  ;;  %v2004_v9 = vld [vmem:[%s2552_s3 + $0x1f0] sm:$0xff] }
  0x3b   : > { %873 = vmatpush.bf16.msra.mxu3 %v1970_v22  ;;  %v484_v41 = vstv %s483_s30  ;;  %v2364_v48 = vld [vmem:[%s2361_s27 + $0x6] sm:$0x3]  ;;  %v1978_v10 = vld [vmem:[%s2552_s3 + $0x120] sm:$0xff]  ;;  %v1977_v16 = vld [vmem:[%s2552_s3 + $0x118] sm:$0xff] }
  0x3c   : > { %612 = vmatpush.bf16.msra.mxu0 %v1953_v20  ;;  %v488_v45 = vunpack.c.l.bf16 %v484_v41  ;;  %780 = vst [vmem:[#allocation1 + $0x20] ss:$4 sm:$0xff] %v2364_v48  ;;  %v1995_v7 = vld [vmem:[%s2552_s3 + $0x1a8] sm:$0xff]  ;;  %v519_v8 = vsel %vm2395_vm2, 0, %v512_v62  ;;  %v1986_v11 = vld [vmem:[%s2552_s3 + $0x160] sm:$0xff]  ;;  %v1985_v18 = vld [vmem:[%s2552_s3 + $0x158] sm:$0xff] }
  0x3d   : > { %680 = vmatpush.bf16.msra.mxu1 %v1945_v21  ;;  %v1994_v15 = vld [vmem:[%s2552_s3 + $0x1a0] sm:$0xff]  ;;  %v1976_v20 = vld [vmem:[%s2552_s3 + $0x110] sm:$0xff]  ;;  %v2003_v27 = vld [vmem:[%s2552_s3 + $0x1e8] sm:$0xff] }
  0x3e   : > { %765 = vmatpush.bf16.msra.mxu2 %v1961_v24  ;;  %v489_v50 = vmul.f32 %v488_v45, %v486_v37  ;;  %v490_v51 = vmul.f32 %v488_v45, %v487_v38  ;;  %v1984_v21 = vld [vmem:[%s2552_s3 + $0x150] sm:$0xff]  ;;  %v1975_v24 = vld [vmem:[%s2552_s3 + $0x108] sm:$0xff]  ;;  %v2013_v32 = vld [vmem:[%s2552_s3 + $0x238] sm:$0xff] }
  0x3f   : > { %874 = vmatpush.bf16.msra.mxu3 %v1969_v28  ;;  %v2002_v33 = vld [vmem:[%s2552_s3 + $0x1e0] sm:$0xff]  ;;  %v460_v34 = vld [vmem:[%s2361_s27 + $0x2] sm:$0x3]  ;;  %v2001_v45 = vld [vmem:[%s2552_s3 + $0x1d8] sm:$0xff] }
  0x40   : > { %613 = vmatpush.bf16.msra.mxu0 %v1952_v25  ;;  %v491_v56 = vpack.c.bf16 %v489_v50, %v489_v50  ;;  %v492_v57 = vpack.c.bf16 %v490_v51, %v490_v51  ;;  %v1983_v25 = vld [vmem:[%s2552_s3 + $0x148] sm:$0xff]  ;;  %v2012_v38 = vld [vmem:[%s2552_s3 + $0x230] sm:$0xff]  ;;  %v2010_v52 = vld [vmem:[%s2552_s3 + $0x220] sm:$0xff] }
  0x41   : > { %681 = vmatpush.bf16.msra.mxu1 %v1944_v26  ;;  %v1993_v26 = vld [vmem:[%s2552_s3 + $0x198] sm:$0xff]  ;;  %v2000_v50 = vld [vmem:[%s2552_s3 + $0x1d0] sm:$0xff] }
  0x42   : > { %766 = vmatpush.bf16.msra.mxu2 %v1960_v29  ;;  %554 = vst [vmem:[#allocation1] ss:$4 sm:$0xff] %v491_v56  ;;  %v495_v60 = vunpack.c.l.b16 %v492_v57  ;;  %v1992_v29 = vld [vmem:[%s2552_s3 + $0x190] sm:$0xff] }
  0x43   : > { %875 = vmatpush.bf16.msra.mxu3 %v1968_v35  ;;  %v2399_v4 = vld.sshfl [vmem:[#allocation1 + $0x20] sm:$0xff pattern:$0x73625140]  ;;  %v2008_v62 = vld [vmem:[%s2552_s3 + $0x210] sm:$0xff] }
  0x44   : > { %614 = vmatpush.bf16.msra.mxu0 %v1951_v30  ;;  %v497_v2 = vpack.c.b16 %v495_v60, %v495_v60  ;;  %1058 = vst [vmem:[#allocation1 + $0x20] ss:$4 sm:$0xff] %v2386_v63  ;;  %v788_v28 = vshrl.u32 %v2399_v4, 16  ;;  %v1974_v30 = vld [vmem:[%s2552_s3 + $0x100] sm:$0xff]  ;;  %v2009_v60 = vld [vmem:[%s2552_s3 + $0x218] sm:$0xff] }
  0x45   : > { %682 = vmatpush.bf16.msra.mxu1 %v1943_v31  ;;  %v1982_v31 = vld [vmem:[%s2552_s3 + $0x140] sm:$0xff] }
  0x46   : > { %767 = vmatpush.bf16.msra.mxu2 %v1959_v36  ;;  %v500_v5 = vshrl.u32 %v497_v2, 16  ;;  %v503_v6 = vshll.u32 %v497_v2, 16  ;;  %v790_v35 = vrot.slane %v788_v28, 7  ;;  %v791_v36 = vshll.u32 %v2399_v4, 16 }
  0x47   : > { %876 = vmatpush.bf16.msra.mxu3 %v1967_v47 }
  0x48   : > { %615 = vmatpush.bf16.msra.mxu0 %v1950_v39  ;;  %v502_v12 = vrot.slane %v500_v5, 7  ;;  %v793_v39 = vor.u32 %v791_v36, %v790_v35 }
  0x49   : > { %683 = vmatpush.bf16.msra.mxu1 %v1942_v40  ;;  %v558_v13 = vld.sshfl [vmem:[#allocation1] sm:$0xff pattern:$0x73625140] }
  0x4a   : > { %768 = vmatpush.bf16.msra.mxu2 %v1958_v46  ;;  %v505_v14 = vor.u32 %v503_v6, %v502_v12  ;;  %625 = vst [vmem:[#allocation1 + $0x1] ss:$4 sm:$0xff] %v519_v8  ;;  %v797_v40 = vsel %vm2395_vm2, 0, %v793_v39  ;;  %v2011_v46 = vld [vmem:[%s2552_s3 + $0x228] sm:$0xff]  ;;  %v2006_v6 = vld [vmem:[%s2552_s3 + $0x200] sm:$0xff] }
  0x4b   : > { %877 = vmatpush.bf16.msra.mxu3 %v1966_v58  ;;  %616 = vmatmul.bf16.vlgmr.msra.gmra.mxu0 %v558_v13 }
  0x4c   : > { %956 = vmatpush.bf16.msrb.mxu0 %v1981_v43  ;;  %v518_v17 = vsel %vm2395_vm2, 0, %v505_v14  ;;  %v465_v14 = vld [vmem:[%s2292_s8 + $0x4] sm:$0x3]  ;;  %s1517_s8 = sshll.u32 %s2573_s21, 2 }
  0x4d   : > { %1040 = vmatpush.bf16.msrb.mxu1 %v1989_v44  ;;  %622 = vst [vmem:[#allocation1] ss:$4 sm:$0xff] %v518_v17  ;;  %v1991_v44 = vld [vmem:[%s2552_s3 + $0x188] sm:$0xff]  ;;  %s454_s14 = sadd.s32 %s1517_s8, %s2579_s17 }
  0x4e   : > { %1148 = vmatpush.bf16.msrb.mxu2 %v1997_v49  ;;  %v1990_v49 = vld [vmem:[%s2552_s3 + $0x180] sm:$0xff]  ;;  %s1518_s10 = sshll.u32 %s454_s14, 1 }
  0x4f   : > { %1233 = vmatpush.bf16.msrb.mxu3 %v2005_v61  ;;  %v1998_v61 = vld [vmem:[%s2552_s3 + $0x1c0] sm:$0xff]  ;;  %s456_s12 = scalar_lea.vmem %s2554_s5, %s1518_s10 }
  0x50   : > { %957 = vmatpush.bf16.msrb.mxu0 %v1980_v54  ;;  %v459_v54 = vld [vmem:[%s2361_s27] sm:$0x3] }
  0x51   : > { %1041 = vmatpush.bf16.msrb.mxu1 %v1988_v55  ;;  %v461_v55 = vld [vmem:[%s2361_s27 + $0x4] sm:$0x3] }
  0x52   : > { %1149 = vmatpush.bf16.msrb.mxu2 %v1996_v59  ;;  %v1999_v59 = vld [vmem:[%s2552_s3 + $0x1c8] sm:$0xff] }
  0x53   : > { %1234 = vmatpush.bf16.msrb.mxu3 %v2004_v9 }
  0x54   : > { %958 = vmatpush.bf16.msrb.mxu0 %v1979_v0  ;;  %v626_v22 = vld.sshfl [vmem:[#allocation1] sm:$0xff pattern:$0x73625140] }
  0x55   : > { %1042 = vmatpush.bf16.msrb.mxu1 %v1987_v1  ;;  %707 = vst [vmem:[#allocation1] ss:$4 sm:$0xff] %v492_v57  ;;  %v1059_v57 = vld.sshfl [vmem:[#allocation1 + $0x20] sm:$0xff pattern:$0x73625140] }
  0x56   : > { %1150 = vmatpush.bf16.msrb.mxu2 %v1995_v7  ;;  %684 = vmatmul.bf16.vlgmr.msra.gmra.mxu1 %v626_v22  ;;  %710 = vst [vmem:[#allocation1 + $0x1] ss:$4 sm:$0xff] %v2308_v23  ;;  %v1066_v0 = vshrl.u32 %v1059_v57, 16  ;;  %v1069_v2 = vshll.u32 %v1059_v57, 16 }
  0x57   : > { %1235 = vmatpush.bf16.msrb.mxu3 %v2003_v27 }
  0x58   : > { %959 = vmatpush.bf16.msrb.mxu0 %v1978_v10  ;;  %v1068_v1 = vrot.slane %v1066_v0, 7 }
  0x59   : > { %1043 = vmatpush.bf16.msrb.mxu1 %v1986_v11 }
  0x5a   : > { %1151 = vmatpush.bf16.msrb.mxu2 %v1994_v15  ;;  %v1071_v5 = vor.u32 %v1069_v2, %v1068_v1 }
  0x5b   : > { %1236 = vmatpush.bf16.msrb.mxu3 %v2002_v33 }
  0x5c   : > { %960 = vmatpush.bf16.msrb.mxu0 %v1977_v16  ;;  %v1075_v7 = vsel %vm2395_vm2, 0, %v1071_v5 }
  0x5d   : > { %1044 = vmatpush.bf16.msrb.mxu1 %v1985_v18  ;;  %v711_v37 = vld.sshfl [vmem:[#allocation1] sm:$0xff pattern:$0x73625140] }
  0x5e   : > { %1152 = vmatpush.bf16.msrb.mxu2 %v1993_v26  ;;  %776 = vst [vmem:[#allocation1] ss:$4 sm:$0xff] %v460_v34 }
  0x5f   : > { %769 = vmatmul.bf16.vlgmr.msra.gmra.mxu2 %v711_v37  ;;  %1237 = vmatpush.bf16.msrb.mxu3 %v2001_v45 }
  0x60   : > { %961 = vmatpush.bf16.msrb.mxu0 %v1976_v20 }
  0x61   : > { %1045 = vmatpush.bf16.msrb.mxu1 %v1984_v21 }
  0x62   : > { %1153 = vmatpush.bf16.msrb.mxu2 %v1992_v29 }
  0x63   : > { %1238 = vmatpush.bf16.msrb.mxu3 %v2000_v50 }
  0x64   : > { %962 = vmatpush.bf16.msrb.mxu0 %v1975_v24 }
  0x65   : > { %1046 = vmatpush.bf16.msrb.mxu1 %v1983_v25  ;;  %v777_v41 = vld.sshfl [vmem:[#allocation1] sm:$0xff pattern:$0x73625140] }
  0x66   : > { %v782_v42 = vshrl.u32 %v777_v41, 16  ;;  %v785_v43 = vshll.u32 %v777_v41, 16  ;;  %819 = vst [vmem:[#allocation1 + $0x1] ss:$4 sm:$0xff] %v797_v40  ;;  %1154 = vmatpush.bf16.msrb.mxu2 %v1991_v44 }
  0x67   : > { %1239 = vmatpush.bf16.msrb.mxu3 %v1999_v59 }
  0x68   : > { %963 = vmatpush.bf16.msrb.mxu0 %v1974_v30  ;;  %v784_v47 = vrot.slane %v782_v42, 7 }
  0x69   : > { %1047 = vmatpush.bf16.msrb.mxu1 %v1982_v31 }
  0x6a   : > { %v787_v51 = vor.u32 %v785_v43, %v784_v47  ;;  %1155 = vmatpush.bf16.msrb.mxu2 %v1990_v49 }
  0x6b   : > { %1240 = vmatpush.bf16.msrb.mxu3 %v1998_v61 }
  0x6c   : > { %1317 = vmatpush.bf16.msra.mxu0 %v2013_v32  ;;  %v796_v53 = vsel %vm2395_vm2, 0, %v787_v51 }
  0x6d   : > { %816 = vst [vmem:[#allocation1] ss:$4 sm:$0xff] %v796_v53 }
  0x70   : > { %1318 = vmatpush.bf16.msra.mxu0 %v2012_v38  ;;  %v2070_v38 = vld [vmem:[%s2553_s4] ss:$0 sm:$0xff] }
  0x74   : > { %1319 = vmatpush.bf16.msra.mxu0 %v2011_v46  ;;  %v820_v56 = vld.sshfl [vmem:[#allocation1] sm:$0xff pattern:$0x73625140] }
  0x75   : > { %878 = vmatmul.bf16.vlgmr.msra.gmra.mxu3 %v820_v56  ;;  %902 = vst [vmem:[#allocation1] ss:$4 sm:$0xff] %v459_v54 }
  0x76   : > { %905 = vst [vmem:[#allocation1 + $0x1] ss:$4 sm:$0xff] %v461_v55 }
  0x78   : > { %1320 = vmatpush.bf16.msra.mxu0 %v2010_v52 }
  0x7c   : > { %1321 = vmatpush.bf16.msra.mxu0 %v2009_v60 }
  0x7d   : > { %v906_v58 = vld.sshfl [vmem:[#allocation1] sm:$0xff pattern:$0x73625140] }
  0x7e   : > { %964 = vmatmul.bf16.vlgmr.msrb.gmra.mxu0 %v906_v58  ;;  %987 = vst [vmem:[#allocation1] ss:$4 sm:$0xff] %v460_v34 }
  0x7f   : > { %989 = vst [vmem:[#allocation1 + $0x1] ss:$4 sm:$0xff] %v2364_v48  ;;  %v2007_v48 = vld [vmem:[%s2552_s3 + $0x208] sm:$0xff] }
  0x80   : > { %1322 = vmatpush.bf16.msra.mxu0 %v2008_v62 }
  0x84   : > { %1323 = vmatpush.bf16.msra.mxu0 %v2007_v48 }
  0x86   : > { %v990_v4 = vld.sshfl [vmem:[#allocation1] sm:$0xff pattern:$0x73625140] }
  0x87   : > { %1048 = vmatmul.bf16.vlgmr.msrb.gmra.mxu1 %v990_v4  ;;  %1054 = vst [vmem:[#allocation1] ss:$4 sm:$0xff] %v2308_v23 }
  0x88   : > { %1324 = vmatpush.bf16.msra.mxu0 %v2006_v6 }
  0x8e   : > { %v1055_v8 = vld.sshfl [vmem:[#allocation1] sm:$0xff pattern:$0x73625140] }
  0x8f   : > { %v1060_v9 = vshrl.u32 %v1055_v8, 16  ;;  %v1063_v10 = vshll.u32 %v1055_v8, 16  ;;  %1097 = vst [vmem:[#allocation1 + $0x1] ss:$4 sm:$0xff] %v1075_v7 }
  0x91   : > { %v1062_v11 = vrot.slane %v1060_v9, 7 }
  0x93   : > { %v1065_v12 = vor.u32 %v1063_v10, %v1062_v11 }
  0x95   : > { %v1074_v13 = vsel %vm2395_vm2, 0, %v1065_v12 }
  0x96   : > { %1094 = vst [vmem:[#allocation1] ss:$4 sm:$0xff] %v1074_v13 }
  0x9d   : > { %v1098_v15 = vld.sshfl [vmem:[#allocation1] sm:$0xff pattern:$0x73625140] }
  0x9e   : > { %1156 = vmatmul.bf16.vlgmr.msrb.gmra.mxu2 %v1098_v15  ;;  %1179 = vst [vmem:[#allocation1] ss:$4 sm:$0xff] %v2295_v19 }
  0x9f   : > { %1182 = vst [vmem:[#allocation1 + $0x1] ss:$4 sm:$0xff] %v465_v14 }
  0xa6   : > { %v1183_v16 = vld.sshfl [vmem:[#allocation1] sm:$0xff pattern:$0x73625140] }
  0xa7   : > { %1241 = vmatmul.bf16.vlgmr.msrb.gmra.mxu3 %v1183_v16  ;;  %1264 = vst [vmem:[#allocation1] ss:$4 sm:$0xff] %v2308_v23 }
  0xa8   : > { %1266 = vst [vmem:[#allocation1 + $0x1] ss:$4 sm:$0xff] %v2386_v63 }
  0xaf   : > { %v1267_v17 = vld.sshfl [vmem:[#allocation1] sm:$0xff pattern:$0x73625140] }
  0xb0   : > { %1325 = vmatmul.bf16.vlgmr.msra.gmra.mxu0 %v1267_v17 }
  0xc8   : > { %v617_v18 = vpop.f32.mrf.mxu0 }
  0xd0   : > { %v619_v20 = vpop.f32.mrf.mxu0 }
  0xd3   : > { %v685_v3 = vpop.f32.mrf.mxu1 }
  0xd4   : > { %v686_v21 = vadd.f32 %v685_v3, %v617_v18 }
  0xdb   : > { %v687_v22 = vpop.f32.mrf.mxu1 }
  0xe2   : > { %v770_v24 = vpop.f32.mrf.mxu2 }
  0xe3   : > { %v774_v25 = vadd.f32 %v770_v24, %v686_v21 }
  0xea   : > { %v772_v19 = vpop.f32.mrf.mxu2 }
  0xf8   : > { %v879_v26 = vpop.f32.mrf.mxu3 }
  0xf9   : > { %v883_v63 = vadd.f32 %v879_v26, %v774_v25 }
  0xfb   : > { %v965_v27 = vpop.f32.mrf.mxu0 }
  0xfc   : > { %v969_v32 = vadd.f32 %v965_v27, %v883_v63 }
 0x100   : > { %v881_v28 = vpop.f32.mrf.mxu3 }
 0x103   : > { %v967_v29 = vpop.f32.mrf.mxu0 }
 0x104   : > { %v1049_v23 = vpop.f32.mrf.mxu1 }
 0x105   : > { %v1053_v33 = vadd.f32 %v1049_v23, %v969_v32 }
 0x10c   : > { %v1051_v30 = vpop.f32.mrf.mxu1 }
 0x121   : > { %v1157_v31 = vpop.f32.mrf.mxu2 }
 0x122   : > { %v1161_v34 = vadd.f32 %v1157_v31, %v1053_v33 }
 0x129   : > { %v1159_v35 = vpop.f32.mrf.mxu2 }
 0x12a   : > { %v1242_v36 = vpop.f32.mrf.mxu3 }
 0x12b   : > { %v1246_v37 = vadd.f32 %v1242_v36, %v1161_v34 }
 0x12d   : > { %v1326_v39 = vpop.f32.mrf.mxu0 }
 0x12e   : > { %v1330_v40 = vadd.f32 %v1326_v39, %v1246_v37 }
 0x130   : > { %v1335_v41 = vadd.f32 %v2070_v38, %v1330_v40 }
 0x132   : > { %v1337_v42 = vrot.slane %v1335_v41, 4  ;;  %v1339_v43 = vpack.c.bf16 %v1335_v41, %v1335_v41  ;;  %v1244_v44 = vpop.f32.mrf.mxu3 }
 0x134   : > { %v1340_v45 = vpack.c.bf16 %v1337_v42, %v1337_v42  ;;  %1341 = vst [vmem:[%s456_s12] sm:$0x3] %v1339_v43 }
 0x135   : > { %v1328_v46 = vpop.f32.mrf.mxu0 }
 0x136   : > { %1342 = vst [vmem:[%s456_s12 + $0x2] sm:$0x3] %v1340_v45 }
 0x137 PF: > { %s15_s24 = sadd.s32 1, %s2125_s24   ;;  %s2558_s18 = smov %s2105_s19 }
 0x138   : > { %p12_p2 = scmp.ge.s32.totalorder %s15_s24, 6   ;;  %s2559_s19 = smov %s2212_s7 }
 0x139   : > { %s2560_s20 = smov %s2117_s22  ;;  %s2561_s21 = smov %s2121_s23 }
 0x13a   : > { %s2562_s22 = smov %s2565_s25  ;;  %s2563_s23 = smov %s2569_s26 }
 0x13b   :  { %14 = sbr.rel (!%p12_p2) target bundleno = 4 (0x4), region = 187 }

// kernel: hyper_encoder.3
= control target key start
LH: loop header
LB: loop body
LE: loop exit
PB: predicated region body
PF: predicated region fallthrough
CT: control target
= control target key end

     0   :  { %s3706_s24 = smov 0   ;;  %s3708_s25 = smov 0   ;;  %s5183_s0 = inlined_call_operand.vmem [shape: bf16[2,16,2,8,256], index: 0, kind: input, shape index: {}, may-alias: {0,1,2}]   ;;  %s5184_s1 = inlined_call_operand.vmem [shape: bf16[2,16,2,8,256], index: 1, kind: input, shape index: {}, may-alias: {0,1,2}]   ;;  %s5185_s2 = inlined_call_operand.vmem [shape: bf16[2,16,2,8,256], index: 2, kind: input, shape index: {}, may-alias: {0,1,2}]   ;;  %s5186_s3 = inlined_call_operand.vmem [shape: bf16[256,128], index: 3, kind: input, shape index: {}]   ;;  %s5187_s4 = inlined_call_operand.vmem [shape: f32[1,128], index: 4, kind: input, shape index: {}]   ;;  %s5188_s5 = inlined_call_operand.vmem [shape: bf16[256,256], index: 5, kind: input, shape index: {}]   ;;  %s5189_s6 = inlined_call_operand.vmem [shape: f32[1,256], index: 6, kind: input, shape index: {}]   ;;  %s5190_s7 = inlined_call_operand.vmem [shape: f32[3,3,256], index: 7, kind: input, shape index: {}]   ;;  %s5191_s8 = inlined_call_operand.vmem [shape: f32[1,256], index: 8, kind: input, shape index: {}]   ;;  %s5192_s9 = inlined_call_operand.vmem [shape: bf16[256,128], index: 9, kind: input, shape index: {}]   ;;  %s5193_s10 = inlined_call_operand.vmem [shape: f32[1,128], index: 10, kind: input, shape index: {}]   ;;  %s5194_s11 = inlined_call_operand.vmem [shape: bf16[128,256], index: 11, kind: input, shape index: {}]   ;;  %s5195_s12 = inlined_call_operand.vmem [shape: f32[1,256], index: 12, kind: input, shape index: {}]   ;;  %s5196_s13 = inlined_call_operand.vmem [shape: bf16[128,256], index: 13, kind: input, shape index: {}]   ;;  %s5197_s14 = inlined_call_operand.vmem [shape: f32[1,256], index: 14, kind: input, shape index: {}]   ;;  %s5198_s15 = inlined_call_operand.vmem [shape: bf16[256,128], index: 15, kind: input, shape index: {}]   ;;  %s5199_s16 = inlined_call_operand.vmem [shape: f32[1,128], index: 16, kind: input, shape index: {}]   ;;  %s5200_s17 = inlined_call_operand.vmem [shape: bf16[2,16,2,8,128], index: 17, kind: output, shape index: {}]  }
   0x1   :  { %5226 = sst [smem:[#allocation42_spill]] %s5183_s0  ;;  %s3710_s26 = smov 0  }
   0x2   :  { %5227 = sst [smem:[#allocation43_spill]] %s5184_s1  ;;  %s3712_s27 = smov 0  }
   0x3   :  { %5228 = sst [smem:[#allocation44_spill]] %s5195_s12  ;;  %s3714_s28 = smov 0  }
   0x4   :  { %5229 = sst [smem:[#allocation45_spill]] %s5199_s16 }
   0x5   :  { %5230 = sst [smem:[#allocation46_spill]] %s5200_s17 }
   0x6 LB: > { %5231 = sst [smem:[#allocation2_spill]] %s3606_s26  ;;  %s36_s29 = sadd.s32 1, %s3606_s26  ;;  %s3614_s28 = sphi %s3714_s28, %s27_s28   ;;  %s3610_s27 = sphi %s3712_s27, %s5316_s27   ;;  %s3606_s26 = sphi %s3710_s26, %s5315_s26   ;;  %s3602_s25 = sphi %s3708_s25, %s5314_s25   ;;  %s3598_s24 = sphi %s3706_s24, %s5313_s24  }
   0x7   : > { %5232 = sst [smem:[#allocation3_spill]] %s3610_s27  ;;  %s39_s0 = sadd.s32 1, %s3610_s27 }
   0x8   : > { %5233 = sst [smem:[#allocation4_spill]] %s3614_s28  ;;  %p37_p0 = scmp.ge.s32.totalorder %s36_s29, 4 }
   0x9   : > { %p2830_p1 = scmp.ge.s32.totalorder %s3614_s28, 1  ;;  %p573_p2 = scmp.lt.s32.totalorder %s3614_s28, 9 }
   0xa   : > { %s5318_s29 = smov (%p37_p0, %s36_s29), 0  ;;  %s5320_s0 = smov (!%p37_p0, %s39_s0), %s3610_s27 }
   0xb   : > { %5234 = sst [smem:[#allocation5_spill]] %s5318_s29  ;;  %p574_p3 = pnand %p2830_p1, %p573_p2 }
   0xc   : > { %p41_p4 = scmp.ge.s32.totalorder %s5320_s0, 2 }
   0xd   : > { %577 = sbr.rel (%p574_p3) target bundleno = 768 (0x300), region = 88 }
   0xe   : > { %s5322_s0 = smov (%p41_p4, %s5320_s0), 0 }
   0xf   : > { %5235 = sst [smem:[#allocation6_spill]] %s5322_s0 }
  0x12   : > { %v2962_v0 = vld [vmem:[%s5188_s5 + $0x70] sm:$0xf]  ;;  %v3397_v1 = vld [vmem:[%s5188_s5 + $0x74] sm:$0xf0]  ;;  %v2954_v5 = vld [vmem:[%s5188_s5 + $0x60] sm:$0xf] }
  0x13   : > { %v3026_v2 = vld [vmem:[%s5188_s5 + $0xf0] sm:$0xf]  ;;  %v2963_v3 = vor.u32 %v3397_v1, %v2962_v0  ;;  %v3413_v4 = vld [vmem:[%s5188_s5 + $0xf4] sm:$0xf0]  ;;  %v3395_v6 = vld [vmem:[%s5188_s5 + $0x64] sm:$0xf0] }
  0x14   : > { %v3027_v7 = vor.u32 %v3413_v4, %v3026_v2  ;;  %v3018_v8 = vld [vmem:[%s5188_s5 + $0xe0] sm:$0xf]  ;;  %v3411_v9 = vld [vmem:[%s5188_s5 + $0xe4] sm:$0xf0]  ;;  %v2955_v10 = vor.u32 %v3395_v6, %v2954_v5  ;;  %v2946_v12 = vld [vmem:[%s5188_s5 + $0x50] sm:$0xf] }
  0x15   : > { %987 = vmatpush.bf16.msra.mxu0 %v2963_v3  ;;  %3517 = vmatpush.bf16.msra.mxu2 %v2963_v3  ;;  %v3019_v11 = vor.u32 %v3411_v9, %v3018_v8  ;;  %v3393_v13 = vld [vmem:[%s5188_s5 + $0x54] sm:$0xf0]  ;;  %v3010_v14 = vld [vmem:[%s5188_s5 + $0xd0] sm:$0xf]  ;;  %v2938_v18 = vld [vmem:[%s5188_s5 + $0x40] sm:$0xf] }
  0x16   : > { %3525 = vmatpush.bf16.msra.mxu3 %v3027_v7  ;;  %1026 = vmatpush.bf16.msra.mxu1 %v3027_v7  ;;  %v3409_v15 = vld [vmem:[%s5188_s5 + $0xd4] sm:$0xf0]  ;;  %v2947_v16 = vor.u32 %v3393_v13, %v2946_v12  ;;  %v3391_v19 = vld [vmem:[%s5188_s5 + $0x44] sm:$0xf0]  ;;  %v3002_v20 = vld [vmem:[%s5188_s5 + $0xc0] sm:$0xf] }
  0x17   : > { %v3011_v17 = vor.u32 %v3409_v15, %v3010_v14  ;;  %v3407_v21 = vld [vmem:[%s5188_s5 + $0xc4] sm:$0xf0]  ;;  %s3789_s23 = sshll.u32 %s3598_s24, 2  ;;  %p662_p5 = scmp.lt.s32.totalorder %s3602_s25, 1  ;;  %v2939_v22 = vor.u32 %v3391_v19, %v2938_v18  ;;  %v2930_v24 = vld [vmem:[%s5188_s5 + $0x30] sm:$0xf] }
  0x18   : > { %p664_p6 = scmp.lt.s32.totalorder %s3789_s23, 15  ;;  %s3794_s30 = sadd.s32 4294967295, %s3789_s23  ;;  %v3003_v23 = vor.u32 %v3407_v21, %v3002_v20  ;;  %v3389_v25 = vld [vmem:[%s5188_s5 + $0x34] sm:$0xf0]  ;;  %v2994_v26 = vld [vmem:[%s5188_s5 + $0xb0] sm:$0xf] }
  0x19   : > { %988 = vmatpush.bf16.msra.mxu0 %v2955_v10  ;;  %3518 = vmatpush.bf16.msra.mxu2 %v2955_v10  ;;  %s5324_s25 = smov (!%p662_p5, %s3602_s25), 1  ;;  %v3405_v27 = vld [vmem:[%s5188_s5 + $0xb4] sm:$0xf0]  ;;  %v2931_v28 = vor.u32 %v3389_v25, %v2930_v24  ;;  %p674_p7 = scmp.gt.s32.totalorder %s3794_s30, 0  ;;  %v2922_v30 = vld [vmem:[%s5188_s5 + $0x20] sm:$0xf] }
  0x1a   : > { %3526 = vmatpush.bf16.msra.mxu3 %v3019_v11  ;;  %1027 = vmatpush.bf16.msra.mxu1 %v3019_v11  ;;  %5236 = sst [smem:[#allocation7_spill]] %s5324_s25  ;;  %s3815_s18 = sshll.u32 %s5324_s25, 6  ;;  %v2995_v29 = vor.u32 %v3405_v27, %v2994_v26  ;;  %v3387_v31 = vld [vmem:[%s5188_s5 + $0x24] sm:$0xf0]  ;;  %v2986_v32 = vld [vmem:[%s5188_s5 + $0xa0] sm:$0xf] }
  0x1b   : > { %s3812_s22 = scalar_select %p664_p6, %s3789_s23, 15  ;;  %v3403_v33 = vld [vmem:[%s5188_s5 + $0xa4] sm:$0xf0]  ;;  %v2923_v34 = vor.u32 %v3387_v31, %v2922_v30  ;;  %v2914_v36 = vld [vmem:[%s5188_s5 + $0x10] sm:$0xf]  ;;  %vm1316_vm1 = vcmask 1046528  }
  0x1c   : > { %p2837_p8 = scmp.lt.s32.totalorder %s3794_s30, 15  ;;  %s3369_s16 = sadd.s32 4, %s3789_s23  ;;  %v2987_v35 = vor.u32 %v3403_v33, %v2986_v32  ;;  %v3385_v37 = vld [vmem:[%s5188_s5 + $0x14] sm:$0xf0]  ;;  %v2978_v38 = vld [vmem:[%s5188_s5 + $0x90] sm:$0xf] }
  0x1d   : > { %989 = vmatpush.bf16.msra.mxu0 %v2947_v16  ;;  %3519 = vmatpush.bf16.msra.mxu2 %v2947_v16  ;;  %5237 = sst [smem:[#allocation8_spill]] %s3812_s22  ;;  %s2832_s19 = sshll.u32 %s3812_s22, 2  ;;  %v3401_v39 = vld [vmem:[%s5188_s5 + $0x94] sm:$0xf0]  ;;  %v2906_v40 = vld [vmem:[%s5188_s5] sm:$0xf]  ;;  %v2915_v41 = vor.u32 %v3385_v37, %v2914_v36 }
  0x1e   : > { %3527 = vmatpush.bf16.msra.mxu3 %v3011_v17  ;;  %1028 = vmatpush.bf16.msra.mxu1 %v3011_v17  ;;  %s668_s17 = sadd.s32 %s3815_s18, %s2832_s19  ;;  %p3834_p9 = scmp.lt.s32.totalorder %s3369_s16, 15  ;;  %v3383_v42 = vld [vmem:[%s5188_s5 + $0x4] sm:$0xf0]  ;;  %v2970_v43 = vld [vmem:[%s5188_s5 + $0x80] sm:$0xf]  ;;  %v2979_v44 = vor.u32 %v3401_v39, %v2978_v38  ;;  %vm1267_vm4 = vcmask 1040384  }
  0x1f   : > { %s675_s1 = scalar_select %p674_p7, %s3794_s30, 0  ;;  %v3399_v45 = vld [vmem:[%s5188_s5 + $0x84] sm:$0xf0]  ;;  %v3396_v46 = vld [vmem:[%s5188_s5 + $0x74] sm:$0xf]  ;;  %v2907_v53 = vor.u32 %v3383_v42, %v2906_v40 }
  0x20   : > { %s2834_s23 = sshll.u32 %s668_s17, 2  ;;  %s5328_s16 = smov (!%p3834_p9, %s3369_s16), 15  ;;  %v2964_v47 = vld [vmem:[%s5188_s5 + $0x78] sm:$0xf0]  ;;  %v3412_v48 = vld [vmem:[%s5188_s5 + $0xf4] sm:$0xf]  ;;  %v2971_v57 = vor.u32 %v3399_v45, %v2970_v43 }
  0x21   : > { %990 = vmatpush.bf16.msra.mxu0 %v2939_v22  ;;  %3520 = vmatpush.bf16.msra.mxu2 %v2939_v22  ;;  %s5326_s1 = smov (!%p2837_p8, %s675_s1), 15  ;;  %s5239_s19 = sld [smem:[#allocation42_spill]]  ;;  %v3028_v49 = vld [vmem:[%s5188_s5 + $0xf8] sm:$0xf0]  ;;  %v2967_v60 = vor.u32 %v3396_v46, %v2964_v47  ;;  %v3394_v62 = vld [vmem:[%s5188_s5 + $0x64] sm:$0xf] }
  0x22   : > { %3528 = vmatpush.bf16.msra.mxu3 %v3003_v23  ;;  %1029 = vmatpush.bf16.msra.mxu1 %v3003_v23  ;;  %s2842_s12 = sshll.u32 %s5326_s1, 2  ;;  %s5330_s16 = smov (!%p3834_p9, %s5328_s16), 15  ;;  %v3031_v61 = vor.u32 %v3412_v48, %v3028_v49  ;;  %v2956_v63 = vld [vmem:[%s5188_s5 + $0x68] sm:$0xf0]  ;;  %v3410_v2 = vld [vmem:[%s5188_s5 + $0xe4] sm:$0xf] }
  0x23   : > { %s682_s21 = sadd.s32 %s2842_s12, %s3815_s18  ;;  %s5240_s12 = sld [smem:[#allocation43_spill]]  ;;  %v3020_v3 = vld [vmem:[%s5188_s5 + $0xe8] sm:$0xf0]  ;;  %v2959_v6 = vor.u32 %v3394_v62, %v2956_v63  ;;  %v3392_v8 = vld [vmem:[%s5188_s5 + $0x54] sm:$0xf] }
  0x24   : > { %s2844_s26 = sshll.u32 %s682_s21, 2  ;;  %s2849_s28 = sshll.u32 %s5330_s16, 2  ;;  %v3023_v7 = vor.u32 %v3410_v2, %v3020_v3  ;;  %v2948_v9 = vld [vmem:[%s5188_s5 + $0x58] sm:$0xf0]  ;;  %v3408_v10 = vld [vmem:[%s5188_s5 + $0xd4] sm:$0xf] }
  0x25   : > { %991 = vmatpush.bf16.msra.mxu0 %v2931_v28  ;;  %3521 = vmatpush.bf16.msra.mxu2 %v2931_v28  ;;  %v3012_v11 = vld [vmem:[%s5188_s5 + $0xd8] sm:$0xf0]  ;;  %s699_s29 = sadd.s32 %s2849_s28, %s3815_s18  ;;  %v2951_v12 = vor.u32 %v3392_v8, %v2948_v9  ;;  %v3390_v14 = vld [vmem:[%s5188_s5 + $0x44] sm:$0xf]  ;;  %v2940_v15 = vld [vmem:[%s5188_s5 + $0x48] sm:$0xf0] }
  0x26   : > { %3529 = vmatpush.bf16.msra.mxu3 %v2995_v29  ;;  %1030 = vmatpush.bf16.msra.mxu1 %v2995_v29  ;;  %v3015_v13 = vor.u32 %v3408_v10, %v3012_v11  ;;  %s2851_s30 = sshll.u32 %s699_s29, 2  ;;  %v3406_v16 = vld [vmem:[%s5188_s5 + $0xc4] sm:$0xf]  ;;  %v3004_v17 = vld [vmem:[%s5188_s5 + $0xc8] sm:$0xf0]  ;;  %v2943_v18 = vor.u32 %v3390_v14, %v2940_v15  ;;  %v3436_v8 = vld [vmem:[%s5186_s3 + $0x30] sm:$0xff] }
  0x27   : > { %s3871_s0 = scalar_lea.vmem %s5239_s19, %s2834_s23  ;;  %v3007_v19 = vor.u32 %v3406_v16, %v3004_v17  ;;  %v3388_v22 = vld [vmem:[%s5188_s5 + $0x34] sm:$0xf]  ;;  %v2932_v23 = vld [vmem:[%s5188_s5 + $0x38] sm:$0xf0]  ;;  %v2924_v37 = vld [vmem:[%s5188_s5 + $0x28] sm:$0xf0] }
  0x28   : > { %v2890_v50 = vld [vmem:[%s3871_s0 + $0x30] sm:$0xf]  ;;  %v3377_v51 = vld [vmem:[%s3871_s0 + $0x34] sm:$0xf0]  ;;  %v3376_v52 = vld [vmem:[%s3871_s0 + $0x34] sm:$0xf]  ;;  %v2935_v32 = vor.u32 %v3388_v22, %v2932_v23 }
  0x29   : > { %992 = vmatpush.bf16.msra.mxu0 %v2923_v34  ;;  %3522 = vmatpush.bf16.msra.mxu2 %v2923_v34  ;;  %s684_s17 = scalar_lea.vmem %s5240_s12, %s2844_s26  ;;  %v2892_v56 = vld [vmem:[%s3871_s0 + $0x38] sm:$0xf0]  ;;  %v3907_v1 = vor.u32 %v3377_v51, %v2890_v50  ;;  %s701_s12 = scalar_lea.vmem %s5185_s2, %s2851_s30  ;;  %v2866_v20 = vld [vmem:[%s3871_s0] sm:$0xf]  ;;  %v3371_v21 = vld [vmem:[%s3871_s0 + $0x4] sm:$0xf0] }
  0x2a   : > { %3530 = vmatpush.bf16.msra.mxu3 %v2987_v35  ;;  %1031 = vmatpush.bf16.msra.mxu1 %v2987_v35  ;;  %v2858_v54 = vld [vmem:[%s684_s17] sm:$0xf]  ;;  %v3379_v55 = vld [vmem:[%s684_s17 + $0x4] sm:$0xf0]  ;;  %v3378_v58 = vld [vmem:[%s684_s17 + $0x4] sm:$0xf]  ;;  %v3915_v4 = vor.u32 %v3376_v52, %v2892_v56  ;;  %v3970_v35 = vor.u32 %v3371_v21, %v2866_v20 }
  0x2b   : > { %v2860_v59 = vld [vmem:[%s684_s17 + $0x8] sm:$0xf0]  ;;  %v3905_v0 = vor.u32 %v3379_v55, %v2858_v54  ;;  %5241 = vst [vmem:[#allocation9_spill] sm:$0xff] %v3907_v1  ;;  %v3404_v24 = vld [vmem:[%s5188_s5 + $0xb4] sm:$0xf]  ;;  %p1215_p10 = scmp.gt.s32.totalorder %s3598_s24, 0 }
  0x2c   : > { %5242 = vst [vmem:[#allocation10_spill] sm:$0xff] %v3915_v4  ;;  %v3917_v5 = vor.u32 %v3378_v58, %v2860_v59  ;;  %v2996_v25 = vld [vmem:[%s5188_s5 + $0xb8] sm:$0xf0]  ;;  %v2898_v26 = vld [vmem:[%s701_s12] sm:$0xf]  ;;  %v3444_v9 = vld [vmem:[%s5186_s3 + $0x70] sm:$0xff] }
  0x2d   : > { %993 = vmatpush.bf16.msra.mxu0 %v2915_v41  ;;  %3523 = vmatpush.bf16.msra.mxu2 %v2915_v41  ;;  %v3381_v27 = vld [vmem:[%s701_s12 + $0x4] sm:$0xf0]  ;;  %v3370_v28 = vld [vmem:[%s3871_s0 + $0x4] sm:$0xf]  ;;  %v2900_v30 = vld [vmem:[%s701_s12 + $0x8] sm:$0xf0]  ;;  %v2999_v33 = vor.u32 %v3404_v24, %v2996_v25 }
  0x2e   : > { %3531 = vmatpush.bf16.msra.mxu3 %v2979_v44  ;;  %1032 = vmatpush.bf16.msra.mxu1 %v2979_v44  ;;  %v3380_v29 = vld [vmem:[%s701_s12 + $0x4] sm:$0xf]  ;;  %v2868_v31 = vld [vmem:[%s3871_s0 + $0x8] sm:$0xf0]  ;;  %v2899_v36 = vor.u32 %v3381_v27, %v2898_v26  ;;  %v3384_v44 = vld [vmem:[%s5188_s5 + $0x14] sm:$0xf] }
  0x2f   : > { %v3386_v34 = vld [vmem:[%s5188_s5 + $0x24] sm:$0xf]  ;;  %v2988_v39 = vld [vmem:[%s5188_s5 + $0xa8] sm:$0xf0]  ;;  %v2903_v40 = vor.u32 %v3380_v29, %v2900_v30  ;;  %v3981_v41 = vor.u32 %v3370_v28, %v2868_v31  ;;  %v2916_v45 = vld [vmem:[%s5188_s5 + $0x18] sm:$0xf0] }
  0x30   : > { %v3402_v38 = vld [vmem:[%s5188_s5 + $0xa4] sm:$0xf]  ;;  %v2927_v42 = vor.u32 %v3386_v34, %v2924_v37  ;;  %v3400_v46 = vld [vmem:[%s5188_s5 + $0x94] sm:$0xf]  ;;  %v2980_v47 = vld [vmem:[%s5188_s5 + $0x98] sm:$0xf0]  ;;  %v2919_v48 = vor.u32 %v3384_v44, %v2916_v45 }
  0x31   : > { %994 = vmatpush.bf16.msra.mxu0 %v2907_v53  ;;  %3524 = vmatpush.bf16.msra.mxu2 %v2907_v53  ;;  %v2991_v43 = vor.u32 %v3402_v38, %v2988_v39  ;;  %v2983_v49 = vor.u32 %v3400_v46, %v2980_v47  ;;  %v3382_v50 = vld [vmem:[%s5188_s5 + $0x4] sm:$0xf]  ;;  %v2908_v51 = vld [vmem:[%s5188_s5 + $0x8] sm:$0xf0]  ;;  %v2874_v56 = vld [vmem:[%s3871_s0 + $0x10] sm:$0xf] }
  0x32   : > { %3532 = vmatpush.bf16.msra.mxu3 %v2971_v57  ;;  %1033 = vmatpush.bf16.msra.mxu1 %v2971_v57  ;;  %v3398_v52 = vld [vmem:[%s5188_s5 + $0x84] sm:$0xf]  ;;  %v2972_v53 = vld [vmem:[%s5188_s5 + $0x88] sm:$0xf0]  ;;  %v2911_v54 = vor.u32 %v3382_v50, %v2908_v51  ;;  %v3373_v57 = vld [vmem:[%s3871_s0 + $0x14] sm:$0xf0] }
  0x33   : > { %v2975_v55 = vor.u32 %v3398_v52, %v2972_v53  ;;  %v3372_v58 = vld [vmem:[%s3871_s0 + $0x14] sm:$0xf]  ;;  %v2876_v59 = vld [vmem:[%s3871_s0 + $0x18] sm:$0xf0]  ;;  %v2882_v62 = vld [vmem:[%s3871_s0 + $0x20] sm:$0xf] }
  0x34   : > { %995 = vmatmul.bf16.vlgmr.msra.gmra.mxu0 %v3905_v0  ;;  %1015 = vmatmul.bf16.vlgmr.msra.gmra.mxu2 %v3907_v1  ;;  %v3375_v63 = vld [vmem:[%s3871_s0 + $0x24] sm:$0xf0]  ;;  %v3374_v2 = vld [vmem:[%s3871_s0 + $0x24] sm:$0xf]  ;;  %v2884_v3 = vld [vmem:[%s3871_s0 + $0x28] sm:$0xf0] }
  0x35   : > { %1065 = vmatpush.bf16.msrb.mxu2 %v2967_v60  ;;  %1054 = vmatmul.bf16.vlgmr.msra.gmra.mxu3 %v3915_v4  ;;  %v4013_v60 = vor.u32 %v3373_v57, %v2874_v56  ;;  %v4054_v10 = vld [vmem:[%s5189_s6] sm:$0x3]  ;;  %s1216_s18 = scalar_select %p1215_p10, 1, 0  ;;  %v3421_v20 = vld [vmem:[%s5192_s9 + $0x38] sm:$0xff]  ;;  %v3435_v25 = vld [vmem:[%s5186_s3 + $0x28] sm:$0xff] }
  0x36   : > { %1104 = vmatpush.bf16.msrb.mxu3 %v3031_v61  ;;  %1034 = vmatmul.bf16.vlgmr.msra.gmra.mxu1 %v3917_v5  ;;  %v4015_v61 = vor.u32 %v3372_v58, %v2876_v59  ;;  %p1218_p11 = scmp.lt.s32.totalorder %s3598_s24, 3  ;;  %v3443_v26 = vld [vmem:[%s5186_s3 + $0x68] sm:$0xff]  ;;  %v3420_v27 = vld [vmem:[%s5192_s9 + $0x30] sm:$0xff]  ;;  %v4086_v34 = vld [vmem:[%s5190_s7 + $0x1] ss:$4 sm:$0x3] }
  0x37   : > { %5243 = vst [vmem:[#allocation11_spill] sm:$0xff] %v4013_v60  ;;  %1841 = vmatpush.bf16.msrb.mxu0 %v3421_v20  ;;  %s1217_s22 = scvt.s32.f32 %s1216_s18  ;;  %v3419_v39 = vld [vmem:[%s5192_s9 + $0x28] sm:$0xff]  ;;  %v4120_v46 = vld [vmem:[%s5190_s7 + $0x11] ss:$4 sm:$0x3]  ;;  %v3434_v51 = vld [vmem:[%s5186_s3 + $0x20] sm:$0xff] }
  0x38   : > { %5244 = vst [vmem:[#allocation12_spill] sm:$0xff] %v4015_v61  ;;  %s4096_s1 = scalar_select %p1218_p11, 1, 0  ;;  %v4115_v45 = vld [vmem:[%s5190_s7 + $0x9] ss:$4 sm:$0x3] }
  0x39   : > { %1066 = vmatpush.bf16.msrb.mxu2 %v2959_v6  ;;  %v4025_v6 = vor.u32 %v3375_v63, %v2882_v62  ;;  %v4076_v30 = vstv %s1217_s22  ;;  %v3442_v52 = vld [vmem:[%s5186_s3 + $0x60] sm:$0xff]  ;;  %v4145_v58 = vld [vmem:[%s5190_s7 + $0xa] ss:$4 sm:$0x3]  ;;  %v4154_v63 = vperm.slane %v4115_v45, 0  ;;  %s5307_s30 = sld [smem:[#allocation44_spill]] }
  0x3a   : > { %1105 = vmatpush.bf16.msrb.mxu3 %v3023_v7  ;;  %v4027_v7 = vor.u32 %v3374_v2, %v2884_v3  ;;  %v3418_v53 = vld [vmem:[%s5192_s9 + $0x20] sm:$0xff]  ;;  %s1220_s25 = scvt.s32.f32 %s4096_s1  ;;  %5248 = vst [vmem:[#allocation16_spill] sm:$0xff] %v4145_v58  ;;  %v4159_v3 = vld [vmem:[%s5190_s7 + $0x12] ss:$4 sm:$0x3]  ;;  %s5309_s18 = sld [smem:[#allocation7_spill]] }
  0x3b   : > { %5245 = vst [vmem:[#allocation13_spill] sm:$0xff] %v4025_v6  ;;  %1842 = vmatpush.bf16.msrb.mxu0 %v3420_v27  ;;  %s5310_s22 = sld [smem:[#allocation45_spill]] }
  0x3c   : > { %5246 = vst [vmem:[#allocation14_spill] sm:$0xff] %v4027_v7  ;;  %s5311_s17 = sld [smem:[#allocation46_spill]] }
  0x3d   : > { %1067 = vmatpush.bf16.msrb.mxu2 %v2951_v12  ;;  %v4057_v12 = vperm.slane %v4054_v10, 0  ;;  %5249 = vst [vmem:[#allocation17_spill] sm:$0xff] %v4159_v3 }
  0x3e   : > { %1106 = vmatpush.bf16.msrb.mxu3 %v3015_v13 }
  0x3f   : > { %1843 = vmatpush.bf16.msrb.mxu0 %v3419_v39 }
  0x40   : > { %s2854_s16 = sshll.u32 %s5309_s18, 5 }
  0x41   : > { %1068 = vmatpush.bf16.msrb.mxu2 %v2943_v18 }
  0x42   : > { %1107 = vmatpush.bf16.msrb.mxu3 %v3007_v19 }
  0x43   : > { %1844 = vmatpush.bf16.msrb.mxu0 %v3418_v53 }
  0x44   : > { %1000 = vmatmul.bf16.gmra.mxu0 %v3970_v35  ;;  %1020 = vmatmul.bf16.gmra.mxu2 %v2899_v36 }
  0x45   : > { %1069 = vmatpush.bf16.msrb.mxu2 %v2935_v32  ;;  %1059 = vmatmul.bf16.gmra.mxu3 %v2903_v40 }
  0x46   : > { %1108 = vmatpush.bf16.msrb.mxu3 %v2999_v33  ;;  %1039 = vmatmul.bf16.gmra.mxu1 %v3981_v41  ;;  %v4081_v33 = vld [vmem:[%s5190_s7] ss:$4 sm:$0x3] }
  0x49   : > { %1070 = vmatpush.bf16.msrb.mxu2 %v2927_v42  ;;  %v4109_v42 = vld [vmem:[%s5190_s7 + $0x10] ss:$4 sm:$0x3] }
  0x4a   : > { %1109 = vmatpush.bf16.msrb.mxu3 %v2991_v43  ;;  %v4151_v62 = vperm.slane %v4109_v42, 0 }
  0x4d   : > { %1071 = vmatpush.bf16.msrb.mxu2 %v2919_v48 }
  0x4e   : > { %1110 = vmatpush.bf16.msrb.mxu3 %v2983_v49 }
  0x51   : > { %1072 = vmatpush.bf16.msrb.mxu2 %v2911_v54  ;;  %v4132_v54 = vperm.slane %v4081_v33, 0 }
  0x52   : > { %1111 = vmatpush.bf16.msrb.mxu3 %v2975_v55  ;;  %v4135_v55 = vperm.slane %v4086_v34, 0 }
  0x54   : > { %1005 = vmatmul.bf16.gmra.mxu0 %v4013_v60  ;;  %1073 = vmatmul.bf16.vlgmr.msrb.gmra.mxu2 %v3905_v0  ;;  %v3437_v0 = vld [vmem:[%s5186_s3 + $0x38] sm:$0xff] }
  0x55   : > { %1112 = vmatmul.bf16.vlgmr.msrb.gmra.mxu3 %v3917_v5  ;;  %v3445_v5 = vld [vmem:[%s5186_s3 + $0x78] sm:$0xff]  ;;  %2031 = vmatpush.bf16.msra.mxu2 %v3437_v0 }
  0x56   : > { %1044 = vmatmul.bf16.gmra.mxu1 %v4015_v61  ;;  %2060 = vmatpush.bf16.msra.mxu3 %v3445_v5  ;;  %v4163_v5 = vperm.slane %v4120_v46, 0 }
  0x59   : > { %2032 = vmatpush.bf16.msra.mxu2 %v3436_v8 }
  0x5a   : > { %2061 = vmatpush.bf16.msra.mxu3 %v3444_v9 }
  0x5d   : > { %2033 = vmatpush.bf16.msra.mxu2 %v3435_v25 }
  0x5e   : > { %2062 = vmatpush.bf16.msra.mxu3 %v3443_v26 }
  0x61   : > { %2034 = vmatpush.bf16.msra.mxu2 %v3434_v51  ;;  %v4216_v51 = vperm.slane %v4086_v34, 1 }
  0x62   : > { %2063 = vmatpush.bf16.msra.mxu3 %v3442_v52 }
  0x63   : > { %5254 = vst [vmem:[#allocation22_spill] sm:$0xff] %v4216_v51 }
  0x64   : > { %1010 = vmatmul.bf16.gmra.mxu0 %v4025_v6  ;;  %1078 = vmatmul.bf16.gmra.mxu2 %v3970_v35 }
  0x65   : > { %1117 = vmatmul.bf16.gmra.mxu3 %v3981_v41 }
  0x66   : > { %1049 = vmatmul.bf16.gmra.mxu1 %v4027_v7 }
  0x74   : > { %1083 = vmatmul.bf16.gmra.mxu2 %v4013_v60 }
  0x75   : > { %1122 = vmatmul.bf16.gmra.mxu3 %v4015_v61 }
  0x84   : > { %1088 = vmatmul.bf16.gmra.mxu2 %v4025_v6 }
  0x85   : > { %1127 = vmatmul.bf16.gmra.mxu3 %v4027_v7 }
  0x94   : > { %1093 = vmatmul.bf16.gmra.mxu2 %v3907_v1 }
  0x95   : > { %1132 = vmatmul.bf16.gmra.mxu3 %v3915_v4 }
  0xa4   : > { %1098 = vmatmul.bf16.gmra.mxu2 %v2899_v36  ;;  %v4091_v36 = vld [vmem:[%s5190_s7 + $0x2] ss:$4 sm:$0x3] }
  0xa5   : > { %1137 = vmatmul.bf16.gmra.mxu3 %v2903_v40  ;;  %v4104_v40 = vld [vmem:[%s5190_s7 + $0x8] ss:$4 sm:$0x3]  ;;  %v4138_v56 = vperm.slane %v4091_v36, 0  ;;  %v4228_v34 = vperm.slane %v4091_v36, 1 }
  0xa6   : > { %v4148_v59 = vperm.slane %v4104_v40, 0  ;;  %v3415_v36 = vld [vmem:[%s5192_s9 + $0x8] sm:$0xff] }
  0xa7   : > { %5247 = vst [vmem:[#allocation15_spill] sm:$0xff] %v4138_v56 }
  0xb1   : > { %v996_v11 = vpop.f32.mrf.mxu0 }
  0xb2   : > { %v997_v14 = vadd.f32 %v996_v11, %v4057_v12 }
  0xb3   : > { %v1035_v13 = vpop.f32.mrf.mxu1 }
  0xb4   : > { %v1036_v16 = vadd.f32 %v1035_v13, %v997_v14 }
  0xb6   : > { %v1167_v23 = vmul.f32 0.01, %v1036_v16  ;;  %vm1143_vm0 = vcmp.ge.f32.partialorder %v1036_v16, 0.0 }
  0xb7   : > { %v1016_v15 = vpop.f32.mrf.mxu2 }
  0xb8   : > { %v1017_v17 = vadd.f32 %v1016_v15, %v4057_v12  ;;  %v1055_v18 = vpop.f32.mrf.mxu3  ;;  %v1191_v29 = vsel %vm1143_vm0, %v1036_v16, %v1167_v23  ;;  %v3417_v16 = vld [vmem:[%s5192_s9 + $0x18] sm:$0xff] }
  0xb9   : > { %v998_v19 = vpop.f32.mrf.mxu0  ;;  %v1222_v44 = vmul.f32 %v4076_v30, %v1191_v29  ;;  %v4191_v29 = vperm.slane %v4054_v10, 1  ;;  %1845 = vmatpush.bf16.msrb.mxu0 %v3417_v16 }
  0xba   : > { %v1056_v21 = vadd.f32 %v1055_v18, %v1017_v17  ;;  %v999_v24 = vadd.f32 %v998_v19, %v4057_v12  ;;  %v4172_v17 = vperm.slane %v4145_v58, 0  ;;  %v4174_v19 = vstv %s1220_s25  ;;  %s5308_s25 = sld [smem:[#allocation8_spill]] }
  0xbb   : > { %v1037_v22 = vpop.f32.mrf.mxu1  ;;  %v1292_v49 = vrot.slane %v1222_v44, 1  ;;  %5251 = vst [vmem:[#allocation19_spill] sm:$0xff] %v4174_v19  ;;  %v4182_v26 = vmul.f32 %v4132_v54, %v1222_v44  ;;  %v4185_v27 = vmul.f32 %v4135_v55, %v1222_v44 }
  0xbc   : > { %v1038_v31 = vadd.f32 %v1037_v22, %v999_v24  ;;  %v1183_v47 = vmul.f32 0.01, %v1056_v21  ;;  %vm1159_vm2 = vcmp.ge.f32.partialorder %v1056_v21, 0.0  ;;  %5250 = vst [vmem:[#allocation18_spill] sm:$0xff] %v4172_v17 }
  0xbd   : > { %v1317_v13 = vsel %vm1316_vm1, %v1292_v49, 0.0 }
  0xbe   : > { %v1169_v48 = vmul.f32 0.01, %v1038_v31  ;;  %vm1145_vm3 = vcmp.ge.f32.partialorder %v1038_v31, 0.0  ;;  %v1207_v0 = vsel %vm1159_vm2, %v1056_v21, %v1183_v47  ;;  %v4177_v21 = vperm.slane %v4159_v3, 0 }
  0xbf   : > { %v1018_v28 = vpop.f32.mrf.mxu2  ;;  %v1300_v25 = vrot.slane %v1207_v0, 1  ;;  %v4204_v44 = vmul.f32 %v4151_v62, %v1207_v0  ;;  %v4207_v10 = vmul.f32 %v4154_v63, %v1207_v0  ;;  %v4210_v47 = vmul.f32 %v4163_v5, %v1207_v0 }
  0xc0   : > { %v1057_v32 = vpop.f32.mrf.mxu3  ;;  %v1019_v37 = vadd.f32 %v1018_v28, %v4057_v12  ;;  %v1193_v8 = vsel %vm1145_vm3, %v1038_v31, %v1169_v48  ;;  %v4188_v28 = vmul.f32 %v4138_v56, %v1317_v13  ;;  %v3429_v31 = vld [vmem:[%s5192_s9 + $0x78] sm:$0xff]  ;;  %v3428_v13 = vld [vmem:[%s5192_s9 + $0x70] sm:$0xff]  ;;  %s2853_s1 = sshll.u32 %s5308_s25, 1 }
  0xc1   : > { %v1001_v38 = vpop.f32.mrf.mxu0  ;;  %v1224_v22 = vmul.f32 %v4076_v30, %v1193_v8  ;;  %5252 = vst [vmem:[#allocation20_spill] sm:$0xff] %v4207_v10  ;;  %1870 = vmatpush.bf16.msrb.mxu1 %v3429_v31  ;;  %v1325_v52 = vsel %vm1316_vm1, %v1300_v25, 0.0  ;;  %s713_s27 = sadd.s32 %s2854_s16, %s2853_s1 }
  0xc2   : > { %v1058_v50 = vadd.f32 %v1057_v32, %v1019_v37  ;;  %v1002_v57 = vadd.f32 %v1001_v38, %v4057_v12  ;;  %v4197_v32 = vmul.f32 %v4148_v59, %v1207_v0  ;;  %5253 = vst [vmem:[#allocation21_spill] sm:$0xff] %v4210_v47  ;;  %v4247_v25 = vmul.f32 %v4172_v17, %v1325_v52  ;;  %s2855_s24 = sshll.u32 %s713_s27, 2 }
  0xc3   : > { %v1040_v43 = vpop.f32.mrf.mxu1  ;;  %v1243_v37 = vrot.slane %v1224_v22, 7  ;;  %v4220_v53 = vmul.f32 %v4135_v55, %v1224_v22  ;;  %s5156_s21 = scalar_lea.vmem %s5311_s17, %s2855_s24 }
  0xc4   : > { %v1185_v14 = vmul.f32 0.01, %v1058_v50  ;;  %vm1161_vm5 = vcmp.ge.f32.partialorder %v1058_v50, 0.0  ;;  %v1041_v18 = vadd.f32 %v1040_v43, %v1002_v57  ;;  %v3416_v43 = vld [vmem:[%s5192_s9 + $0x10] sm:$0xff]  ;;  %5256 = vst [vmem:[#allocation24_spill] sm:$0xff] %v4247_v25 }
  0xc5   : > { %1846 = vmatpush.bf16.msrb.mxu0 %v3416_v43  ;;  %1871 = vmatpush.bf16.msrb.mxu1 %v3428_v13 }
  0xc6   : > { %v1209_v38 = vsel %vm1161_vm5, %v1058_v50, %v1185_v14  ;;  %v1171_v48 = vmul.f32 0.01, %v1041_v18  ;;  %vm1147_vm6 = vcmp.ge.f32.partialorder %v1041_v18, 0.0  ;;  %v4213_v50 = vperm.slane %v4081_v33, 1  ;;  %v3433_v14 = vld [vmem:[%s5186_s3 + $0x18] sm:$0xff] }
  0xc7   : > { %v1021_v2 = vpop.f32.mrf.mxu2  ;;  %v1251_v57 = vrot.slane %v1209_v38, 7  ;;  %2035 = vmatpush.bf16.msra.mxu2 %v3433_v14  ;;  %v4269_v13 = vmul.f32 %v4177_v21, %v1209_v38 }
  0xc8   : > { %v1022_v9 = vadd.f32 %v1021_v2, %v4057_v12  ;;  %v1060_v11 = vpop.f32.mrf.mxu3  ;;  %v1195_v16 = vsel %vm1147_vm6, %v1041_v18, %v1171_v48 }
  0xc9   : > { %v1003_v15 = vpop.f32.mrf.mxu0  ;;  %v1294_v31 = vrot.slane %v1195_v16, 1  ;;  %v1276_v48 = vsel %vm1267_vm4, 0.0, %v1251_v57  ;;  %1847 = vmatpush.bf16.msrb.mxu0 %v3415_v36  ;;  %5259 = vst [vmem:[#allocation27_spill] sm:$0xff] %v4269_v13  ;;  %v4278_v14 = vmul.f32 %v4132_v54, %v1195_v16  ;;  %v4290_v25 = vmul.f32 %v4135_v55, %v1195_v16 }
  0xca   : > { %v1061_v23 = vadd.f32 %v1060_v11, %v1022_v9  ;;  %v1004_v24 = vadd.f32 %v1003_v15, %v4057_v12  ;;  %v1268_v9 = vsel %vm1267_vm4, 0.0, %v1243_v37  ;;  %v4225_v11 = vmul.f32 %v4138_v56, %v1224_v22  ;;  %v3441_v15 = vld [vmem:[%s5186_s3 + $0x58] sm:$0xff] }
  0xcb   : > { %v1042_v20 = vpop.f32.mrf.mxu1  ;;  %v4251_v18 = vmul.f32 %v4132_v54, %v1268_v9  ;;  %2064 = vmatpush.bf16.msra.mxu3 %v3441_v15  ;;  %v3414_v9 = vld [vmem:[%s5192_s9] sm:$0xff]  ;;  %v4282_v1 = vsel %vm1316_vm1, %v1294_v31, 0.0  ;;  %v4294_v31 = vmul.f32 %v4154_v63, %v1195_v16 }
  0xcc   : > { %v1043_v39 = vadd.f32 %v1042_v20, %v1004_v24  ;;  %v1187_v20 = vmul.f32 0.01, %v1061_v23  ;;  %v4244_v24 = vmul.f32 %v4177_v21, %v1325_v52  ;;  %vm1163_vm8 = vcmp.ge.f32.partialorder %v1061_v23, 0.0 }
  0xcd   : > { %v4261_v52 = vmul.f32 %v4163_v5, %v1209_v38  ;;  %1848 = vmatpush.bf16.msrb.mxu0 %v3414_v9  ;;  %v4300_v9 = vmul.f32 %v4172_v17, %v4282_v1 }
  0xce   : > { %v1173_v2 = vmul.f32 0.01, %v1043_v39  ;;  %vm1149_vm7 = vcmp.ge.f32.partialorder %v1043_v39, 0.0  ;;  %5255 = vst [vmem:[#allocation23_spill] sm:$0xff] %v4244_v24  ;;  %v1211_v57 = vsel %vm1163_vm8, %v1061_v23, %v1187_v20 }
  0xcf   : > { %v1023_v49 = vpop.f32.mrf.mxu2  ;;  %5258 = vst [vmem:[#allocation26_spill] sm:$0xff] %v4261_v52  ;;  %v1227_v10 = vmul.f32 %v4174_v19, %v1211_v57  ;;  %v4309_v57 = vperm.slane %v4104_v40, 1  ;;  %v3432_v40 = vld [vmem:[%s5186_s3 + $0x10] sm:$0xff] }
  0xd0   : > { %v1024_v0 = vadd.f32 %v1023_v49, %v4057_v12  ;;  %v1062_v8 = vpop.f32.mrf.mxu3  ;;  %v4255_v49 = vmul.f32 %v4154_v63, %v1209_v38  ;;  %v4258_v4 = vsel %vm1149_vm7, %v1043_v39, %v1173_v2  ;;  %v4272_v39 = vmul.f32 %v4172_v17, %v1209_v38  ;;  %2036 = vmatpush.bf16.msra.mxu2 %v3432_v40 }
  0xd1   : > { %v1006_v33 = vpop.f32.mrf.mxu0  ;;  %v4275_v2 = vmul.f32 %v4148_v59, %v1276_v48  ;;  %v1245_v15 = vrot.slane %v4258_v4, 7  ;;  %v4286_v38 = vmul.f32 %v4151_v62, %v1276_v48  ;;  %v4341_v3 = vmul.f32 %v4135_v55, %v4258_v4 }
  0xd2   : > { %v1063_v37 = vadd.f32 %v1062_v8, %v1024_v0  ;;  %v1007_v43 = vadd.f32 %v1006_v33, %v4057_v12  ;;  %5257 = vst [vmem:[#allocation25_spill] sm:$0xff] %v4255_v49  ;;  %v1376_v0 = vmul.f32 %v4148_v59, %v1195_v16  ;;  %v4314_v16 = vld [vmem:[%s5191_s8] sm:$0x3] }
  0xd3   : > { %v1045_v22 = vpop.f32.mrf.mxu1  ;;  %5260 = vst [vmem:[#allocation28_spill] sm:$0xff] %v4272_v39  ;;  %v1270_v48 = vsel %vm1267_vm4, 0.0, %v1245_v15  ;;  %v4318_v15 = vperm.slane %v4115_v45, 1  ;;  %v1302_v45 = vrot.slane %v1227_v10, 1 }
  0xd4   : > { %vm1165_vm9 = vcmp.ge.f32.partialorder %v1063_v37, 0.0  ;;  %v1189_v8 = vmul.f32 0.01, %v1063_v37  ;;  %v1046_v33 = vadd.f32 %v1045_v22, %v1007_v43  ;;  %5261 = vst [vmem:[#allocation29_spill] sm:$0xff] %v4275_v2  ;;  %v1392_v39 = vadd.f32 %v1376_v0, %v4182_v26 }
  0xd5   : > { %5263 = vst [vmem:[#allocation31_spill] sm:$0xff] %v4314_v16  ;;  %v1374_v6 = vmul.f32 %v4148_v59, %v1270_v48  ;;  %v4337_v2 = vperm.slane %v4314_v16, 0 }
  0xd6   : > { %v1213_v23 = vsel %vm1165_vm9, %v1063_v37, %v1189_v8  ;;  %vm1151_vm10 = vcmp.ge.f32.partialorder %v1046_v33, 0.0  ;;  %v1175_v20 = vmul.f32 0.01, %v1046_v33  ;;  %5264 = vst [vmem:[#allocation32_spill] sm:$0xff] %v4318_v15 }
  0xd7   : > { %v1074_v36 = vpop.f32.mrf.mxu2  ;;  %v4304_v26 = vmul.f32 %v4174_v19, %v1213_v23  ;;  %v3427_v23 = vld [vmem:[%s5192_s9 + $0x68] sm:$0xff] }
  0xd8   : > { %v1075_v22 = vadd.f32 %v1074_v36, %v4191_v29  ;;  %v1113_v43 = vpop.f32.mrf.mxu3  ;;  %v4296_v37 = vsel %vm1151_vm10, %v1046_v33, %v1175_v20  ;;  %1872 = vmatpush.bf16.msrb.mxu1 %v3427_v23  ;;  %v4353_v23 = vmul.f32 %v4132_v54, %v1270_v48 }
  0xd9   : > { %v1008_v7 = vpop.f32.mrf.mxu0  ;;  %5262 = vst [vmem:[#allocation30_spill] sm:$0xff] %v4304_v26  ;;  %v1415_v0 = vmul.f32 %v4151_v62, %v4296_v37  ;;  %v1296_v60 = vrot.slane %v4296_v37, 1  ;;  %v1530_v15 = vmul.f32 %v4163_v5, %v4296_v37 }
  0xda   : > { %v1114_v8 = vadd.f32 %v1113_v43, %v1075_v22  ;;  %v1009_v20 = vadd.f32 %v1008_v7, %v4057_v12  ;;  %v4327_v22 = vmul.f32 %v4151_v62, %v1227_v10  ;;  %v4330_v43 = vmul.f32 %v4163_v5, %v1227_v10  ;;  %v3440_v7 = vld [vmem:[%s5186_s3 + $0x50] sm:$0xff] }
  0xdb   : > { %v1047_v36 = vpop.f32.mrf.mxu1  ;;  %v1431_v19 = vadd.f32 %v1415_v0, %v1392_v39  ;;  %v1493_v39 = vmul.f32 %v4154_v63, %v4258_v4  ;;  %v1253_v0 = vrot.slane %v4304_v26, 7  ;;  %2065 = vmatpush.bf16.msra.mxu3 %v3440_v7  ;;  %v4348_v10 = vmul.f32 %v4172_v17, %v4258_v4  ;;  %v3426_v7 = vld [vmem:[%s5192_s9 + $0x60] sm:$0xff] }
  0xdc   : > { %vm1144_vm11 = vcmp.ge.f32.partialorder %v1114_v8, 0.0  ;;  %v1168_v33 = vmul.f32 0.01, %v1114_v8  ;;  %5265 = vst [vmem:[#allocation33_spill] sm:$0xff] %v4327_v22  ;;  %v1048_v24 = vadd.f32 %v1047_v36, %v1009_v20  ;;  %v4361_v22 = vmul.f32 %v4138_v56, %v4258_v4  ;;  %1873 = vmatpush.bf16.msrb.mxu1 %v3426_v7 }
  0xdd   : > { %5266 = vst [vmem:[#allocation34_spill] sm:$0xff] %v4330_v43  ;;  %v1470_v16 = vadd.f32 %v4220_v53, %v1431_v19  ;;  %v1380_v19 = vmul.f32 %v4148_v59, %v4296_v37  ;;  %v4376_v4 = vmul.f32 %v4138_v56, %v4282_v1 }
  0xde   : > { %v1192_v49 = vsel %vm1144_vm11, %v1114_v8, %v1168_v33  ;;  %vm1153_vm12 = vcmp.ge.f32.partialorder %v1048_v24, 0.0  ;;  %v1177_v36 = vmul.f32 0.01, %v1048_v24  ;;  %5267 = vst [vmem:[#allocation35_spill] sm:$0xff] %v4361_v22 }
  0xdf   : > { %v1076_v43 = vpop.f32.mrf.mxu2  ;;  %v1223_v8 = vmul.f32 %v4076_v30, %v1192_v49  ;;  %v4364_v49 = vsel %vm1316_vm1, %v1302_v45, 0.0 }
  0xe0   : > { %v1077_v33 = vadd.f32 %v1076_v43, %v4191_v29  ;;  %v1115_v20 = vpop.f32.mrf.mxu3  ;;  %5268 = vst [vmem:[#allocation36_spill] sm:$0xff] %v4364_v49  ;;  %v1390_v43 = vadd.f32 %v1374_v6, %v4251_v18  ;;  %v4367_v13 = vsel %vm1153_vm12, %v1048_v24, %v1177_v36  ;;  %v1278_v6 = vsel %vm1267_vm4, 0.0, %v1253_v0 }
  0xe1   : > { %v1011_v40 = vpop.f32.mrf.mxu0  ;;  %v1247_v53 = vrot.slane %v4367_v13, 7  ;;  %v1293_v24 = vrot.slane %v1223_v8, 1  ;;  %v4391_v7 = vmul.f32 %v4151_v62, %v1278_v6  ;;  %v4412_v22 = vmul.f32 %v4213_v50, %v1223_v8 }
  0xe2   : > { %v1116_v48 = vadd.f32 %v1115_v20, %v1077_v33  ;;  %v1012_v58 = vadd.f32 %v1011_v40, %v4057_v12  ;;  %v1509_v33 = vadd.f32 %v1493_v39, %v1470_v16  ;;  %v1532_v20 = vmul.f32 %v4163_v5, %v4367_v13 }
  0xe3   : > { %v1050_v61 = vpop.f32.mrf.mxu1  ;;  %v4380_v36 = vsel %vm1267_vm4, 0.0, %v1247_v53  ;;  %v4386_v40 = vmul.f32 %v4163_v5, %v4304_v26  ;;  %5270 = vst [vmem:[#allocation38_spill] sm:$0xff] %v4391_v7  ;;  %v4402_v39 = vsel %vm1316_vm1, %v1296_v60, 0.0  ;;  %v1396_v53 = vadd.f32 %v1380_v19, %v4278_v14  ;;  %v3425_v19 = vld [vmem:[%s5192_s9 + $0x58] sm:$0xff] }
  0xe4   : > { %v1170_v18 = vmul.f32 0.01, %v1116_v48  ;;  %v1051_v45 = vadd.f32 %v1050_v61, %v1012_v58  ;;  %vm1146_vm13 = vcmp.ge.f32.partialorder %v1116_v48, 0.0  ;;  %v1413_v0 = vmul.f32 %v4151_v62, %v4380_v36  ;;  %1874 = vmatpush.bf16.msrb.mxu1 %v3425_v19 }
  0xe5   : > { %5269 = vst [vmem:[#allocation37_spill] sm:$0xff] %v4386_v40  ;;  %v4395_v61 = vmul.f32 %v4132_v54, %v4296_v37  ;;  %v4399_v58 = vmul.f32 %v4135_v55, %v4296_v37  ;;  %v1318_v7 = vsel %vm1316_vm1, %v1293_v24, 0.0  ;;  %v1548_v56 = vadd.f32 %v1532_v20, %v1509_v33  ;;  %v3431_v24 = vld [vmem:[%s5186_s3 + $0x8] sm:$0xff] }
  0xe6   : > { %vm1155_vm14 = vcmp.ge.f32.partialorder %v1051_v45, 0.0  ;;  %v1179_v1 = vmul.f32 0.01, %v1051_v45  ;;  %v1194_v26 = vsel %vm1146_vm13, %v1116_v48, %v1170_v18  ;;  %v1429_v6 = vadd.f32 %v1413_v0, %v1390_v43  ;;  %2037 = vmatpush.bf16.msra.mxu2 %v3431_v24 }
  0xe7   : > { %v1079_v16 = vpop.f32.mrf.mxu2  ;;  %v4415_v60 = vmul.f32 %v4216_v51, %v1223_v8  ;;  %v1649_v43 = vmul.f32 %v4177_v21, %v4402_v39  ;;  %v3439_v8 = vld [vmem:[%s5186_s3 + $0x48] sm:$0xff]  ;;  %v1225_v18 = vmul.f32 %v4076_v30, %v1194_v26  ;;  %v4435_v20 = vmul.f32 %v4154_v63, %v4296_v37 }
  0xe8   : > { %v1080_v49 = vadd.f32 %v1079_v16, %v4191_v29  ;;  %v1118_v40 = vpop.f32.mrf.mxu3  ;;  %v4407_v52 = vsel %vm1155_vm14, %v1051_v45, %v1179_v1  ;;  %v1468_v33 = vadd.f32 %v4185_v27, %v1429_v6  ;;  %v4438_v1 = vmul.f32 %v4228_v34, %v1318_v7  ;;  %2066 = vmatpush.bf16.msra.mxu3 %v3439_v8  ;;  %v3424_v7 = vld [vmem:[%s5192_s9 + $0x50] sm:$0xff]  ;;  %v3438_v6 = vld [vmem:[%s5186_s3 + $0x40] sm:$0xff] }
  0xe9   : > { %v1013_v47 = vpop.f32.mrf.mxu0  ;;  %5271 = vst [vmem:[#allocation39_spill] sm:$0xff] %v4415_v60  ;;  %v1419_v14 = vmul.f32 %v4151_v62, %v4407_v52  ;;  %v4441_v16 = vperm.slane %v4109_v42, 1  ;;  %v1647_v60 = vmul.f32 %v4177_v21, %v4367_v13  ;;  %v1587_v27 = vadd.f32 %v4188_v28, %v1548_v56  ;;  %1875 = vmatpush.bf16.msrb.mxu1 %v3424_v7 }
  0xea   : > { %v1014_v45 = vadd.f32 %v1013_v47, %v4057_v12  ;;  %5272 = vst [vmem:[#allocation40_spill] sm:$0xff] %v4438_v1  ;;  %v1119_v0 = vadd.f32 %v1118_v40, %v1080_v49  ;;  %v1507_v12 = vadd.f32 %v4294_v31, %v1468_v33  ;;  %v1497_v47 = vmul.f32 %v4154_v63, %v4367_v13 }
  0xeb   : > { %v1052_v48 = vpop.f32.mrf.mxu1  ;;  %v1378_v37 = vmul.f32 %v4148_v59, %v4380_v36  ;;  %v1435_v26 = vadd.f32 %v1419_v14, %v1396_v53  ;;  %v4453_v42 = vmul.f32 %v4172_v17, %v4367_v13  ;;  %v4457_v49 = vmul.f32 %v4172_v17, %v4402_v39  ;;  %v3430_v53 = vld [vmem:[%s5186_s3] sm:$0xff] }
  0xec   : > { %v1053_v30 = vadd.f32 %v1052_v48, %v1014_v45  ;;  %v1244_v40 = vrot.slane %v1225_v18, 7  ;;  %v4460_v31 = vmul.f32 %v4216_v51, %v1225_v18  ;;  %v1384_v56 = vmul.f32 %v4148_v59, %v4407_v52  ;;  %2038 = vmatpush.bf16.msra.mxu2 %v3430_v53  ;;  %2067 = vmatpush.bf16.msra.mxu3 %v3438_v6 }
  0xed   : > { %v4474_v14 = vperm.slane %v4120_v46, 1  ;;  %v1172_v48 = vmul.f32 0.01, %v1119_v0  ;;  %v4478_v45 = vmul.f32 %v4228_v34, %v1225_v18  ;;  %vm1148_vm0 = vcmp.ge.f32.partialorder %v1119_v0, 0.0 }
  0xee   : > { %vm1157_vm15 = vcmp.ge.f32.partialorder %v1053_v30, 0.0  ;;  %v1181_v19 = vmul.f32 0.01, %v1053_v30  ;;  %v1546_v33 = vadd.f32 %v1530_v15, %v1507_v12  ;;  %v1626_v1 = vadd.f32 %v4300_v9, %v1587_v27 }
  0xef   : > { %v1081_v28 = vpop.f32.mrf.mxu2  ;;  %5273 = vst [vmem:[#allocation41_spill] sm:$0xff] %v4474_v14  ;;  %v1349_v51 = vmul.f32 %v4132_v54, %v4407_v52  ;;  %v1474_v17 = vadd.f32 %v4341_v3, %v1435_v26  ;;  %v1400_v12 = vadd.f32 %v1384_v56, %v4395_v61  ;;  %v4495_v27 = vsel %vm1148_vm0, %v1119_v0, %v1172_v48 }
  0xf0   : > { %v1082_v24 = vadd.f32 %v1081_v28, %v4191_v29  ;;  %v1120_v8 = vpop.f32.mrf.mxu3  ;;  %v4483_v46 = vsel %vm1157_vm15, %v1053_v30, %v1181_v19  ;;  %v4488_v28 = vmul.f32 %v4135_v55, %v4407_v52  ;;  %v1585_v15 = vadd.f32 %v4225_v11, %v1546_v33  ;;  %2039 = vmatmul.bf16.vlgmr.msra.gmra.mxu2 %v3970_v35 }
  0xf1   : > { %v1249_v18 = vrot.slane %v4483_v46, 7  ;;  %v1536_v9 = vmul.f32 %v4163_v5, %v4483_v46  ;;  %v1298_v30 = vrot.slane %v4407_v52, 1  ;;  %v1513_v7 = vadd.f32 %v1497_v47, %v1474_v17  ;;  %2068 = vmatmul.bf16.vlgmr.msra.gmra.mxu3 %v3981_v41 }
  0xf2   : > { %v1121_v14 = vadd.f32 %v1120_v8, %v1082_v24  ;;  %v1624_v26 = vadd.f32 %v4348_v10, %v1585_v15  ;;  %v1665_v53 = vadd.f32 %v1649_v43, %v1626_v1  ;;  %v1343_v11 = vmul.f32 %v4132_v54, %v4380_v36 }
  0xf3   : > { %v4500_v3 = vsel %vm1267_vm4, 0.0, %v1249_v18  ;;  %v1394_v61 = vadd.f32 %v1378_v37, %v4353_v23  ;;  %v1269_v17 = vsel %vm1267_vm4, 0.0, %v1244_v40  ;;  %v1552_v43 = vadd.f32 %v1536_v9, %v1513_v7 }
  0xf4   : > { %v1174_v6 = vmul.f32 0.01, %v1121_v14  ;;  %v1417_v0 = vmul.f32 %v4151_v62, %v4500_v3  ;;  %v1382_v35 = vmul.f32 %v4148_v59, %v4500_v3  ;;  %vm1150_vm2 = vcmp.ge.f32.partialorder %v1121_v14, 0.0 }
  0xf5   : > { %v1663_v10 = vadd.f32 %v1647_v60, %v1624_v26  ;;  %v1534_v36 = vmul.f32 %v4163_v5, %v4407_v52  ;;  %v1377_v62 = vmul.f32 %v4309_v57, %v4495_v27  ;;  %v1687_v59 = vadd.f32 %v4337_v2, %v1665_v53  ;;  %v3423_v60 = vld [vmem:[%s5192_s9 + $0x48] sm:$0xff] }
  0xf6   : > { %v1433_v56 = vadd.f32 %v1417_v0, %v1394_v61  ;;  %v1398_v23 = vadd.f32 %v1382_v35, %v1343_v11  ;;  %v4520_v40 = vsel %vm1316_vm1, %v1298_v30, 0.0  ;;  %v4525_v48 = vsel %vm1150_vm2, %v1121_v14, %v1174_v6  ;;  %1876 = vmatpush.bf16.msrb.mxu1 %v3423_v60  ;;  %v5274_v6 = vld [vmem:[#allocation35_spill] sm:$0xff]  ;;  %v3422_v60 = vld [vmem:[%s5192_s9 + $0x40] sm:$0xff] }
  0xf7   : > { %v1084_v47 = vpop.f32.mrf.mxu2  ;;  %v1685_v37 = vadd.f32 %v4337_v2, %v1663_v10  ;;  %v1439_v24 = vadd.f32 %v4204_v44, %v1400_v12  ;;  %v1591_v33 = vadd.f32 %v4376_v4, %v1552_v43  ;;  %v1462_v15 = vmul.f32 %v4135_v55, %v4367_v13  ;;  %v5275_v10 = vld [vmem:[#allocation15_spill] sm:$0xff] }
  0xf8   : > { %v1085_v41 = vadd.f32 %v1084_v47, %v4191_v29  ;;  %v1123_v1 = vpop.f32.mrf.mxu3  ;;  %v1472_v5 = vadd.f32 %v4290_v25, %v1433_v56  ;;  %v1437_v18 = vadd.f32 %v4286_v38, %v1398_v23  ;;  %v1499_v14 = vmul.f32 %v4154_v63, %v4407_v52 }
  0xf9   : > { %v1701_v8 = vpack.c.bf16 %v1687_v59, %v1685_v37  ;;  %v1336_v25 = vmul.f32 %v4213_v50, %v1269_v17  ;;  %v4538_v44 = vadd.f32 %v4197_v32, %v1349_v51  ;;  %v1501_v38 = vmul.f32 %v4154_v63, %v4483_v46 }
  0xfa   : > { %v1124_v19 = vadd.f32 %v1123_v1, %v1085_v41  ;;  %v1511_v30 = vadd.f32 %v4435_v20, %v1472_v5  ;;  %v1476_v4 = vadd.f32 %v4399_v58, %v1437_v18  ;;  %v1393_v12 = vadd.f32 %v1377_v62, %v4412_v22  ;;  %1877 = vmatpush.bf16.msrb.mxu1 %v3422_v60 }
  0xfb   : > { %1849 = vmatmul.bf16.vlgmr.msrb.gmra.mxu0 %v1701_v8  ;;  %v1653_v20 = vmul.f32 %v4177_v21, %v4520_v40  ;;  %v1246_v52 = vrot.slane %v4525_v48, 7  ;;  %v1630_v53 = vadd.f32 %v4457_v49, %v1591_v33  ;;  %v1478_v58 = vadd.f32 %v1462_v15, %v1439_v24  ;;  %v5276_v49 = vld [vmem:[#allocation32_spill] sm:$0xff]  ;;  %v5278_v24 = vld [vmem:[#allocation26_spill] sm:$0xff] }
  0xfc   : > { %vm1152_vm3 = vcmp.ge.f32.partialorder %v1124_v19, 0.0  ;;  %v1176_v9 = vmul.f32 0.01, %v1124_v19  ;;  %v1550_v26 = vadd.f32 %v1534_v36, %v1511_v30  ;;  %v1651_v61 = vmul.f32 %v4177_v21, %v4483_v46  ;;  %v5277_v36 = vld [vmem:[#allocation21_spill] sm:$0xff]  ;;  %v5281_v30 = vld [vmem:[#allocation12_spill] sm:$0xff] }
  0xfd   : > { %v1515_v0 = vadd.f32 %v1499_v14, %v1476_v4  ;;  %v1342_v35 = vmul.f32 %v4213_v50, %v4495_v27  ;;  %v1517_v47 = vadd.f32 %v1501_v38, %v1478_v58  ;;  %v1577_v43 = vmul.f32 %v5275_v10, %v4367_v13  ;;  %v5282_v14 = vld [vmem:[#allocation22_spill] sm:$0xff] }
  0xfe   : > { %v4544_v7 = vsel %vm1152_vm3, %v1124_v19, %v1176_v9  ;;  %v1589_v22 = vadd.f32 %v5274_v6, %v1550_v26  ;;  %v4562_v41 = vmul.f32 %v5276_v49, %v4495_v27  ;;  %v1271_v62 = vsel %vm1267_vm4, 0.0, %v1246_v52 }
  0xff   : > { %v1416_v32 = vmul.f32 %v4441_v16, %v4544_v7  ;;  %v1086_v51 = vpop.f32.mrf.mxu2  ;;  %v1554_v23 = vadd.f32 %v5277_v36, %v1515_v0  ;;  %v1669_v37 = vadd.f32 %v1653_v20, %v1630_v53  ;;  %v1579_v59 = vmul.f32 %v5275_v10, %v4402_v39  ;;  %v5280_v39 = vld [vmem:[#allocation18_spill] sm:$0xff] }
 0x100   : > { %v1087_v11 = vadd.f32 %v1086_v51, %v4191_v29  ;;  %v1125_v63 = vpop.f32.mrf.mxu3  ;;  %v1628_v56 = vadd.f32 %v4453_v42, %v1589_v22  ;;  %v1556_v8 = vadd.f32 %v5278_v24, %v1517_v47  ;;  %v5279_v42 = vld [vmem:[#allocation11_spill] sm:$0xff]  ;;  %v1295_v33 = vrot.slane %v4495_v27, 1  ;;  %v5283_v51 = vld [vmem:[#allocation41_spill] sm:$0xff] }
 0x101   : > { %v1432_v17 = vadd.f32 %v1416_v32, %v1393_v12  ;;  %2044 = vmatmul.bf16.gmra.mxu2 %v5279_v42  ;;  %v1494_v18 = vmul.f32 %v5276_v49, %v4525_v48  ;;  %v1593_v15 = vadd.f32 %v1577_v43, %v1554_v23  ;;  %v1616_v9 = vmul.f32 %v5280_v39, %v4483_v46 }
 0x102   : > { %v1126_v1 = vadd.f32 %v1125_v63, %v1087_v11  ;;  %v1667_v5 = vadd.f32 %v1651_v61, %v1628_v56  ;;  %2073 = vmatmul.bf16.gmra.mxu3 %v5281_v30  ;;  %v4584_v4 = vmul.f32 %v5282_v14, %v4525_v48  ;;  %v1691_v52 = vadd.f32 %v4337_v2, %v1669_v37 }
 0x103   : > { %v1471_v13 = vadd.f32 %v4460_v31, %v1432_v17  ;;  %v1375_v31 = vmul.f32 %v4309_v57, %v1271_v62  ;;  %v4594_v58 = vmul.f32 %v4213_v50, %v1271_v62  ;;  %v1595_v6 = vadd.f32 %v1579_v59, %v1556_v8  ;;  %v5284_v59 = vld [vmem:[#allocation16_spill] sm:$0xff] }
 0x104   : > { %vm1154_vm5 = vcmp.ge.f32.partialorder %v1126_v1, 0.0  ;;  %v1178_v19 = vmul.f32 0.01, %v1126_v1  ;;  %v1689_v12 = vadd.f32 %v4337_v2, %v1667_v5  ;;  %v1618_v22 = vmul.f32 %v5280_v39, %v4520_v40  ;;  %v5285_v5 = vld [vmem:[#allocation27_spill] sm:$0xff]  ;;  %v5286_v8 = vld [vmem:[#allocation40_spill] sm:$0xff] }
 0x105   : > { %v1510_v32 = vadd.f32 %v1494_v18, %v1471_v13  ;;  %v1632_v17 = vadd.f32 %v1616_v9, %v1593_v15  ;;  %v1391_v43 = vadd.f32 %v1375_v31, %v1336_v25  ;;  %v4608_v23 = vmul.f32 %v4213_v50, %v4544_v7  ;;  %v5287_v15 = vld [vmem:[#allocation33_spill] sm:$0xff]  ;;  %v5288_v9 = vld [vmem:[#allocation39_spill] sm:$0xff] }
 0x106   : > { %v4586_v38 = vsel %vm1154_vm5, %v1126_v1, %v1178_v19  ;;  %v1703_v0 = vpack.c.bf16 %v1691_v52, %v1689_v12  ;;  %v1381_v1 = vmul.f32 %v4309_v57, %v4544_v7  ;;  %v1297_v62 = vrot.slane %v4544_v7, 1 }
 0x107   : > { %v1248_v26 = vrot.slane %v4586_v38, 7  ;;  %v1089_v20 = vpop.f32.mrf.mxu2  ;;  %v1533_v53 = vmul.f32 %v5283_v51, %v4586_v38  ;;  %v4612_v37 = vsel %vm1316_vm1, %v1295_v33, 0.0  ;;  %v4615_v60 = vperm.slane %v5284_v59, 1 }
 0x108   : > { %v1090_v11 = vadd.f32 %v1089_v20, %v4191_v29  ;;  %v1128_v63 = vpop.f32.mrf.mxu3  ;;  %v1634_v13 = vadd.f32 %v1618_v22, %v1595_v6  ;;  %v1671_v24 = vadd.f32 %v5285_v5, %v1632_v17  ;;  %v1347_v18 = vmul.f32 %v4132_v54, %v4500_v3  ;;  %v5289_v3 = vld [vmem:[#allocation17_spill] sm:$0xff]  ;;  %v5291_v6 = vld [vmem:[#allocation23_spill] sm:$0xff] }
 0x109   : > { %v4600_v61 = vsel %vm1267_vm4, 0.0, %v1248_v26  ;;  %v1549_v47 = vadd.f32 %v1533_v53, %v1510_v32  ;;  %v1443_v39 = vadd.f32 %v5287_v15, %v4538_v44  ;;  %v1397_v33 = vadd.f32 %v1381_v1, %v1342_v35 }
 0x10a   : > { %v1414_v56 = vmul.f32 %v4441_v16, %v4600_v61  ;;  %v1129_v36 = vadd.f32 %v1128_v63, %v1090_v11  ;;  %v1531_v31 = vmul.f32 %v5283_v51, %v4544_v7  ;;  %v1466_v12 = vmul.f32 %v4135_v55, %v4483_v46  ;;  %v5290_v11 = vld [vmem:[#allocation29_spill] sm:$0xff] }
 0x10b   : > { %1854 = vmatmul.bf16.gmra.mxu0 %v1703_v0  ;;  %v1588_v42 = vadd.f32 %v5286_v8, %v1549_v47  ;;  %v4631_v52 = vsel %vm1316_vm1, %v1297_v62, 0.0  ;;  %v1611_v54 = vmul.f32 %v4615_v60, %v4612_v37  ;;  %v4636_v44 = vperm.slane %v5289_v3, 1 }
 0x10c   : > { %vm1156_vm6 = vcmp.ge.f32.partialorder %v1129_v36, 0.0  ;;  %v1180_v25 = vmul.f32 0.01, %v1129_v36  ;;  %v1430_v19 = vadd.f32 %v1414_v56, %v1391_v43  ;;  %v1609_v55 = vmul.f32 %v4615_v60, %v4525_v48 }
 0x10d   : > { %v1402_v63 = vadd.f32 %v5290_v11, %v1347_v18  ;;  %v1673_v22 = vadd.f32 %v5291_v6, %v1634_v13  ;;  %v1693_v0 = vadd.f32 %v4337_v2, %v1671_v24  ;;  %v1627_v17 = vadd.f32 %v1611_v54, %v1588_v42  ;;  %v5294_v42 = vld [vmem:[#allocation13_spill] sm:$0xff]  ;;  %v5298_v54 = vld [vmem:[#allocation20_spill] sm:$0xff] }
 0x10e   : > { %v1469_v30 = vadd.f32 %v5288_v9, %v1430_v19  ;;  %v4628_v26 = vsel %vm1156_vm6, %v1129_v36, %v1180_v25  ;;  %v1482_v47 = vadd.f32 %v1466_v12, %v1443_v39  ;;  %v5292_v36 = vld [vmem:[#allocation38_spill] sm:$0xff]  ;;  %v1650_v59 = vmul.f32 %v4636_v44, %v4631_v52  ;;  %v5293_v25 = vld [vmem:[#allocation25_spill] sm:$0xff]  ;;  %v5295_v39 = vld [vmem:[#allocation31_spill] sm:$0xff] }
 0x10f   : > { %v1091_v20 = vpop.f32.mrf.mxu2  ;;  %v1420_v43 = vmul.f32 %v4441_v16, %v4628_v26  ;;  %v1441_v62 = vadd.f32 %v5292_v36, %v1402_v63  ;;  %v1583_v13 = vmul.f32 %v5275_v10, %v4520_v40  ;;  %v1695_v18 = vadd.f32 %v4337_v2, %v1673_v22  ;;  %v5297_v12 = vld [vmem:[#allocation14_spill] sm:$0xff] }
 0x110   : > { %v1092_v35 = vadd.f32 %v1091_v20, %v4191_v29  ;;  %v1130_v32 = vpop.f32.mrf.mxu3  ;;  %v1508_v53 = vadd.f32 %v4562_v41, %v1469_v30  ;;  %v1648_v41 = vmul.f32 %v4636_v44, %v4586_v38  ;;  %v1521_v19 = vadd.f32 %v5293_v25, %v1482_v47  ;;  %v5296_v30 = vld [vmem:[#allocation37_spill] sm:$0xff]  ;;  %v5299_v47 = vld [vmem:[#allocation34_spill] sm:$0xff] }
 0x111   : > { %v1480_v8 = vadd.f32 %v4488_v28, %v1441_v62  ;;  %2049 = vmatmul.bf16.gmra.mxu2 %v5294_v42  ;;  %v1666_v15 = vadd.f32 %v1650_v59, %v1627_v17  ;;  %v4660_v9 = vperm.slane %v5295_v39, 1  ;;  %v1379_v11 = vmul.f32 %v4309_v57, %v4600_v61 }
 0x112   : > { %v1131_v1 = vadd.f32 %v1130_v32, %v1092_v35  ;;  %v1547_v56 = vadd.f32 %v1531_v31, %v1508_v53  ;;  %v1560_v31 = vadd.f32 %v5296_v30, %v1521_v19  ;;  %2078 = vmatmul.bf16.gmra.mxu3 %v5297_v12  ;;  %v1581_v32 = vmul.f32 %v5275_v10, %v4483_v46  ;;  %v5301_v46 = vld [vmem:[#allocation36_spill] sm:$0xff] }
 0x113   : > { %v1519_v3 = vadd.f32 %v5298_v54, %v1480_v8  ;;  %v1705_v22 = vpack.c.bf16 %v1695_v18, %v1693_v0  ;;  %v1661_v10 = vmul.f32 %v4177_v21, %v5301_v46  ;;  %v1688_v59 = vadd.f32 %v4660_v9, %v1666_v15 }
 0x114   : > { %vm1158_vm7 = vcmp.ge.f32.partialorder %v1131_v1, 0.0  ;;  %v1182_v5 = vmul.f32 0.01, %v1131_v1  ;;  %v1586_v24 = vadd.f32 %v4478_v45, %v1547_v56  ;;  %v1436_v45 = vadd.f32 %v1420_v43, %v1397_v33  ;;  %v5300_v43 = vld [vmem:[#allocation24_spill] sm:$0xff] }
 0x115   : > { %v1599_v53 = vadd.f32 %v1583_v13, %v1560_v31  ;;  %v1385_v33 = vmul.f32 %v4309_v57, %v4628_v26  ;;  %v1395_v19 = vadd.f32 %v1379_v11, %v4594_v58  ;;  %v1498_v8 = vmul.f32 %v5276_v49, %v4586_v38  ;;  %v5303_v58 = vld [vmem:[#allocation30_spill] sm:$0xff] }
 0x116   : > { %v4664_v20 = vsel %vm1158_vm7, %v1131_v1, %v1182_v5  ;;  %v1625_v40 = vadd.f32 %v1609_v55, %v1586_v24  ;;  %v1558_v55 = vadd.f32 %v5299_v47, %v1519_v3  ;;  %v1475_v0 = vadd.f32 %v4584_v4, %v1436_v45  ;;  %v5302_v4 = vld [vmem:[#allocation28_spill] sm:$0xff] }
 0x117   : > { %v1250_v28 = vrot.slane %v4664_v20, 7  ;;  %v1094_v35 = vpop.f32.mrf.mxu2  ;;  %v1638_v56 = vadd.f32 %v5300_v43, %v1599_v53  ;;  %v1457_v42 = vmul.f32 %v5282_v14, %v4495_v27  ;;  %v1401_v18 = vadd.f32 %v1385_v33, %v4608_v23 }
 0x118   : > { %v1095_v63 = vadd.f32 %v1094_v35, %v4191_v29  ;;  %v1133_v6 = vpop.f32.mrf.mxu3  ;;  %v1664_v17 = vadd.f32 %v1648_v41, %v1625_v40  ;;  %v1597_v41 = vadd.f32 %v1581_v32, %v1558_v55  ;;  %v1659_v31 = vmul.f32 %v4177_v21, %v5303_v58 }
 0x119   : > { %v4675_v1 = vsel %vm1267_vm4, 0.0, %v1250_v28  ;;  %v1677_v25 = vadd.f32 %v1661_v10, %v1638_v56  ;;  %v1514_v12 = vadd.f32 %v1498_v8, %v1475_v0  ;;  %v1537_v40 = vmul.f32 %v5283_v51, %v4664_v20  ;;  %v5305_v0 = vld [vmem:[#allocation10_spill] sm:$0xff] }
 0x11a   : > { %v1134_v36 = vadd.f32 %v1133_v6, %v1095_v63  ;;  %v1686_v62 = vadd.f32 %v4660_v9, %v1664_v17  ;;  %v1418_v13 = vmul.f32 %v4441_v16, %v4675_v1  ;;  %v1636_v15 = vadd.f32 %v5302_v4, %v1597_v41 }
 0x11b   : > { %1859 = vmatmul.bf16.gmra.mxu0 %v1705_v22  ;;  %v1299_v23 = vrot.slane %v4628_v26, 1  ;;  %v1496_v3 = vmul.f32 %v5276_v49, %v4544_v7  ;;  %v1576_v45 = vmul.f32 %v4228_v34, %v4612_v37  ;;  %v1553_v53 = vadd.f32 %v1537_v40, %v1514_v12 }
 0x11c   : > { %vm1160_vm8 = vcmp.ge.f32.partialorder %v1134_v36, 0.0  ;;  %v1184_v5 = vmul.f32 0.01, %v1134_v36  ;;  %v1702_v24 = vpack.c.bf16 %v1688_v59, %v1686_v62  ;;  %v1434_v39 = vadd.f32 %v1418_v13, %v1395_v19  ;;  %v5304_v62 = vld [vmem:[#allocation9_spill] sm:$0xff] }
 0x11d   : > { %v1675_v21 = vadd.f32 %v1659_v31, %v1636_v15  ;;  %v1699_v63 = vadd.f32 %v4337_v2, %v1677_v25  ;;  %v1535_v6 = vmul.f32 %v5283_v51, %v4628_v26  ;;  %v1592_v55 = vadd.f32 %v1576_v45, %v1553_v53 }
 0x11e   : > { %v4694_v30 = vsel %vm1160_vm8, %v1134_v36, %v1184_v5  ;;  %1878 = vmatmul.bf16.vlgmr.msrb.gmra.mxu1 %v1702_v24  ;;  %v1473_v32 = vadd.f32 %v1457_v42, %v1434_v39  ;;  %v1463_v37 = vmul.f32 %v5282_v14, %v4586_v38  ;;  %v4715_v33 = vsel %vm1316_vm1, %v1299_v23, 0.0 }
 0x11f   : > { %v1424_v54 = vmul.f32 %v4441_v16, %v4694_v30  ;;  %v1096_v27 = vpop.f32.mrf.mxu2  ;;  %v1697_v17 = vadd.f32 %v4337_v2, %v1675_v21  ;;  %v1574_v43 = vmul.f32 %v4228_v34, %v4525_v48  ;;  %v1615_v56 = vmul.f32 %v4615_v60, %v4631_v52 }
 0x120   : > { %v1097_v28 = vadd.f32 %v1096_v27, %v4191_v29  ;;  %v1135_v35 = vpop.f32.mrf.mxu3  ;;  %v1512_v47 = vadd.f32 %v1496_v3, %v1473_v32  ;;  %v1383_v25 = vmul.f32 %v4309_v57, %v4675_v1  ;;  %v1613_v48 = vmul.f32 %v4615_v60, %v4586_v38 }
 0x121   : > { %v1440_v11 = vadd.f32 %v1424_v54, %v1401_v18  ;;  %v1707_v10 = vpack.c.bf16 %v1699_v63, %v1697_v17  ;;  %2054 = vmatmul.bf16.gmra.mxu2 %v5304_v62  ;;  %v1631_v59 = vadd.f32 %v1615_v56, %v1592_v55  ;;  %v1654_v8 = vmul.f32 %v4636_v44, %v4715_v33 }
 0x122   : > { %v1136_v22 = vadd.f32 %v1135_v35, %v1097_v28  ;;  %v1551_v36 = vadd.f32 %v1535_v6, %v1512_v47  ;;  %2083 = vmatmul.bf16.gmra.mxu3 %v5305_v0  ;;  %v1502_v42 = vmul.f32 %v5276_v49, %v4664_v20  ;;  %v1344_v18 = vmul.f32 %v4213_v50, %v4600_v61  ;;  %v5306_v47 = vld [vmem:[#allocation19_spill] sm:$0xff] }
 0x123   : > { %v1479_v2 = vadd.f32 %v1463_v37, %v1440_v11  ;;  %v1652_v58 = vmul.f32 %v4636_v44, %v4664_v20  ;;  %v1670_v12 = vadd.f32 %v1654_v8, %v1631_v59  ;;  %v1461_v61 = vmul.f32 %v5282_v14, %v4544_v7  ;;  %v3292_v8 = vld [vmem:[%s5196_s13 + $0x78] sm:$0xf0] }
 0x124   : > { %vm1162_vm9 = vcmp.ge.f32.partialorder %v1136_v22, 0.0  ;;  %v1186_v46 = vmul.f32 0.01, %v1136_v22  ;;  %v1590_v19 = vadd.f32 %v1574_v43, %v1551_v36  ;;  %v1399_v54 = vadd.f32 %v1383_v25, %v1344_v18  ;;  %v3290_v25 = vld [vmem:[%s5196_s13 + $0x70] sm:$0xf] }
 0x125   : > { %v1518_v40 = vadd.f32 %v1502_v42, %v1479_v2  ;;  %v1389_v28 = vmul.f32 %v4309_v57, %v4694_v30  ;;  %v1692_v53 = vadd.f32 %v4660_v9, %v1670_v12  ;;  %v1301_v11 = vrot.slane %v4694_v30, 1  ;;  %v3226_v42 = vld [vmem:[%s5194_s11 + $0x70] sm:$0xf] }
 0x126   : > { %v4723_v41 = vsel %vm1162_vm9, %v1136_v22, %v1186_v46  ;;  %v1629_v39 = vadd.f32 %v1613_v48, %v1590_v19  ;;  %v1580_v63 = vmul.f32 %v4228_v34, %v4631_v52  ;;  %v1500_v7 = vmul.f32 %v5276_v49, %v4628_v26 }
 0x127   : > { %v1252_v13 = vrot.slane %v4723_v41, 7  ;;  %v1541_v5 = vmul.f32 %v5283_v51, %v4723_v41  ;;  %v1099_v24 = vpop.f32.mrf.mxu2  ;;  %v1350_v17 = vmul.f32 %v4213_v50, %v4628_v26  ;;  %v1539_v46 = vmul.f32 %v5283_v51, %v4694_v30 }
 0x128   : > { %v1100_v4 = vadd.f32 %v1099_v24, %v4191_v29  ;;  %v1138_v15 = vpop.f32.mrf.mxu3  ;;  %v1668_v3 = vadd.f32 %v1652_v58, %v1629_v39  ;;  %v1326_v59 = vsel %vm1316_vm1, %v1301_v11, 0.0  ;;  %v1619_v0 = vmul.f32 %v4615_v60, %v4715_v33  ;;  %v3476_v24 = vld [vmem:[%s5196_s13 + $0x74] sm:$0xf]  ;;  %v3282_v58 = vld [vmem:[%s5196_s13 + $0x60] sm:$0xf] }
 0x129   : > { %v4742_v31 = vsel %vm1267_vm4, 0.0, %v1252_v13  ;;  %v1557_v45 = vadd.f32 %v1541_v5, %v1518_v40  ;;  %v1405_v36 = vadd.f32 %v1389_v28, %v1350_v17  ;;  %v1578_v13 = vmul.f32 %v4228_v34, %v4586_v38  ;;  %v3461_v38 = vld [vmem:[%s5194_s11 + $0x74] sm:$0xf0] }
 0x12a   : > { %v1422_v27 = vmul.f32 %v4441_v16, %v4742_v31  ;;  %v1139_v23 = vadd.f32 %v1138_v15, %v1100_v4  ;;  %v1690_v32 = vadd.f32 %v4660_v9, %v1668_v3  ;;  %v1467_v4 = vmul.f32 %v5282_v14, %v4664_v20 }
 0x12b   : > { %1864 = vmatmul.bf16.gmra.mxu0 %v1707_v10  ;;  %v1596_v56 = vadd.f32 %v1580_v63, %v1557_v45  ;;  %v3295_v39 = vor.u32 %v3476_v24, %v3292_v8  ;;  %v3227_v3 = vor.u32 %v3461_v38, %v3226_v42  ;;  %v1387_v11 = vmul.f32 %v4309_v57, %v4742_v31  ;;  %v3459_v42 = vld [vmem:[%s5194_s11 + $0x64] sm:$0xf0] }
 0x12c   : > { %v1438_v35 = vadd.f32 %v1422_v27, %v1399_v54  ;;  %vm1164_vm10 = vcmp.ge.f32.partialorder %v1139_v23, 0.0  ;;  %v1188_v21 = vmul.f32 0.01, %v1139_v23  ;;  %v1704_v37 = vpack.c.bf16 %v1692_v53, %v1690_v32  ;;  %v3475_v27 = vld [vmem:[%s5196_s13 + $0x64] sm:$0xf0] }
 0x12d   : > { %v1635_v15 = vadd.f32 %v1619_v0, %v1596_v56  ;;  %v1617_v54 = vmul.f32 %v4615_v60, %v4664_v20  ;;  %2392 = vmatpush.bf16.msrb.mxu3 %v3295_v39  ;;  %2203 = vmatpush.bf16.msra.mxu0 %v3227_v3  ;;  %v1506_v63 = vmul.f32 %v5276_v49, %v4723_v41  ;;  %v3473_v39 = vld [vmem:[%s5196_s13 + $0x54] sm:$0xf0] }
 0x12e   : > { %v1212_v6 = vsel %vm1164_vm10, %v1139_v23, %v1188_v21  ;;  %v1477_v22 = vadd.f32 %v1461_v61, %v1438_v35  ;;  %1883 = vmatmul.bf16.gmra.mxu1 %v1704_v37  ;;  %v1658_v23 = vmul.f32 %v4636_v44, %v1326_v59  ;;  %v3283_v61 = vor.u32 %v3475_v27, %v3282_v58  ;;  %v3458_v58 = vld [vmem:[%s5194_s11 + $0x64] sm:$0xf]  ;;  %v3276_v27 = vld [vmem:[%s5196_s13 + $0x58] sm:$0xf0]  ;;  %v3457_v3 = vld [vmem:[%s5194_s11 + $0x54] sm:$0xf0] }
 0x12f   : > { %v4760_v55 = vmul.f32 %v5306_v47, %v1212_v6  ;;  %v1101_v43 = vpop.f32.mrf.mxu2  ;;  %v1656_v21 = vmul.f32 %v4636_v44, %v4723_v41  ;;  %v1348_v17 = vmul.f32 %v4213_v50, %v4675_v1  ;;  %v1504_v1 = vmul.f32 %v5276_v49, %v4694_v30 }
 0x130   : > { %v1102_v10 = vadd.f32 %v1101_v43, %v4191_v29  ;;  %v1516_v52 = vadd.f32 %v1500_v7, %v1477_v22  ;;  %v1140_v2 = vpop.f32.mrf.mxu3  ;;  %v3477_v29 = vld [vmem:[%s5196_s13 + $0x74] sm:$0xf0]  ;;  %v1674_v53 = vadd.f32 %v1658_v23, %v1635_v15  ;;  %v1621_v49 = vmul.f32 %v4615_v60, %v4723_v41  ;;  %v3284_v41 = vld [vmem:[%s5196_s13 + $0x68] sm:$0xf0]  ;;  %v3274_v15 = vld [vmem:[%s5196_s13 + $0x50] sm:$0xf] }
 0x131   : > { %v1428_v62 = vmul.f32 %v4441_v16, %v4760_v55  ;;  %v3291_v5 = vor.u32 %v3477_v29, %v3290_v25  ;;  %v1303_v50 = vrot.slane %v4760_v55, 1  ;;  %v1623_v29 = vmul.f32 %v4615_v60, %v1326_v59  ;;  %v3228_v60 = vld [vmem:[%s5194_s11 + $0x78] sm:$0xf0]  ;;  %v3210_v23 = vld [vmem:[%s5194_s11 + $0x50] sm:$0xf] }
 0x132   : > { %v1141_v19 = vadd.f32 %v1140_v2, %v1102_v10  ;;  %v1555_v48 = vadd.f32 %v1539_v46, %v1516_v52  ;;  %v1696_v56 = vadd.f32 %v4660_v9, %v1674_v53  ;;  %v1403_v46 = vadd.f32 %v1387_v11, %v1348_v17  ;;  %v3212_v53 = vld [vmem:[%s5194_s11 + $0x58] sm:$0xf0]  ;;  %v3470_v11 = vld [vmem:[%s5196_s13 + $0x44] sm:$0xf] }
 0x133   : > { %v1444_v18 = vadd.f32 %v1428_v62, %v1405_v36  ;;  %2363 = vmatpush.bf16.msrb.mxu2 %v3291_v5  ;;  %v1465_v52 = vmul.f32 %v5282_v14, %v4628_v26  ;;  %v1584_v62 = vmul.f32 %v4228_v34, %v4715_v33  ;;  %v1328_v14 = vsel %vm1316_vm1, %v1303_v50, 0.0  ;;  %v3453_v50 = vld [vmem:[%s5194_s11 + $0x34] sm:$0xf0] }
 0x134   : > { %vm1166_vm11 = vcmp.ge.f32.partialorder %v1141_v19, 0.0  ;;  %v1190_v12 = vmul.f32 0.01, %v1141_v19  ;;  %v1594_v40 = vadd.f32 %v1578_v13, %v1555_v48  ;;  %v1582_v33 = vmul.f32 %v4228_v34, %v4664_v20  ;;  %v3460_v34 = vld [vmem:[%s5194_s11 + $0x74] sm:$0xf] }
 0x135   : > { %v1483_v45 = vadd.f32 %v1467_v4, %v1444_v18  ;;  %v1662_v30 = vmul.f32 %v4636_v44, %v1328_v14  ;;  %v3231_v20 = vor.u32 %v3460_v34, %v3228_v60  ;;  %v3275_v38 = vor.u32 %v3473_v39, %v3274_v15  ;;  %v3466_v14 = vld [vmem:[%s5196_s13 + $0x24] sm:$0xf]  ;;  %v3244_v34 = vld [vmem:[%s5196_s13 + $0x18] sm:$0xf0] }
 0x136   : > { %v1214_v28 = vsel %vm1166_vm11, %v1141_v19, %v1190_v12  ;;  %v1633_v35 = vadd.f32 %v1617_v54, %v1594_v40  ;;  %v3220_v12 = vld [vmem:[%s5194_s11 + $0x68] sm:$0xf0]  ;;  %v3472_v40 = vld [vmem:[%s5196_s13 + $0x54] sm:$0xf] }
 0x137   : > { %v1230_v32 = vmul.f32 %v5306_v47, %v1214_v28  ;;  %2364 = vmatpush.bf16.msrb.mxu2 %v3283_v61  ;;  %v1522_v43 = vadd.f32 %v1506_v63, %v1483_v45  ;;  %2232 = vmatpush.bf16.msra.mxu1 %v3231_v20  ;;  %v3223_v54 = vor.u32 %v3458_v58, %v3220_v12  ;;  %v3266_v28 = vld [vmem:[%s5196_s13 + $0x40] sm:$0xf]  ;;  %v3449_v20 = vld [vmem:[%s5194_s11 + $0x14] sm:$0xf0]  ;;  %v3462_v58 = vld [vmem:[%s5196_s13 + $0x4] sm:$0xf] }
 0x138   : > { %v1672_v6 = vadd.f32 %v1656_v21, %v1633_v35  ;;  %v3279_v61 = vor.u32 %v3472_v40, %v3276_v27  ;;  %v3211_v45 = vor.u32 %v3457_v3, %v3210_v23  ;;  %v3471_v35 = vld [vmem:[%s5196_s13 + $0x44] sm:$0xf0]  ;;  %v3236_v12 = vld [vmem:[%s5196_s13 + $0x8] sm:$0xf0]  ;;  %v3170_v40 = vld [vmem:[%s5194_s11] sm:$0xf] }
 0x139   : > { %v1254_v22 = vrot.slane %v1230_v32, 7  ;;  %v1545_v7 = vmul.f32 %v5283_v51, %v1230_v32  ;;  %v1660_v5 = vmul.f32 %v4636_v44, %v1230_v32  ;;  %v3474_v44 = vld [vmem:[%s5196_s13 + $0x64] sm:$0xf]  ;;  %v3267_v21 = vor.u32 %v3471_v35, %v3266_v28  ;;  %v3456_v32 = vld [vmem:[%s5194_s11 + $0x54] sm:$0xf] }
 0x13a   : > { %v1694_v37 = vadd.f32 %v4660_v9, %v1672_v6  ;;  %v3287_v18 = vor.u32 %v3474_v44, %v3284_v41  ;;  %v3215_v63 = vor.u32 %v3456_v32, %v3212_v53  ;;  %v3268_v6 = vld [vmem:[%s5196_s13 + $0x48] sm:$0xf0]  ;;  %v3178_v44 = vld [vmem:[%s5194_s11 + $0x10] sm:$0xf]  ;;  %v3448_v41 = vld [vmem:[%s5194_s11 + $0x14] sm:$0xf]  ;;  %v3239_v27 = vor.u32 %v3462_v58, %v3236_v12 }
 0x13b   : > { %v1279_v47 = vsel %vm1267_vm4, 0.0, %v1254_v22  ;;  %v1561_v31 = vadd.f32 %v1545_v7, %v1522_v43  ;;  %2365 = vmatpush.bf16.msrb.mxu2 %v3275_v38  ;;  %2233 = vmatpush.bf16.msra.mxu1 %v3223_v54  ;;  %v3202_v22 = vld [vmem:[%s5194_s11 + $0x40] sm:$0xf]  ;;  %v3455_v7 = vld [vmem:[%s5194_s11 + $0x44] sm:$0xf0]  ;;  %v3271_v17 = vor.u32 %v3470_v11, %v3268_v6 }
 0x13c   : > { %v1426_v57 = vmul.f32 %v4441_v16, %v1279_v47  ;;  %v1706_v10 = vpack.c.bf16 %v1696_v56, %v1694_v37  ;;  %v1543_v16 = vmul.f32 %v5283_v51, %v4760_v55  ;;  %2393 = vmatpush.bf16.msrb.mxu3 %v3287_v18  ;;  %v3203_v37 = vor.u32 %v3455_v7, %v3202_v22  ;;  %v3258_v43 = vld [vmem:[%s5196_s13 + $0x30] sm:$0xf]  ;;  %v3469_v47 = vld [vmem:[%s5196_s13 + $0x34] sm:$0xf0]  ;;  %v3234_v18 = vld [vmem:[%s5196_s13] sm:$0xf] }
 0x13d   : > { %v1600_v0 = vadd.f32 %v1584_v62, %v1561_v31  ;;  %v3259_v56 = vor.u32 %v3469_v47, %v3258_v43  ;;  %v3468_v31 = vld [vmem:[%s5196_s13 + $0x34] sm:$0xf]  ;;  %v3447_v23 = vld [vmem:[%s5194_s11 + $0x4] sm:$0xf0]  ;;  %v3446_v3 = vld [vmem:[%s5194_s11 + $0x4] sm:$0xf] }
 0x13e   : > { %v1442_v36 = vadd.f32 %v1426_v57, %v1403_v46  ;;  %1888 = vmatmul.bf16.gmra.mxu1 %v1706_v10  ;;  %v3454_v46 = vld [vmem:[%s5194_s11 + $0x44] sm:$0xf]  ;;  %v3204_v57 = vld [vmem:[%s5194_s11 + $0x48] sm:$0xf0]  ;;  %v5005_v11 = vld [vmem:[%s5187_s4] ss:$0 sm:$0xff] }
 0x13f   : > { %v1639_v19 = vadd.f32 %v1623_v29, %v1600_v0  ;;  %2366 = vmatpush.bf16.msrb.mxu2 %v3267_v21  ;;  %2234 = vmatpush.bf16.msra.mxu1 %v3215_v63  ;;  %v3207_v10 = vor.u32 %v3454_v46, %v3204_v57  ;;  %v3196_v29 = vld [vmem:[%s5194_s11 + $0x38] sm:$0xf0]  ;;  %v5010_v6 = vld [vmem:[%s5193_s10] ss:$0 sm:$0xff] }
 0x140   : > { %v1481_v2 = vadd.f32 %v1465_v52, %v1442_v36  ;;  %2394 = vmatpush.bf16.msrb.mxu3 %v3279_v61  ;;  %v3260_v52 = vld [vmem:[%s5196_s13 + $0x38] sm:$0xf0]  ;;  %v3194_v36 = vld [vmem:[%s5194_s11 + $0x30] sm:$0xf]  ;;  %v3172_v61 = vld [vmem:[%s5194_s11 + $0x8] sm:$0xf0] }
 0x141   : > { %v1678_v51 = vadd.f32 %v1662_v30, %v1639_v19  ;;  %v3263_v62 = vor.u32 %v3468_v31, %v3260_v52  ;;  %v3195_v0 = vor.u32 %v3453_v50, %v3194_v36  ;;  %v3242_v30 = vld [vmem:[%s5196_s13 + $0x10] sm:$0xf]  ;;  %v3175_v28 = vor.u32 %v3446_v3, %v3172_v61 }
 0x142   : > { %v1520_v25 = vadd.f32 %v1504_v1, %v1481_v2  ;;  %v3250_v1 = vld [vmem:[%s5196_s13 + $0x20] sm:$0xf]  ;;  %v3467_v2 = vld [vmem:[%s5196_s13 + $0x24] sm:$0xf0] }
 0x143   : > { %v1700_v24 = vadd.f32 %v4660_v9, %v1678_v51  ;;  %2367 = vmatpush.bf16.msrb.mxu2 %v3259_v56  ;;  %2235 = vmatpush.bf16.msra.mxu1 %v3207_v10 }
 0x144   : > { %v1559_v26 = vadd.f32 %v1543_v16, %v1520_v25  ;;  %2395 = vmatpush.bf16.msrb.mxu3 %v3271_v17  ;;  %v3251_v16 = vor.u32 %v3467_v2, %v3250_v1  ;;  %v3452_v25 = vld [vmem:[%s5194_s11 + $0x34] sm:$0xf] }
 0x146   : > { %v1598_v48 = vadd.f32 %v1582_v33, %v1559_v26  ;;  %v3199_v26 = vor.u32 %v3452_v25, %v3196_v29  ;;  %v3252_v33 = vld [vmem:[%s5196_s13 + $0x28] sm:$0xf0] }
 0x147   : > { %2368 = vmatpush.bf16.msrb.mxu2 %v3251_v16  ;;  %v3255_v19 = vor.u32 %v3466_v14, %v3252_v33 }
 0x148   : > { %v1637_v13 = vadd.f32 %v1621_v49, %v1598_v48  ;;  %2396 = vmatpush.bf16.msrb.mxu3 %v3263_v62  ;;  %2236 = vmatpush.bf16.msra.mxu1 %v3199_v26  ;;  %v3186_v48 = vld [vmem:[%s5194_s11 + $0x20] sm:$0xf]  ;;  %v3451_v49 = vld [vmem:[%s5194_s11 + $0x24] sm:$0xf0] }
 0x14a   : > { %v1676_v55 = vadd.f32 %v1660_v5, %v1637_v13  ;;  %v3187_v13 = vor.u32 %v3451_v49, %v3186_v48  ;;  %v3465_v5 = vld [vmem:[%s5196_s13 + $0x14] sm:$0xf0] }
 0x14b   : > { %v3243_v51 = vor.u32 %v3465_v5, %v3242_v30 }
 0x14c   : > { %v1698_v59 = vadd.f32 %v4660_v9, %v1676_v55  ;;  %v3218_v9 = vld [vmem:[%s5194_s11 + $0x60] sm:$0xf]  ;;  %2397 = vmatpush.bf16.msrb.mxu3 %v3255_v19  ;;  %v3450_v55 = vld [vmem:[%s5194_s11 + $0x24] sm:$0xf] }
 0x14d   : > { %v3219_v4 = vor.u32 %v3459_v42, %v3218_v9  ;;  %2369 = vmatpush.bf16.msrb.mxu2 %v3243_v51  ;;  %v3179_v9 = vor.u32 %v3449_v20, %v3178_v44  ;;  %v3180_v42 = vld [vmem:[%s5194_s11 + $0x18] sm:$0xf0] }
 0x14e   : > { %v1708_v8 = vpack.c.bf16 %v1700_v24, %v1698_v59  ;;  %v3188_v59 = vld [vmem:[%s5194_s11 + $0x28] sm:$0xf0]  ;;  %v3464_v24 = vld [vmem:[%s5196_s13 + $0x14] sm:$0xf]  ;;  %v3183_v39 = vor.u32 %v3448_v41, %v3180_v42  ;;  %v3485_v44 = vld [vmem:[%s5198_s15 + $0x38] sm:$0xff] }
 0x14f   : > { %2204 = vmatpush.bf16.msra.mxu0 %v3219_v4  ;;  %v3247_v60 = vor.u32 %v3464_v24, %v3244_v34  ;;  %v3463_v4 = vld [vmem:[%s5196_s13 + $0x4] sm:$0xf0]  ;;  %v3493_v20 = vld [vmem:[%s5198_s15 + $0x78] sm:$0xff]  ;;  %v3492_v42 = vld [vmem:[%s5198_s15 + $0x70] sm:$0xff] }
 0x150   : > { %1893 = vmatmul.bf16.gmra.mxu1 %v1708_v8  ;;  %v3191_v8 = vor.u32 %v3450_v55, %v3188_v59  ;;  %v3235_v38 = vor.u32 %v3463_v4, %v3234_v18 }
 0x151   : > { %2398 = vmatpush.bf16.msrb.mxu3 %v3247_v60 }
 0x152   : > { %2237 = vmatpush.bf16.msra.mxu1 %v3191_v8  ;;  %2370 = vmatpush.bf16.msrb.mxu2 %v3235_v38  ;;  %v3491_v38 = vld [vmem:[%s5198_s15 + $0x68] sm:$0xff] }
 0x153   : > { %2205 = vmatpush.bf16.msra.mxu0 %v3211_v45  ;;  %v3171_v45 = vor.u32 %v3447_v23, %v3170_v40 }
 0x155   : > { %2399 = vmatpush.bf16.msrb.mxu3 %v3239_v27 }
 0x156   : > { %2238 = vmatpush.bf16.msra.mxu1 %v3183_v39  ;;  %v3483_v39 = vld [vmem:[%s5198_s15 + $0x28] sm:$0xff] }
 0x157   : > { %2206 = vmatpush.bf16.msra.mxu0 %v3203_v37 }
 0x15a   : > { %2239 = vmatpush.bf16.msra.mxu1 %v3175_v28  ;;  %v3490_v28 = vld [vmem:[%s5198_s15 + $0x60] sm:$0xff] }
 0x15b   : > { %2207 = vmatpush.bf16.msra.mxu0 %v3195_v0 }
 0x15e   : > { %2622 = vmatpush.bf16.msrb.mxu1 %v3493_v20 }
 0x15f   : > { %2208 = vmatpush.bf16.msra.mxu0 %v3187_v13 }
 0x162   : > { %2623 = vmatpush.bf16.msrb.mxu1 %v3492_v42 }
 0x163   : > { %2209 = vmatpush.bf16.msra.mxu0 %v3179_v9  ;;  %v3484_v9 = vld [vmem:[%s5198_s15 + $0x30] sm:$0xff] }
 0x166   : > { %2624 = vmatpush.bf16.msrb.mxu1 %v3491_v38 }
 0x167   : > { %2210 = vmatpush.bf16.msra.mxu0 %v3171_v45  ;;  %v3482_v45 = vld [vmem:[%s5198_s15 + $0x20] sm:$0xff] }
 0x16a   : > { %2625 = vmatpush.bf16.msrb.mxu1 %v3490_v28 }
 0x16b   : > { %2593 = vmatpush.bf16.msrb.mxu0 %v3485_v44 }
 0x16f   : > { %2594 = vmatpush.bf16.msrb.mxu0 %v3484_v9 }
 0x173   : > { %v2040_v15 = vpop.f32.mrf.mxu2  ;;  %2595 = vmatpush.bf16.msrb.mxu0 %v3483_v39 }
 0x174   : > { %v2069_v35 = vpop.f32.mrf.mxu3  ;;  %v2041_v22 = vadd.f32 %v5005_v11, %v2040_v15 }
 0x176   : > { %v2070_v56 = vadd.f32 %v2069_v35, %v2041_v22  ;;  %v3489_v22 = vld [vmem:[%s5198_s15 + $0x58] sm:$0xff] }
 0x177   : > { %2596 = vmatpush.bf16.msrb.mxu0 %v3482_v45  ;;  %2626 = vmatpush.bf16.msrb.mxu1 %v3489_v22 }
 0x178   : > { %v1850_v54 = vpop.f32.mrf.mxu0 }
 0x179   : > { %v1851_v17 = vadd.f32 %v5010_v6, %v1850_v54 }
 0x17b   : > { %v2042_v21 = vpop.f32.mrf.mxu2 }
 0x17c   : > { %v2071_v53 = vpop.f32.mrf.mxu3  ;;  %v2043_v43 = vadd.f32 %v5005_v11, %v2042_v21 }
 0x17e   : > { %v2072_v10 = vadd.f32 %v2071_v53, %v2043_v43 }
 0x180   : > { %v1852_v32 = vpop.f32.mrf.mxu0 }
 0x181   : > { %v1853_v47 = vadd.f32 %v5010_v6, %v1852_v32 }
 0x184   : > { %v2045_v7 = vpop.f32.mrf.mxu2 }
 0x185   : > { %v2074_v57 = vpop.f32.mrf.mxu3  ;;  %v2046_v25 = vadd.f32 %v5005_v11, %v2045_v7 }
 0x187   : > { %v2075_v48 = vadd.f32 %v2074_v57, %v2046_v25  ;;  %v3479_v25 = vld [vmem:[%s5198_s15 + $0x8] sm:$0xff] }
 0x188   : > { %v1855_v37 = vpop.f32.mrf.mxu0 }
 0x189   : > { %v1856_v14 = vadd.f32 %v5010_v6, %v1855_v37 }
 0x18c   : > { %v2047_v1 = vpop.f32.mrf.mxu2 }
 0x18d   : > { %v2076_v0 = vpop.f32.mrf.mxu3  ;;  %v2048_v26 = vadd.f32 %v5005_v11, %v2047_v1 }
 0x18f   : > { %v2077_v5 = vadd.f32 %v2076_v0, %v2048_v26  ;;  %v3486_v26 = vld [vmem:[%s5198_s15 + $0x40] sm:$0xff] }
 0x190   : > { %v1857_v2 = vpop.f32.mrf.mxu0 }
 0x191   : > { %v1858_v19 = vadd.f32 %v5010_v6, %v1857_v2 }
 0x194   : > { %v2050_v29 = vpop.f32.mrf.mxu2 }
 0x195   : > { %v2079_v13 = vpop.f32.mrf.mxu3  ;;  %v2051_v18 = vadd.f32 %v5005_v11, %v2050_v29  ;;  %v3487_v29 = vld [vmem:[%s5198_s15 + $0x48] sm:$0xff] }
 0x197   : > { %v2080_v12 = vadd.f32 %v2079_v13, %v2051_v18 }
 0x198   : > { %v1860_v33 = vpop.f32.mrf.mxu0 }
 0x199   : > { %v1861_v4 = vadd.f32 %v5010_v6, %v1860_v33 }
 0x19b   : > { %v1879_v63 = vpop.f32.mrf.mxu1 }
 0x19c   : > { %v1880_v46 = vadd.f32 %v1879_v63, %v1851_v17  ;;  %v2052_v8 = vpop.f32.mrf.mxu2  ;;  %v3481_v63 = vld [vmem:[%s5198_s15 + $0x18] sm:$0xff] }
 0x19d   : > { %v2081_v41 = vpop.f32.mrf.mxu3  ;;  %v2053_v15 = vadd.f32 %v5005_v11, %v2052_v8  ;;  %2597 = vmatpush.bf16.msrb.mxu0 %v3481_v63  ;;  %v2117_v8 = vld [vmem:[%s5307_s30] sm:$0x3] }
 0x19e   : > { %v5016_v36 = vadd.f32 %v2070_v56, %v1880_v46  ;;  %v5112_v44 = vperm.slane %v2117_v8, 0  ;;  %v5114_v20 = vperm.slane %v2117_v8, 1 }
 0x19f   : > { %v2082_v23 = vadd.f32 %v2081_v41, %v2053_v15 }
 0x1a0   : > { %v1862_v34 = vpop.f32.mrf.mxu0 }
 0x1a1   : > { %v1863_v58 = vadd.f32 %v5010_v6, %v1862_v34 }
 0x1a3   : > { %v1881_v31 = vpop.f32.mrf.mxu1 }
 0x1a4   : > { %v1882_v52 = vadd.f32 %v1881_v31, %v1853_v47  ;;  %v2055_v27 = vpop.f32.mrf.mxu2 }
 0x1a5   : > { %v2084_v32 = vpop.f32.mrf.mxu3  ;;  %v2056_v37 = vadd.f32 %v5005_v11, %v2055_v27 }
 0x1a6   : > { %v5018_v62 = vadd.f32 %v2072_v10, %v1882_v52 }
 0x1a7   : > { %v2085_v31 = vadd.f32 %v2084_v32, %v2056_v37 }
 0x1a8   : > { %v2097_v50 = vpack.c.bf16 %v5018_v62, %v5016_v36  ;;  %v1865_v61 = vpop.f32.mrf.mxu0 }
 0x1a9   : > { %v1866_v47 = vadd.f32 %v5010_v6, %v1865_v61 }
 0x1aa   : > { %2211 = vmatmul.bf16.vlgmr.msra.gmra.mxu0 %v2097_v50  ;;  %2240 = vmatmul.bf16.vlgmr.msra.gmra.mxu1 %v2097_v50 }
 0x1ab   : > { %2371 = vmatmul.bf16.vlgmr.msrb.gmra.mxu2 %v2097_v50  ;;  %2400 = vmatmul.bf16.vlgmr.msrb.gmra.mxu3 %v2097_v50  ;;  %v1884_v16 = vpop.f32.mrf.mxu1 }
 0x1ac   : > { %v1885_v49 = vadd.f32 %v1884_v16, %v1856_v14  ;;  %v2057_v17 = vpop.f32.mrf.mxu2  ;;  %v3478_v14 = vld [vmem:[%s5198_s15] sm:$0xff] }
 0x1ad   : > { %v2058_v56 = vadd.f32 %v5005_v11, %v2057_v17  ;;  %v2086_v46 = vpop.f32.mrf.mxu3  ;;  %v3480_v11 = vld [vmem:[%s5198_s15 + $0x10] sm:$0xff] }
 0x1ae   : > { %v5026_v55 = vadd.f32 %v2075_v48, %v1885_v49  ;;  %2598 = vmatpush.bf16.msrb.mxu0 %v3480_v11  ;;  %v2277_v48 = vld [vmem:[%s5197_s14] sm:$0x3] }
 0x1af   : > { %v2087_v50 = vadd.f32 %v2086_v46, %v2058_v56  ;;  %v5103_v13 = vperm.slane %v2277_v48, 0 }
 0x1b0   : > { %v1867_v43 = vpop.f32.mrf.mxu0 }
 0x1b1   : > { %v1868_v57 = vadd.f32 %v5010_v6, %v1867_v43  ;;  %v3488_v6 = vld [vmem:[%s5198_s15 + $0x50] sm:$0xff] }
 0x1b2   : > { %2627 = vmatpush.bf16.msrb.mxu1 %v3488_v6  ;;  %2599 = vmatpush.bf16.msrb.mxu0 %v3479_v25 }
 0x1b3   : > { %v1886_v30 = vpop.f32.mrf.mxu1 }
 0x1b4   : > { %v1887_v51 = vadd.f32 %v1886_v30, %v1858_v19 }
 0x1b6   : > { %v5028_v59 = vadd.f32 %v2077_v5, %v1887_v51  ;;  %2628 = vmatpush.bf16.msrb.mxu1 %v3487_v29  ;;  %2600 = vmatpush.bf16.msrb.mxu0 %v3478_v14  ;;  %v5105_v5 = vperm.slane %v2277_v48, 1 }
 0x1b8   : > { %v2098_v24 = vpack.c.bf16 %v5028_v59, %v5026_v55 }
 0x1ba   : > { %2216 = vmatmul.bf16.gmra.mxu0 %v2098_v24  ;;  %2245 = vmatmul.bf16.gmra.mxu1 %v2098_v24 }
 0x1bb   : > { %2376 = vmatmul.bf16.gmra.mxu2 %v2098_v24  ;;  %2405 = vmatmul.bf16.gmra.mxu3 %v2098_v24  ;;  %v1889_v60 = vpop.f32.mrf.mxu1 }
 0x1bc   : > { %v1890_v40 = vadd.f32 %v1889_v60, %v1861_v4  ;;  %2629 = vmatpush.bf16.msrb.mxu1 %v3486_v26 }
 0x1be   : > { %v5060_v35 = vadd.f32 %v2080_v12, %v1890_v40 }
 0x1c3   : > { %v1891_v54 = vpop.f32.mrf.mxu1 }
 0x1c4   : > { %v1892_v3 = vadd.f32 %v1891_v54, %v1863_v58 }
 0x1c6   : > { %v5062_v21 = vadd.f32 %v2082_v23, %v1892_v3 }
 0x1c8   : > { %v2099_v53 = vpack.c.bf16 %v5062_v21, %v5060_v35 }
 0x1ca   : > { %2221 = vmatmul.bf16.gmra.mxu0 %v2099_v53  ;;  %2250 = vmatmul.bf16.gmra.mxu1 %v2099_v53 }
 0x1cb   : > { %2381 = vmatmul.bf16.gmra.mxu2 %v2099_v53  ;;  %2410 = vmatmul.bf16.gmra.mxu3 %v2099_v53 }
 0x1cd   : > { %v1894_v7 = vpop.f32.mrf.mxu1 }
 0x1ce   : > { %v1895_v10 = vadd.f32 %v1894_v7, %v1866_v47 }
 0x1d0   : > { %v5076_v2 = vadd.f32 %v2085_v31, %v1895_v10 }
 0x1d5   : > { %v1896_v52 = vpop.f32.mrf.mxu1 }
 0x1d6   : > { %v1897_v1 = vadd.f32 %v1896_v52, %v1868_v57 }
 0x1d8   : > { %v5078_v0 = vadd.f32 %v2087_v50, %v1897_v1 }
 0x1da   : > { %v2100_v16 = vpack.c.bf16 %v5078_v0, %v5076_v2 }
 0x1dc   : > { %2226 = vmatmul.bf16.gmra.mxu0 %v2100_v16  ;;  %2255 = vmatmul.bf16.gmra.mxu1 %v2100_v16 }
 0x1dd   : > { %2386 = vmatmul.bf16.gmra.mxu2 %v2100_v16  ;;  %2415 = vmatmul.bf16.gmra.mxu3 %v2100_v16 }
 0x227   : > { %v2212_v33 = vpop.f32.mrf.mxu0  ;;  %v2241_v19 = vpop.f32.mrf.mxu1 }
 0x228   : > { %v2213_v39 = vadd.f32 %v2212_v33, %v5112_v44  ;;  %v2242_v38 = vadd.f32 %v2241_v19, %v5114_v20 }
 0x22e   : > { %v2372_v49 = vpop.f32.mrf.mxu2  ;;  %v2401_v30 = vpop.f32.mrf.mxu3 }
 0x22f   : > { %v2214_v51 = vpop.f32.mrf.mxu0  ;;  %v2243_v24 = vpop.f32.mrf.mxu1  ;;  %v2373_v34 = vadd.f32 %v2372_v49, %v5103_v13  ;;  %v2402_v60 = vadd.f32 %v2401_v30, %v5105_v5 }
 0x230   : > { %v2215_v58 = vadd.f32 %v2214_v51, %v5112_v44  ;;  %v2244_v12 = vadd.f32 %v2243_v24, %v5114_v20 }
 0x231   : > { %v2421_v42 = vmax.f32 %v2373_v34, 0.0  ;;  %v2422_v18 = vmax.f32 %v2402_v60, 0.0 }
 0x233   : > { %v2437_v3 = vmul.f32 %v2421_v42, %v2213_v39  ;;  %v2438_v61 = vmul.f32 %v2422_v18, %v2242_v38 }
 0x236   : > { %v2374_v41 = vpop.f32.mrf.mxu2  ;;  %v2403_v9 = vpop.f32.mrf.mxu3 }
 0x237   : > { %v2375_v4 = vadd.f32 %v2374_v41, %v5103_v13  ;;  %v2404_v15 = vadd.f32 %v2403_v9, %v5105_v5  ;;  %v2217_v27 = vpop.f32.mrf.mxu0  ;;  %v2246_v23 = vpop.f32.mrf.mxu1 }
 0x238   : > { %v2218_v52 = vadd.f32 %v2217_v27, %v5112_v44  ;;  %v2247_v50 = vadd.f32 %v2246_v23, %v5114_v20 }
 0x239   : > { %v2423_v40 = vmax.f32 %v2375_v4, 0.0  ;;  %v2424_v54 = vmax.f32 %v2404_v15, 0.0 }
 0x23b   : > { %v2439_v45 = vmul.f32 %v2423_v40, %v2215_v58  ;;  %v2440_v28 = vmul.f32 %v2424_v54, %v2244_v12 }
 0x23d   : > { %v2453_v32 = vpack.c.bf16 %v2439_v45, %v2437_v3  ;;  %v2454_v53 = vpack.c.bf16 %v2440_v28, %v2438_v61 }
 0x23e   : > { %v2377_v63 = vpop.f32.mrf.mxu2  ;;  %v2406_v22 = vpop.f32.mrf.mxu3 }
 0x23f   : > { %2601 = vmatmul.bf16.vlgmr.msrb.gmra.mxu0 %v2453_v32  ;;  %2630 = vmatmul.bf16.vlgmr.msrb.gmra.mxu1 %v2454_v53  ;;  %v2219_v7 = vpop.f32.mrf.mxu0  ;;  %v2248_v17 = vpop.f32.mrf.mxu1  ;;  %v2378_v37 = vadd.f32 %v2377_v63, %v5103_v13  ;;  %v2407_v43 = vadd.f32 %v2406_v22, %v5105_v5 }
 0x240   : > { %v2220_v1 = vadd.f32 %v2219_v7, %v5112_v44  ;;  %v2249_v16 = vadd.f32 %v2248_v17, %v5114_v20 }
 0x241   : > { %v2425_v46 = vmax.f32 %v2378_v37, 0.0  ;;  %v2426_v57 = vmax.f32 %v2407_v43, 0.0 }
 0x243   : > { %v2441_v14 = vmul.f32 %v2425_v46, %v2218_v52  ;;  %v2442_v26 = vmul.f32 %v2426_v57, %v2247_v50 }
 0x246   : > { %v2379_v47 = vpop.f32.mrf.mxu2  ;;  %v2408_v56 = vpop.f32.mrf.mxu3 }
 0x247   : > { %v2380_v31 = vadd.f32 %v2379_v47, %v5103_v13  ;;  %v2409_v10 = vadd.f32 %v2408_v56, %v5105_v5  ;;  %v2222_v25 = vpop.f32.mrf.mxu0  ;;  %v2251_v29 = vpop.f32.mrf.mxu1 }
 0x248   : > { %v2223_v39 = vadd.f32 %v2222_v25, %v5112_v44  ;;  %v2252_v38 = vadd.f32 %v2251_v29, %v5114_v20 }
 0x249   : > { %v2427_v11 = vmax.f32 %v2380_v31, 0.0  ;;  %v2428_v6 = vmax.f32 %v2409_v10, 0.0 }
 0x24b   : > { %v2443_v33 = vmul.f32 %v2427_v11, %v2220_v1  ;;  %v2444_v19 = vmul.f32 %v2428_v6, %v2249_v16 }
 0x24d   : > { %v2455_v48 = vpack.c.bf16 %v2443_v33, %v2441_v14  ;;  %v2456_v49 = vpack.c.bf16 %v2444_v19, %v2442_v26 }
 0x24e   : > { %v2382_v30 = vpop.f32.mrf.mxu2  ;;  %v2411_v51 = vpop.f32.mrf.mxu3 }
 0x24f   : > { %2606 = vmatmul.bf16.gmra.mxu0 %v2455_v48  ;;  %2635 = vmatmul.bf16.gmra.mxu1 %v2456_v49  ;;  %v2383_v24 = vadd.f32 %v2382_v30, %v5103_v13  ;;  %v2412_v8 = vadd.f32 %v2411_v51, %v5105_v5  ;;  %v2224_v34 = vpop.f32.mrf.mxu0  ;;  %v2253_v60 = vpop.f32.mrf.mxu1 }
 0x250   : > { %v2225_v58 = vadd.f32 %v2224_v34, %v5112_v44  ;;  %v2254_v12 = vadd.f32 %v2253_v60, %v5114_v20 }
 0x251   : > { %v2429_v42 = vmax.f32 %v2383_v24, 0.0  ;;  %v2430_v18 = vmax.f32 %v2412_v8, 0.0 }
 0x253   : > { %v2445_v27 = vmul.f32 %v2429_v42, %v2223_v39  ;;  %v2446_v23 = vmul.f32 %v2430_v18, %v2252_v38 }
 0x256   : > { %v2384_v41 = vpop.f32.mrf.mxu2  ;;  %v2413_v9 = vpop.f32.mrf.mxu3 }
 0x257   : > { %v2385_v4 = vadd.f32 %v2384_v41, %v5103_v13  ;;  %v2414_v15 = vadd.f32 %v2413_v9, %v5105_v5 }
 0x259   : > { %v2431_v40 = vmax.f32 %v2385_v4, 0.0  ;;  %v2432_v54 = vmax.f32 %v2414_v15, 0.0  ;;  %v2227_v45 = vpop.f32.mrf.mxu0  ;;  %v2256_v28 = vpop.f32.mrf.mxu1 }
 0x25a   : > { %v2228_v52 = vadd.f32 %v2227_v45, %v5112_v44  ;;  %v2257_v50 = vadd.f32 %v2256_v28, %v5114_v20 }
 0x25b   : > { %v2447_v3 = vmul.f32 %v2431_v40, %v2225_v58  ;;  %v2448_v61 = vmul.f32 %v2432_v54, %v2254_v12 }
 0x25d   : > { %v2457_v32 = vpack.c.bf16 %v2447_v3, %v2445_v27  ;;  %v2458_v53 = vpack.c.bf16 %v2448_v61, %v2446_v23 }
 0x25f   : > { %2611 = vmatmul.bf16.gmra.mxu0 %v2457_v32  ;;  %2640 = vmatmul.bf16.gmra.mxu1 %v2458_v53 }
 0x260   : > { %v2387_v63 = vpop.f32.mrf.mxu2  ;;  %v2416_v22 = vpop.f32.mrf.mxu3 }
 0x261   : > { %v2388_v7 = vadd.f32 %v2387_v63, %v5103_v13  ;;  %v2417_v17 = vadd.f32 %v2416_v22, %v5105_v5  ;;  %v2229_v37 = vpop.f32.mrf.mxu0  ;;  %v2258_v43 = vpop.f32.mrf.mxu1 }
 0x262   : > { %v2230_v1 = vadd.f32 %v2229_v37, %v5112_v44  ;;  %v2259_v16 = vadd.f32 %v2258_v43, %v5114_v20  ;;  %v3575_v44 = vld [vmem:[%s5310_s22] ss:$0 sm:$0xff] }
 0x263   : > { %v2433_v46 = vmax.f32 %v2388_v7, 0.0  ;;  %v2434_v57 = vmax.f32 %v2417_v17, 0.0 }
 0x265   : > { %v2449_v25 = vmul.f32 %v2433_v46, %v2228_v52  ;;  %v2450_v29 = vmul.f32 %v2434_v57, %v2257_v50 }
 0x268   : > { %v2389_v47 = vpop.f32.mrf.mxu2  ;;  %v2418_v56 = vpop.f32.mrf.mxu3 }
 0x269   : > { %v2390_v31 = vadd.f32 %v2389_v47, %v5103_v13  ;;  %v2419_v10 = vadd.f32 %v2418_v56, %v5105_v5 }
 0x26b   : > { %v2435_v11 = vmax.f32 %v2390_v31, 0.0  ;;  %v2436_v6 = vmax.f32 %v2419_v10, 0.0 }
 0x26d   : > { %v2451_v14 = vmul.f32 %v2435_v11, %v2230_v1  ;;  %v2452_v26 = vmul.f32 %v2436_v6, %v2259_v16 }
 0x26f   : > { %v2459_v33 = vpack.c.bf16 %v2451_v14, %v2449_v25  ;;  %v2460_v13 = vpack.c.bf16 %v2452_v26, %v2450_v29 }
 0x271   : > { %2616 = vmatmul.bf16.gmra.mxu0 %v2459_v33  ;;  %2645 = vmatmul.bf16.gmra.mxu1 %v2460_v13 }
 0x2bc   : > { %v2602_v5 = vpop.f32.mrf.mxu0  ;;  %v2631_v19 = vpop.f32.mrf.mxu1 }
 0x2bd   : > { %v2603_v48 = vadd.f32 %v3575_v44, %v2602_v5 }
 0x2bf   : > { %v2632_v49 = vadd.f32 %v2631_v19, %v2603_v48 }
 0x2c1   : > { %v2651_v8 = vadd.f32 %v2632_v49, %v5016_v36 }
 0x2c4   : > { %v2604_v20 = vpop.f32.mrf.mxu0  ;;  %v2633_v51 = vpop.f32.mrf.mxu1 }
 0x2c5   : > { %v2605_v30 = vadd.f32 %v3575_v44, %v2604_v20 }
 0x2c7   : > { %v2634_v24 = vadd.f32 %v2633_v51, %v2605_v30 }
 0x2c9   : > { %v2652_v34 = vadd.f32 %v2634_v24, %v5018_v62 }
 0x2cb   : > { %v3497_v60 = vpack.c.bf16 %v2652_v34, %v2651_v8 }
 0x2cc   : > { %v2607_v41 = vpop.f32.mrf.mxu0  ;;  %v2636_v9 = vpop.f32.mrf.mxu1 }
 0x2cd   : > { %3498 = vst [vmem:[%s5156_s21] sm:$0xff] %v3497_v60   ;;  %v2608_v42 = vadd.f32 %v3575_v44, %v2607_v41 }
 0x2cf   : > { %v2637_v15 = vadd.f32 %v2636_v9, %v2608_v42 }
 0x2d1   : > { %v2653_v36 = vadd.f32 %v2637_v15, %v5026_v55 }
 0x2d4   : > { %v2609_v18 = vpop.f32.mrf.mxu0  ;;  %v2638_v4 = vpop.f32.mrf.mxu1 }
 0x2d5   : > { %v2610_v39 = vadd.f32 %v3575_v44, %v2609_v18 }
 0x2d7   : > { %v2639_v38 = vadd.f32 %v2638_v4, %v2610_v39 }
 0x2d9   : > { %v2654_v62 = vadd.f32 %v2639_v38, %v5028_v59 }
 0x2db   : > { %v3502_v58 = vpack.c.bf16 %v2654_v62, %v2653_v36 }
 0x2dc   : > { %v2612_v12 = vpop.f32.mrf.mxu0  ;;  %v2641_v40 = vpop.f32.mrf.mxu1 }
 0x2dd   : > { %3514 = vst [vmem:[%s5156_s21 + $0x8] sm:$0xff] %v3502_v58   ;;  %v2613_v54 = vadd.f32 %v3575_v44, %v2612_v12 }
 0x2df   : > { %v2642_v3 = vadd.f32 %v2641_v40, %v2613_v54 }
 0x2e1   : > { %v2655_v28 = vadd.f32 %v2642_v3, %v5060_v35 }
 0x2e4   : > { %v2614_v27 = vpop.f32.mrf.mxu0  ;;  %v2643_v23 = vpop.f32.mrf.mxu1 }
 0x2e5   : > { %v2615_v61 = vadd.f32 %v3575_v44, %v2614_v27 }
 0x2e7   : > { %v2644_v45 = vadd.f32 %v2643_v23, %v2615_v61 }
 0x2e9   : > { %v2656_v32 = vadd.f32 %v2644_v45, %v5062_v21 }
 0x2eb   : > { %v3507_v53 = vpack.c.bf16 %v2656_v32, %v2655_v28 }
 0x2ed   : > { %3515 = vst [vmem:[%s5156_s21 + $0x10] sm:$0xff] %v3507_v53  }
 0x2ee   : > { %v2617_v55 = vpop.f32.mrf.mxu0  ;;  %v2646_v63 = vpop.f32.mrf.mxu1 }
 0x2ef   : > { %v2618_v59 = vadd.f32 %v3575_v44, %v2617_v55 }
 0x2f1   : > { %v2647_v7 = vadd.f32 %v2646_v63, %v2618_v59 }
 0x2f3   : > { %v2657_v47 = vadd.f32 %v2647_v7, %v5076_v2 }
 0x2f6   : > { %v2619_v22 = vpop.f32.mrf.mxu0  ;;  %v2648_v37 = vpop.f32.mrf.mxu1 }
 0x2f7   : > { %v2620_v17 = vadd.f32 %v3575_v44, %v2619_v22 }
 0x2f9   : > { %v2649_v43 = vadd.f32 %v2648_v37, %v2620_v17 }
 0x2fb   : > { %v2658_v56 = vadd.f32 %v2649_v43, %v5078_v0 }
 0x2fd   : > { %v3512_v46 = vpack.c.bf16 %v2658_v56, %v2657_v47 }
 0x2ff   : > { %3516 = vst [vmem:[%s5156_s21 + $0x18] sm:$0xff] %v3512_v46  }
 0x300 PF: > { %s5312_s20 = sld [smem:[#allocation4_spill]] }
 0x301   : > { %s5313_s24 = sld [smem:[#allocation2_spill]] }
 0x302   : > { %s5314_s25 = sld [smem:[#allocation3_spill]] }
 0x303   : > { %s5315_s26 = sld [smem:[#allocation5_spill]] }
 0x304   : > { %s5316_s27 = sld [smem:[#allocation6_spill]] }
 0x306   : > { %s27_s28 = sadd.s32 1, %s5312_s20  }
 0x307   : > { %p24_p12 = scmp.ge.s32.totalorder %s27_s28, 10  }
 0x309   :  { %26 = sbr.rel (!%p24_p12) target bundleno = 6 (0x6), region = 132 }

</bundles_post_ra>
